<compile_context>
chip_gen: v7x
topology: tpu7x:2x2x1
jax: 0.10.0
libtpu: 0.0.40
codegen_flags: <defaults>
</compile_context>

<pallas_src>
import functools

import jax
import jax.numpy as jnp
import numpy as np
from jax.experimental import pallas as pl
from jax.experimental.pallas import tpu as pltpu

EPS = 1e-5           # nn.LayerNorm default
LEAKY_SLOPE = 0.01   # nn.LeakyReLU default


def _device_info():
    """(physical VMEM bytes, TensorCores per chip) for the local device."""
    try:
        kind = jax.devices()[0].device_kind.lower()
    except Exception:  # no device info available; assume 128 MiB / 1 TC
        kind = ""
    is_v7 = "v7" in kind
    vmem_bytes = (64 if is_v7 else 128) * (2 ** 20)
    n_cores = 2 if is_v7 else 1
    return vmem_bytes, n_cores


def _pick_batch_block(B, H, W, C, vmem_bytes, n_cores):
    """Images per grid step: big enough that M = BB*H*W amortizes per-step
    overhead, small enough to fit the VMEM working set, and leaving >= 2 grid
    steps per TensorCore (input/output pipelining; megacore on 2-TC parts)."""
    hw = H * W
    # Per-pixel working set: f32 {x, xn, conv acc, y} + bf16 {3 dx-shifted
    # copies + rolled tap} + double-buffered f32 in/out blocks  ~= C * 40 bytes.
    bytes_per_img = hw * C * 40
    bb_vmem = max(1, int(vmem_bytes * 0.6) // max(1, 2 * bytes_per_img))
    bb_rows = max(1, 16384 // hw)          # cap M ~= 16K matmul rows per step
    bb = max(1, min(B, bb_vmem, bb_rows))
    min_steps = 2 * n_cores
    if B >= min_steps:
        bb = min(bb, B // min_steps)
    elif B >= 2:
        bb = min(bb, max(1, B // 2))
    while B % bb:
        bb -= 1
    return bb


def _vmem_limit(BB, H, W, C, Cr, vmem_bytes):
    blk = BB * H * W * C * 4                                   # one f32 I/O block
    work = BB * H * W * C * 40                                  # in-kernel temporaries
    weights = 2 * 9 * C * C * 2 + 4 * (C * Cr * 2 + 3 * C + Cr)
    want = 4 * blk + 2 * work + weights                         # headroom x2 on temps
    return int(min(vmem_bytes * 3 // 4, max(32 * (2 ** 20), want)))


@functools.lru_cache(maxsize=None)
def _build_rcab_call(B, H, W, C, Cr, out_dtype, BB, vmem_limit):
    HW = H * W
    M = BB * HW

    def conv3x3(t, w_ref, b_ref):
        # t: (M, C) f32 -> (M, C) f32.  3x3 conv, circular (wrap) padding.
        # tap(dy,dx)[h, w] = t[(h+dy-1) % H, (w+dx-1) % W]
        #   * W wrap: roll (BB*H, W, C) by +1/-1 along axis 1  (unaligned, f32, 2x)
        #   * H wrap: roll (BB, HW, C) by +W/-W along axis 1   (8-aligned, bf16, 6x)
        # Weight block index = kx*3 + ky (wrapper pre-permutes ky/kx).
        t_w = t.reshape(BB * H, W, C)
        acc = None
        for kx, sx in ((0, 1), (1, 0), (2, -1)):          # dx = 0, 1, 2
            tw = t_w if sx == 0 else jnp.roll(t_w, sx, axis=1)
            tw = tw.reshape(BB, HW, C).astype(jnp.bfloat16)     # one cast per dx
            for ky, sy in ((0, W), (1, 0), (2, -W)):      # dy = 0, 1, 2
                th = tw if sy == 0 else jnp.roll(tw, sy, axis=1)
                part = jnp.dot(th.reshape(M, C), w_ref[kx * 3 + ky],
                               preferred_element_type=jnp.float32)
                acc = part if acc is None else acc + part
        return acc + b_ref[...]                            # (M, C) f32

    def kernel(x_ref, gamma_ref, beta_ref, w1_ref, b1_ref, w2_ref, b2_ref,
               wf1_ref, bf1_ref, wf2_ref, bf2_ref, o_ref):
        xin = x_ref[...].astype(jnp.float32)               # (BB, H, W, C)
        xf = xin.reshape(M, C)

        # ---- LayerNorm over C: one pass sums, overlapping lane reductions ----
        s1 = jnp.sum(xf, axis=-1, keepdims=True)
        s2 = jnp.sum(xf * xf, axis=-1, keepdims=True)
        mean = s1 * (1.0 / C)
        var = s2 * (1.0 / C) - mean * mean
        inv = jax.lax.rsqrt(var + EPS)
        xn = (xf - mean) * inv
        xn = xn * gamma_ref[...] + beta_ref[...]

        # ---- conv1 -> LeakyReLU -> conv2 (bf16 MXU operands, f32 accumulate) ----
        y = conv3x3(xn, w1_ref, b1_ref)
        y = jnp.maximum(y, LEAKY_SLOPE * y)
        y = conv3x3(y, w2_ref, b2_ref)

        # ---- SE: GAP over HW -> FC -> ReLU -> FC -> sigmoid -> channel scale ----
        y = y.reshape(BB, HW, C)
        pooled = jnp.mean(y, axis=1)                       # (BB, C)
        h = jnp.dot(pooled, wf1_ref[...],
                    preferred_element_type=jnp.float32) + bf1_ref[...]
        h = jnp.maximum(h, 0.0)
        s = jnp.dot(h, wf2_ref[...],
                    preferred_element_type=jnp.float32) + bf2_ref[...]
        s = jax.nn.sigmoid(s)                              # (BB, C), EUP
        y = y * s[:, None, :]

        # ---- residual ----
        o_ref[...] = (xin + y.reshape(BB, H, W, C)).astype(o_ref.dtype)

    def full(shape):
        n = len(shape)
        return pl.BlockSpec(shape, lambda *_: (0,) * n)

    in_specs = [
        pl.BlockSpec((BB, H, W, C), lambda b: (b, 0, 0, 0)),   # x
        full((1, C)), full((1, C)),                            # LN gamma, beta
        full((9, C, C)), full((1, C)),                         # conv1 w (bf16), b
        full((9, C, C)), full((1, C)),                         # conv2 w (bf16), b
        full((C, Cr)), full((1, Cr)),                          # SE fc1 w, b
        full((Cr, C)), full((1, C)),                           # SE fc2 w, b
    ]
    out_spec = pl.BlockSpec((BB, H, W, C), lambda b: (b, 0, 0, 0))

    return pl.pallas_call(
        kernel,
        out_shape=jax.ShapeDtypeStruct((B, H, W, C), out_dtype),
        grid=(B // BB,),
        in_specs=in_specs,
        out_specs=out_spec,
        compiler_params=pltpu.CompilerParams(
            dimension_semantics=("parallel",),
            vmem_limit_bytes=vmem_limit,
        ),
    )


def _rcab_forward(x, params):
    gamma, beta, w1, b1, w2, b2, wf1, bf1, wf2, bf2 = params
    B, H, W, C = x.shape
    Cr = wf1.shape[1]

    vmem_bytes, n_cores = _device_info()
    BB = _pick_batch_block(B, H, W, C, vmem_bytes, n_cores)
    vmem_limit = _vmem_limit(BB, H, W, C, Cr, vmem_bytes)

    def prep(w):
        # (3, 3, Cin, Cout) HWIO -> (kx, ky, Cin, Cout) -> (9, Cin, Cout) bf16;
        # block k = kx*3 + ky matches the dx-outer / dy-inner tap order.
        return (jnp.transpose(jnp.asarray(w, jnp.float32), (1, 0, 2, 3))
                .reshape(9, C, C).astype(jnp.bfloat16))

    call = _build_rcab_call(B, H, W, C, Cr, x.dtype, BB, vmem_limit)
    return call(x, gamma, beta, prep(w1), b1, prep(w2), b2, wf1, bf1, wf2, bf2)


rcab_pallas = jax.jit(_rcab_forward)


# ---------------- pure-JAX reference (for correctness check) ----------------
def rcab_ref(x, params):
    gamma, beta, w1, b1, w2, b2, wf1, bf1, wf2, bf2 = params
    mean = x.mean(-1, keepdims=True)
    var = ((x - mean) ** 2).mean(-1, keepdims=True)
    xn = (x - mean) / jnp.sqrt(var + EPS) * gamma[0] + beta[0]

    def conv(t, w, b):
        p = jnp.pad(t, ((0, 0), (1, 1), (1, 1), (0, 0)), mode="wrap")
        out = jax.lax.conv_general_dilated(
            p, w, (1, 1), "VALID",
            dimension_numbers=("NHWC", "HWIO", "NHWC"))
        return out + b[0]

    y = conv(xn, w1, b1)
    y = jnp.where(y >= 0, y, LEAKY_SLOPE * y)
    y = conv(y, w2, b2)
    pooled = y.mean(axis=(1, 2))                                   # (B, C)
    h = jnp.maximum(pooled @ wf1 + bf1[0], 0.0)
    s = jax.nn.sigmoid(h @ wf2 + bf2[0])                           # (B, C)
    y = y * s[:, None, None, :]
    return x + y


if __name__ == "__main__":
    B, H, W, C, R = 2, 16, 16, 32, 4
    Cr = C // R

    key = jax.random.PRNGKey(0)
    ks = jax.random.split(key, 12)
    x = jax.random.normal(ks[0], (B, H, W, C), jnp.float32)

    # deterministic synthetic parameters (shapes match the nn.Module __init__)
    conv_scale = 1.0 / np.sqrt(C * 9)
    fc1_scale = 1.0 / np.sqrt(C)
    fc2_scale = 1.0 / np.sqrt(Cr)
    gamma = 1.0 + 0.1 * jax.random.normal(ks[1], (1, C), jnp.float32)
    beta = 0.1 * jax.random.normal(ks[2], (1, C), jnp.float32)
    w1 = conv_scale * jax.random.uniform(ks[3], (3, 3, C, C), jnp.float32, -1.0, 1.0)
    b1 = conv_scale * jax.random.uniform(ks[4], (1, C), jnp.float32, -1.0, 1.0)
    w2 = conv_scale * jax.random.uniform(ks[5], (3, 3, C, C), jnp.float32, -1.0, 1.0)
    b2 = conv_scale * jax.random.uniform(ks[6], (1, C), jnp.float32, -1.0, 1.0)
    wf1 = fc1_scale * jax.random.uniform(ks[7], (C, Cr), jnp.float32, -1.0, 1.0)
    bf1 = fc1_scale * jax.random.uniform(ks[8], (1, Cr), jnp.float32, -1.0, 1.0)
    wf2 = fc2_scale * jax.random.uniform(ks[9], (Cr, C), jnp.float32, -1.0, 1.0)
    bf2 = fc2_scale * jax.random.uniform(ks[10], (1, C), jnp.float32, -1.0, 1.0)

    params = (gamma, beta, w1, b1, w2, b2, wf1, bf1, wf2, bf2)

    out = rcab_pallas(x, params)
    jax.block_until_ready(out)

    ref = rcab_ref(x, params)
    # bf16 MXU operands (f32 accumulate) vs the all-f32 reference.
    np.testing.assert_allclose(np.asarray(out), np.asarray(ref), rtol=2e-2, atol=3e-2)

    print("KERNEL_OK")
</pallas_src>

<mosaic_0001>
module attributes {stable_mosaic.version = 11 : i64} {
  func.func @kernel(%arg0: i32, %arg1: memref<1x16x16x32xf32, #tpu.memory_space<vmem>>, %arg2: memref<1x32xf32, #tpu.memory_space<vmem>>, %arg3: memref<1x32xf32, #tpu.memory_space<vmem>>, %arg4: memref<9x32x32xbf16, #tpu.memory_space<vmem>>, %arg5: memref<1x32xf32, #tpu.memory_space<vmem>>, %arg6: memref<9x32x32xbf16, #tpu.memory_space<vmem>>, %arg7: memref<1x32xf32, #tpu.memory_space<vmem>>, %arg8: memref<32x8xf32, #tpu.memory_space<vmem>>, %arg9: memref<1x8xf32, #tpu.memory_space<vmem>>, %arg10: memref<8x32xf32, #tpu.memory_space<vmem>>, %arg11: memref<1x32xf32, #tpu.memory_space<vmem>>, %arg12: memref<1x16x16x32xf32, #tpu.memory_space<vmem>>) attributes {dimension_semantics = [#tpu.dimension_semantics<parallel>], iteration_bounds = array<i64: 2>, scalar_prefetch = 0 : i64, scratch_operands = 0 : i64, tpu.core_type = #tpu.core_type<tc>, window_params = [{transform_indices = @transform_0, window_bounds = array<i64: 1, 16, 16, 32>}, {pipeline_mode = #tpu.pipeline_mode<synchronous>, transform_indices = @transform_1, window_bounds = array<i64: 1, 32>}, {pipeline_mode = #tpu.pipeline_mode<synchronous>, transform_indices = @transform_2, window_bounds = array<i64: 1, 32>}, {pipeline_mode = #tpu.pipeline_mode<synchronous>, transform_indices = @transform_3, window_bounds = array<i64: 9, 32, 32>}, {pipeline_mode = #tpu.pipeline_mode<synchronous>, transform_indices = @transform_4, window_bounds = array<i64: 1, 32>}, {pipeline_mode = #tpu.pipeline_mode<synchronous>, transform_indices = @transform_5, window_bounds = array<i64: 9, 32, 32>}, {pipeline_mode = #tpu.pipeline_mode<synchronous>, transform_indices = @transform_6, window_bounds = array<i64: 1, 32>}, {pipeline_mode = #tpu.pipeline_mode<synchronous>, transform_indices = @transform_7, window_bounds = array<i64: 32, 8>}, {pipeline_mode = #tpu.pipeline_mode<synchronous>, transform_indices = @transform_8, window_bounds = array<i64: 1, 8>}, {pipeline_mode = #tpu.pipeline_mode<synchronous>, transform_indices = @transform_9, window_bounds = array<i64: 8, 32>}, {pipeline_mode = #tpu.pipeline_mode<synchronous>, transform_indices = @transform_10, window_bounds = array<i64: 1, 32>}, {transform_indices = @transform_11, window_bounds = array<i64: 1, 16, 16, 32>}]} {
    %c0 = arith.constant 0 : index
    %c0_0 = arith.constant 0 : index
    %c0_1 = arith.constant 0 : index
    %c0_2 = arith.constant 0 : index
    %0 = vector.load %arg1[%c0, %c0_0, %c0_1, %c0_2] : memref<1x16x16x32xf32, #tpu.memory_space<vmem>>, vector<1x16x16x32xf32>
    %1 = vector.shape_cast %0 : vector<1x16x16x32xf32> to vector<256x32xf32>
    %cst = arith.constant dense<0.000000e+00> : vector<256xf32>
    %2 = vector.multi_reduction <add>, %1, %cst [1] : vector<256x32xf32> to vector<256xf32>
    %3 = vector.shape_cast %2 : vector<256xf32> to vector<256x1xf32>
    %4 = arith.mulf %1, %1 : vector<256x32xf32>
    %cst_3 = arith.constant dense<0.000000e+00> : vector<256xf32>
    %5 = vector.multi_reduction <add>, %4, %cst_3 [1] : vector<256x32xf32> to vector<256xf32>
    %6 = vector.shape_cast %5 : vector<256xf32> to vector<256x1xf32>
    %cst_4 = arith.constant 3.125000e-02 : f32
    %7 = vector.broadcast %cst_4 : f32 to vector<256x1xf32>
    %8 = arith.mulf %3, %7 : vector<256x1xf32>
    %cst_5 = arith.constant 3.125000e-02 : f32
    %9 = vector.broadcast %cst_5 : f32 to vector<256x1xf32>
    %10 = arith.mulf %6, %9 : vector<256x1xf32>
    %11 = arith.mulf %8, %8 : vector<256x1xf32>
    %12 = arith.subf %10, %11 : vector<256x1xf32>
    %cst_6 = arith.constant 9.99999974E-6 : f32
    %13 = vector.broadcast %cst_6 : f32 to vector<256x1xf32>
    %14 = arith.addf %12, %13 : vector<256x1xf32>
    %15 = math.rsqrt %14 : vector<256x1xf32>
    %16 = vector.broadcast %8 : vector<256x1xf32> to vector<256x32xf32>
    %17 = arith.subf %1, %16 : vector<256x32xf32>
    %18 = vector.broadcast %15 : vector<256x1xf32> to vector<256x32xf32>
    %19 = arith.mulf %17, %18 : vector<256x32xf32>
    %c0_7 = arith.constant 0 : index
    %c0_8 = arith.constant 0 : index
    %20 = vector.load %arg2[%c0_7, %c0_8] : memref<1x32xf32, #tpu.memory_space<vmem>>, vector<1x32xf32>
    %21 = vector.broadcast %20 : vector<1x32xf32> to vector<256x32xf32>
    %22 = arith.mulf %19, %21 : vector<256x32xf32>
    %c0_9 = arith.constant 0 : index
    %c0_10 = arith.constant 0 : index
    %23 = vector.load %arg3[%c0_9, %c0_10] : memref<1x32xf32, #tpu.memory_space<vmem>>, vector<1x32xf32>
    %24 = vector.broadcast %23 : vector<1x32xf32> to vector<256x32xf32>
    %25 = arith.addf %22, %24 : vector<256x32xf32>
    %26 = vector.shape_cast %25 : vector<256x32xf32> to vector<16x16x32xf32>
    %27 = vector.extract_strided_slice %26 {offsets = [0, 15, 0], sizes = [16, 1, 32], strides = [1, 1, 1]} : vector<16x16x32xf32> to vector<16x1x32xf32>
    %28 = vector.extract_strided_slice %26 {offsets = [0, 0, 0], sizes = [16, 15, 32], strides = [1, 1, 1]} : vector<16x16x32xf32> to vector<16x15x32xf32>
    %29 = tpu.concatenate %27, %28 in 1 : vector<16x1x32xf32>, vector<16x15x32xf32> -> vector<16x16x32xf32>
    %30 = vector.shape_cast %29 : vector<16x16x32xf32> to vector<1x256x32xf32>
    %31 = arith.truncf %30 : vector<1x256x32xf32> to vector<1x256x32xbf16>
    %32 = vector.extract_strided_slice %31 {offsets = [0, 240, 0], sizes = [1, 16, 32], strides = [1, 1, 1]} : vector<1x256x32xbf16> to vector<1x16x32xbf16>
    %33 = vector.extract_strided_slice %31 {offsets = [0, 0, 0], sizes = [1, 240, 32], strides = [1, 1, 1]} : vector<1x256x32xbf16> to vector<1x240x32xbf16>
    %34 = tpu.concatenate %32, %33 in 1 : vector<1x16x32xbf16>, vector<1x240x32xbf16> -> vector<1x256x32xbf16>
    %35 = vector.shape_cast %34 : vector<1x256x32xbf16> to vector<256x32xbf16>
    %c0_11 = arith.constant 0 : index
    %c0_12 = arith.constant 0 : index
    %c0_13 = arith.constant 0 : index
    %36 = vector.load %arg4[%c0_11, %c0_12, %c0_13] : memref<9x32x32xbf16, #tpu.memory_space<vmem>>, vector<1x32x32xbf16>
    %37 = vector.shape_cast %36 : vector<1x32x32xbf16> to vector<32x32xbf16>
    %cst_14 = arith.constant dense<0.000000e+00> : vector<256x32xf32>
    %38 = tpu.matmul %35, %37, %cst_14 {dimension_numbers = #tpu.dot_dimension_numbers<[1], [0], [0], [1], [0, 0, 1, 1], [], []>} : vector<256x32xbf16>, vector<32x32xbf16>, vector<256x32xf32> -> vector<256x32xf32>
    %39 = vector.shape_cast %31 : vector<1x256x32xbf16> to vector<256x32xbf16>
    %c1 = arith.constant 1 : index
    %c0_15 = arith.constant 0 : index
    %c0_16 = arith.constant 0 : index
    %40 = vector.load %arg4[%c1, %c0_15, %c0_16] : memref<9x32x32xbf16, #tpu.memory_space<vmem>>, vector<1x32x32xbf16>
    %41 = vector.shape_cast %40 : vector<1x32x32xbf16> to vector<32x32xbf16>
    %cst_17 = arith.constant dense<0.000000e+00> : vector<256x32xf32>
    %42 = tpu.matmul %39, %41, %cst_17 {dimension_numbers = #tpu.dot_dimension_numbers<[1], [0], [0], [1], [0, 0, 1, 1], [], []>} : vector<256x32xbf16>, vector<32x32xbf16>, vector<256x32xf32> -> vector<256x32xf32>
    %43 = arith.addf %38, %42 : vector<256x32xf32>
    %44 = vector.extract_strided_slice %31 {offsets = [0, 16, 0], sizes = [1, 240, 32], strides = [1, 1, 1]} : vector<1x256x32xbf16> to vector<1x240x32xbf16>
    %45 = vector.extract_strided_slice %31 {offsets = [0, 0, 0], sizes = [1, 16, 32], strides = [1, 1, 1]} : vector<1x256x32xbf16> to vector<1x16x32xbf16>
    %46 = tpu.concatenate %44, %45 in 1 : vector<1x240x32xbf16>, vector<1x16x32xbf16> -> vector<1x256x32xbf16>
    %47 = vector.shape_cast %46 : vector<1x256x32xbf16> to vector<256x32xbf16>
    %c2 = arith.constant 2 : index
    %c0_18 = arith.constant 0 : index
    %c0_19 = arith.constant 0 : index
    %48 = vector.load %arg4[%c2, %c0_18, %c0_19] : memref<9x32x32xbf16, #tpu.memory_space<vmem>>, vector<1x32x32xbf16>
    %49 = vector.shape_cast %48 : vector<1x32x32xbf16> to vector<32x32xbf16>
    %cst_20 = arith.constant dense<0.000000e+00> : vector<256x32xf32>
    %50 = tpu.matmul %47, %49, %cst_20 {dimension_numbers = #tpu.dot_dimension_numbers<[1], [0], [0], [1], [0, 0, 1, 1], [], []>} : vector<256x32xbf16>, vector<32x32xbf16>, vector<256x32xf32> -> vector<256x32xf32>
    %51 = arith.addf %43, %50 : vector<256x32xf32>
    %52 = vector.shape_cast %26 : vector<16x16x32xf32> to vector<1x256x32xf32>
    %53 = arith.truncf %52 : vector<1x256x32xf32> to vector<1x256x32xbf16>
    %54 = vector.extract_strided_slice %53 {offsets = [0, 240, 0], sizes = [1, 16, 32], strides = [1, 1, 1]} : vector<1x256x32xbf16> to vector<1x16x32xbf16>
    %55 = vector.extract_strided_slice %53 {offsets = [0, 0, 0], sizes = [1, 240, 32], strides = [1, 1, 1]} : vector<1x256x32xbf16> to vector<1x240x32xbf16>
    %56 = tpu.concatenate %54, %55 in 1 : vector<1x16x32xbf16>, vector<1x240x32xbf16> -> vector<1x256x32xbf16>
    %57 = vector.shape_cast %56 : vector<1x256x32xbf16> to vector<256x32xbf16>
    %c3 = arith.constant 3 : index
    %c0_21 = arith.constant 0 : index
    %c0_22 = arith.constant 0 : index
    %58 = vector.load %arg4[%c3, %c0_21, %c0_22] : memref<9x32x32xbf16, #tpu.memory_space<vmem>>, vector<1x32x32xbf16>
    %59 = vector.shape_cast %58 : vector<1x32x32xbf16> to vector<32x32xbf16>
    %cst_23 = arith.constant dense<0.000000e+00> : vector<256x32xf32>
    %60 = tpu.matmul %57, %59, %cst_23 {dimension_numbers = #tpu.dot_dimension_numbers<[1], [0], [0], [1], [0, 0, 1, 1], [], []>} : vector<256x32xbf16>, vector<32x32xbf16>, vector<256x32xf32> -> vector<256x32xf32>
    %61 = arith.addf %51, %60 : vector<256x32xf32>
    %62 = vector.shape_cast %53 : vector<1x256x32xbf16> to vector<256x32xbf16>
    %c4 = arith.constant 4 : index
    %c0_24 = arith.constant 0 : index
    %c0_25 = arith.constant 0 : index
    %63 = vector.load %arg4[%c4, %c0_24, %c0_25] : memref<9x32x32xbf16, #tpu.memory_space<vmem>>, vector<1x32x32xbf16>
    %64 = vector.shape_cast %63 : vector<1x32x32xbf16> to vector<32x32xbf16>
    %cst_26 = arith.constant dense<0.000000e+00> : vector<256x32xf32>
    %65 = tpu.matmul %62, %64, %cst_26 {dimension_numbers = #tpu.dot_dimension_numbers<[1], [0], [0], [1], [0, 0, 1, 1], [], []>} : vector<256x32xbf16>, vector<32x32xbf16>, vector<256x32xf32> -> vector<256x32xf32>
    %66 = arith.addf %61, %65 : vector<256x32xf32>
    %67 = vector.extract_strided_slice %53 {offsets = [0, 16, 0], sizes = [1, 240, 32], strides = [1, 1, 1]} : vector<1x256x32xbf16> to vector<1x240x32xbf16>
    %68 = vector.extract_strided_slice %53 {offsets = [0, 0, 0], sizes = [1, 16, 32], strides = [1, 1, 1]} : vector<1x256x32xbf16> to vector<1x16x32xbf16>
    %69 = tpu.concatenate %67, %68 in 1 : vector<1x240x32xbf16>, vector<1x16x32xbf16> -> vector<1x256x32xbf16>
    %70 = vector.shape_cast %69 : vector<1x256x32xbf16> to vector<256x32xbf16>
    %c5 = arith.constant 5 : index
    %c0_27 = arith.constant 0 : index
    %c0_28 = arith.constant 0 : index
    %71 = vector.load %arg4[%c5, %c0_27, %c0_28] : memref<9x32x32xbf16, #tpu.memory_space<vmem>>, vector<1x32x32xbf16>
    %72 = vector.shape_cast %71 : vector<1x32x32xbf16> to vector<32x32xbf16>
    %cst_29 = arith.constant dense<0.000000e+00> : vector<256x32xf32>
    %73 = tpu.matmul %70, %72, %cst_29 {dimension_numbers = #tpu.dot_dimension_numbers<[1], [0], [0], [1], [0, 0, 1, 1], [], []>} : vector<256x32xbf16>, vector<32x32xbf16>, vector<256x32xf32> -> vector<256x32xf32>
    %74 = arith.addf %66, %73 : vector<256x32xf32>
    %75 = vector.extract_strided_slice %26 {offsets = [0, 1, 0], sizes = [16, 15, 32], strides = [1, 1, 1]} : vector<16x16x32xf32> to vector<16x15x32xf32>
    %76 = vector.extract_strided_slice %26 {offsets = [0, 0, 0], sizes = [16, 1, 32], strides = [1, 1, 1]} : vector<16x16x32xf32> to vector<16x1x32xf32>
    %77 = tpu.concatenate %75, %76 in 1 : vector<16x15x32xf32>, vector<16x1x32xf32> -> vector<16x16x32xf32>
    %78 = vector.shape_cast %77 : vector<16x16x32xf32> to vector<1x256x32xf32>
    %79 = arith.truncf %78 : vector<1x256x32xf32> to vector<1x256x32xbf16>
    %80 = vector.extract_strided_slice %79 {offsets = [0, 240, 0], sizes = [1, 16, 32], strides = [1, 1, 1]} : vector<1x256x32xbf16> to vector<1x16x32xbf16>
    %81 = vector.extract_strided_slice %79 {offsets = [0, 0, 0], sizes = [1, 240, 32], strides = [1, 1, 1]} : vector<1x256x32xbf16> to vector<1x240x32xbf16>
    %82 = tpu.concatenate %80, %81 in 1 : vector<1x16x32xbf16>, vector<1x240x32xbf16> -> vector<1x256x32xbf16>
    %83 = vector.shape_cast %82 : vector<1x256x32xbf16> to vector<256x32xbf16>
    %c6 = arith.constant 6 : index
    %c0_30 = arith.constant 0 : index
    %c0_31 = arith.constant 0 : index
    %84 = vector.load %arg4[%c6, %c0_30, %c0_31] : memref<9x32x32xbf16, #tpu.memory_space<vmem>>, vector<1x32x32xbf16>
    %85 = vector.shape_cast %84 : vector<1x32x32xbf16> to vector<32x32xbf16>
    %cst_32 = arith.constant dense<0.000000e+00> : vector<256x32xf32>
    %86 = tpu.matmul %83, %85, %cst_32 {dimension_numbers = #tpu.dot_dimension_numbers<[1], [0], [0], [1], [0, 0, 1, 1], [], []>} : vector<256x32xbf16>, vector<32x32xbf16>, vector<256x32xf32> -> vector<256x32xf32>
    %87 = arith.addf %74, %86 : vector<256x32xf32>
    %88 = vector.shape_cast %79 : vector<1x256x32xbf16> to vector<256x32xbf16>
    %c7 = arith.constant 7 : index
    %c0_33 = arith.constant 0 : index
    %c0_34 = arith.constant 0 : index
    %89 = vector.load %arg4[%c7, %c0_33, %c0_34] : memref<9x32x32xbf16, #tpu.memory_space<vmem>>, vector<1x32x32xbf16>
    %90 = vector.shape_cast %89 : vector<1x32x32xbf16> to vector<32x32xbf16>
    %cst_35 = arith.constant dense<0.000000e+00> : vector<256x32xf32>
    %91 = tpu.matmul %88, %90, %cst_35 {dimension_numbers = #tpu.dot_dimension_numbers<[1], [0], [0], [1], [0, 0, 1, 1], [], []>} : vector<256x32xbf16>, vector<32x32xbf16>, vector<256x32xf32> -> vector<256x32xf32>
    %92 = arith.addf %87, %91 : vector<256x32xf32>
    %93 = vector.extract_strided_slice %79 {offsets = [0, 16, 0], sizes = [1, 240, 32], strides = [1, 1, 1]} : vector<1x256x32xbf16> to vector<1x240x32xbf16>
    %94 = vector.extract_strided_slice %79 {offsets = [0, 0, 0], sizes = [1, 16, 32], strides = [1, 1, 1]} : vector<1x256x32xbf16> to vector<1x16x32xbf16>
    %95 = tpu.concatenate %93, %94 in 1 : vector<1x240x32xbf16>, vector<1x16x32xbf16> -> vector<1x256x32xbf16>
    %96 = vector.shape_cast %95 : vector<1x256x32xbf16> to vector<256x32xbf16>
    %c8 = arith.constant 8 : index
    %c0_36 = arith.constant 0 : index
    %c0_37 = arith.constant 0 : index
    %97 = vector.load %arg4[%c8, %c0_36, %c0_37] : memref<9x32x32xbf16, #tpu.memory_space<vmem>>, vector<1x32x32xbf16>
    %98 = vector.shape_cast %97 : vector<1x32x32xbf16> to vector<32x32xbf16>
    %cst_38 = arith.constant dense<0.000000e+00> : vector<256x32xf32>
    %99 = tpu.matmul %96, %98, %cst_38 {dimension_numbers = #tpu.dot_dimension_numbers<[1], [0], [0], [1], [0, 0, 1, 1], [], []>} : vector<256x32xbf16>, vector<32x32xbf16>, vector<256x32xf32> -> vector<256x32xf32>
    %100 = arith.addf %92, %99 : vector<256x32xf32>
    %c0_39 = arith.constant 0 : index
    %c0_40 = arith.constant 0 : index
    %101 = vector.load %arg5[%c0_39, %c0_40] : memref<1x32xf32, #tpu.memory_space<vmem>>, vector<1x32xf32>
    %102 = vector.broadcast %101 : vector<1x32xf32> to vector<256x32xf32>
    %103 = arith.addf %100, %102 : vector<256x32xf32>
    %cst_41 = arith.constant 0.00999999977 : f32
    %104 = vector.broadcast %cst_41 : f32 to vector<256x32xf32>
    %105 = arith.mulf %104, %103 : vector<256x32xf32>
    %106 = arith.maximumf %103, %105 : vector<256x32xf32>
    %107 = vector.shape_cast %106 : vector<256x32xf32> to vector<16x16x32xf32>
    %108 = vector.extract_strided_slice %107 {offsets = [0, 15, 0], sizes = [16, 1, 32], strides = [1, 1, 1]} : vector<16x16x32xf32> to vector<16x1x32xf32>
    %109 = vector.extract_strided_slice %107 {offsets = [0, 0, 0], sizes = [16, 15, 32], strides = [1, 1, 1]} : vector<16x16x32xf32> to vector<16x15x32xf32>
    %110 = tpu.concatenate %108, %109 in 1 : vector<16x1x32xf32>, vector<16x15x32xf32> -> vector<16x16x32xf32>
    %111 = vector.shape_cast %110 : vector<16x16x32xf32> to vector<1x256x32xf32>
    %112 = arith.truncf %111 : vector<1x256x32xf32> to vector<1x256x32xbf16>
    %113 = vector.extract_strided_slice %112 {offsets = [0, 240, 0], sizes = [1, 16, 32], strides = [1, 1, 1]} : vector<1x256x32xbf16> to vector<1x16x32xbf16>
    %114 = vector.extract_strided_slice %112 {offsets = [0, 0, 0], sizes = [1, 240, 32], strides = [1, 1, 1]} : vector<1x256x32xbf16> to vector<1x240x32xbf16>
    %115 = tpu.concatenate %113, %114 in 1 : vector<1x16x32xbf16>, vector<1x240x32xbf16> -> vector<1x256x32xbf16>
    %116 = vector.shape_cast %115 : vector<1x256x32xbf16> to vector<256x32xbf16>
    %c0_42 = arith.constant 0 : index
    %c0_43 = arith.constant 0 : index
    %c0_44 = arith.constant 0 : index
    %117 = vector.load %arg6[%c0_42, %c0_43, %c0_44] : memref<9x32x32xbf16, #tpu.memory_space<vmem>>, vector<1x32x32xbf16>
    %118 = vector.shape_cast %117 : vector<1x32x32xbf16> to vector<32x32xbf16>
    %cst_45 = arith.constant dense<0.000000e+00> : vector<256x32xf32>
    %119 = tpu.matmul %116, %118, %cst_45 {dimension_numbers = #tpu.dot_dimension_numbers<[1], [0], [0], [1], [0, 0, 1, 1], [], []>} : vector<256x32xbf16>, vector<32x32xbf16>, vector<256x32xf32> -> vector<256x32xf32>
    %120 = vector.shape_cast %112 : vector<1x256x32xbf16> to vector<256x32xbf16>
    %c1_46 = arith.constant 1 : index
    %c0_47 = arith.constant 0 : index
    %c0_48 = arith.constant 0 : index
    %121 = vector.load %arg6[%c1_46, %c0_47, %c0_48] : memref<9x32x32xbf16, #tpu.memory_space<vmem>>, vector<1x32x32xbf16>
    %122 = vector.shape_cast %121 : vector<1x32x32xbf16> to vector<32x32xbf16>
    %cst_49 = arith.constant dense<0.000000e+00> : vector<256x32xf32>
    %123 = tpu.matmul %120, %122, %cst_49 {dimension_numbers = #tpu.dot_dimension_numbers<[1], [0], [0], [1], [0, 0, 1, 1], [], []>} : vector<256x32xbf16>, vector<32x32xbf16>, vector<256x32xf32> -> vector<256x32xf32>
    %124 = arith.addf %119, %123 : vector<256x32xf32>
    %125 = vector.extract_strided_slice %112 {offsets = [0, 16, 0], sizes = [1, 240, 32], strides = [1, 1, 1]} : vector<1x256x32xbf16> to vector<1x240x32xbf16>
    %126 = vector.extract_strided_slice %112 {offsets = [0, 0, 0], sizes = [1, 16, 32], strides = [1, 1, 1]} : vector<1x256x32xbf16> to vector<1x16x32xbf16>
    %127 = tpu.concatenate %125, %126 in 1 : vector<1x240x32xbf16>, vector<1x16x32xbf16> -> vector<1x256x32xbf16>
    %128 = vector.shape_cast %127 : vector<1x256x32xbf16> to vector<256x32xbf16>
    %c2_50 = arith.constant 2 : index
    %c0_51 = arith.constant 0 : index
    %c0_52 = arith.constant 0 : index
    %129 = vector.load %arg6[%c2_50, %c0_51, %c0_52] : memref<9x32x32xbf16, #tpu.memory_space<vmem>>, vector<1x32x32xbf16>
    %130 = vector.shape_cast %129 : vector<1x32x32xbf16> to vector<32x32xbf16>
    %cst_53 = arith.constant dense<0.000000e+00> : vector<256x32xf32>
    %131 = tpu.matmul %128, %130, %cst_53 {dimension_numbers = #tpu.dot_dimension_numbers<[1], [0], [0], [1], [0, 0, 1, 1], [], []>} : vector<256x32xbf16>, vector<32x32xbf16>, vector<256x32xf32> -> vector<256x32xf32>
    %132 = arith.addf %124, %131 : vector<256x32xf32>
    %133 = vector.shape_cast %107 : vector<16x16x32xf32> to vector<1x256x32xf32>
    %134 = arith.truncf %133 : vector<1x256x32xf32> to vector<1x256x32xbf16>
    %135 = vector.extract_strided_slice %134 {offsets = [0, 240, 0], sizes = [1, 16, 32], strides = [1, 1, 1]} : vector<1x256x32xbf16> to vector<1x16x32xbf16>
    %136 = vector.extract_strided_slice %134 {offsets = [0, 0, 0], sizes = [1, 240, 32], strides = [1, 1, 1]} : vector<1x256x32xbf16> to vector<1x240x32xbf16>
    %137 = tpu.concatenate %135, %136 in 1 : vector<1x16x32xbf16>, vector<1x240x32xbf16> -> vector<1x256x32xbf16>
    %138 = vector.shape_cast %137 : vector<1x256x32xbf16> to vector<256x32xbf16>
    %c3_54 = arith.constant 3 : index
    %c0_55 = arith.constant 0 : index
    %c0_56 = arith.constant 0 : index
    %139 = vector.load %arg6[%c3_54, %c0_55, %c0_56] : memref<9x32x32xbf16, #tpu.memory_space<vmem>>, vector<1x32x32xbf16>
    %140 = vector.shape_cast %139 : vector<1x32x32xbf16> to vector<32x32xbf16>
    %cst_57 = arith.constant dense<0.000000e+00> : vector<256x32xf32>
    %141 = tpu.matmul %138, %140, %cst_57 {dimension_numbers = #tpu.dot_dimension_numbers<[1], [0], [0], [1], [0, 0, 1, 1], [], []>} : vector<256x32xbf16>, vector<32x32xbf16>, vector<256x32xf32> -> vector<256x32xf32>
    %142 = arith.addf %132, %141 : vector<256x32xf32>
    %143 = vector.shape_cast %134 : vector<1x256x32xbf16> to vector<256x32xbf16>
    %c4_58 = arith.constant 4 : index
    %c0_59 = arith.constant 0 : index
    %c0_60 = arith.constant 0 : index
    %144 = vector.load %arg6[%c4_58, %c0_59, %c0_60] : memref<9x32x32xbf16, #tpu.memory_space<vmem>>, vector<1x32x32xbf16>
    %145 = vector.shape_cast %144 : vector<1x32x32xbf16> to vector<32x32xbf16>
    %cst_61 = arith.constant dense<0.000000e+00> : vector<256x32xf32>
    %146 = tpu.matmul %143, %145, %cst_61 {dimension_numbers = #tpu.dot_dimension_numbers<[1], [0], [0], [1], [0, 0, 1, 1], [], []>} : vector<256x32xbf16>, vector<32x32xbf16>, vector<256x32xf32> -> vector<256x32xf32>
    %147 = arith.addf %142, %146 : vector<256x32xf32>
    %148 = vector.extract_strided_slice %134 {offsets = [0, 16, 0], sizes = [1, 240, 32], strides = [1, 1, 1]} : vector<1x256x32xbf16> to vector<1x240x32xbf16>
    %149 = vector.extract_strided_slice %134 {offsets = [0, 0, 0], sizes = [1, 16, 32], strides = [1, 1, 1]} : vector<1x256x32xbf16> to vector<1x16x32xbf16>
    %150 = tpu.concatenate %148, %149 in 1 : vector<1x240x32xbf16>, vector<1x16x32xbf16> -> vector<1x256x32xbf16>
    %151 = vector.shape_cast %150 : vector<1x256x32xbf16> to vector<256x32xbf16>
    %c5_62 = arith.constant 5 : index
    %c0_63 = arith.constant 0 : index
    %c0_64 = arith.constant 0 : index
    %152 = vector.load %arg6[%c5_62, %c0_63, %c0_64] : memref<9x32x32xbf16, #tpu.memory_space<vmem>>, vector<1x32x32xbf16>
    %153 = vector.shape_cast %152 : vector<1x32x32xbf16> to vector<32x32xbf16>
    %cst_65 = arith.constant dense<0.000000e+00> : vector<256x32xf32>
    %154 = tpu.matmul %151, %153, %cst_65 {dimension_numbers = #tpu.dot_dimension_numbers<[1], [0], [0], [1], [0, 0, 1, 1], [], []>} : vector<256x32xbf16>, vector<32x32xbf16>, vector<256x32xf32> -> vector<256x32xf32>
    %155 = arith.addf %147, %154 : vector<256x32xf32>
    %156 = vector.extract_strided_slice %107 {offsets = [0, 1, 0], sizes = [16, 15, 32], strides = [1, 1, 1]} : vector<16x16x32xf32> to vector<16x15x32xf32>
    %157 = vector.extract_strided_slice %107 {offsets = [0, 0, 0], sizes = [16, 1, 32], strides = [1, 1, 1]} : vector<16x16x32xf32> to vector<16x1x32xf32>
    %158 = tpu.concatenate %156, %157 in 1 : vector<16x15x32xf32>, vector<16x1x32xf32> -> vector<16x16x32xf32>
    %159 = vector.shape_cast %158 : vector<16x16x32xf32> to vector<1x256x32xf32>
    %160 = arith.truncf %159 : vector<1x256x32xf32> to vector<1x256x32xbf16>
    %161 = vector.extract_strided_slice %160 {offsets = [0, 240, 0], sizes = [1, 16, 32], strides = [1, 1, 1]} : vector<1x256x32xbf16> to vector<1x16x32xbf16>
    %162 = vector.extract_strided_slice %160 {offsets = [0, 0, 0], sizes = [1, 240, 32], strides = [1, 1, 1]} : vector<1x256x32xbf16> to vector<1x240x32xbf16>
    %163 = tpu.concatenate %161, %162 in 1 : vector<1x16x32xbf16>, vector<1x240x32xbf16> -> vector<1x256x32xbf16>
    %164 = vector.shape_cast %163 : vector<1x256x32xbf16> to vector<256x32xbf16>
    %c6_66 = arith.constant 6 : index
    %c0_67 = arith.constant 0 : index
    %c0_68 = arith.constant 0 : index
    %165 = vector.load %arg6[%c6_66, %c0_67, %c0_68] : memref<9x32x32xbf16, #tpu.memory_space<vmem>>, vector<1x32x32xbf16>
    %166 = vector.shape_cast %165 : vector<1x32x32xbf16> to vector<32x32xbf16>
    %cst_69 = arith.constant dense<0.000000e+00> : vector<256x32xf32>
    %167 = tpu.matmul %164, %166, %cst_69 {dimension_numbers = #tpu.dot_dimension_numbers<[1], [0], [0], [1], [0, 0, 1, 1], [], []>} : vector<256x32xbf16>, vector<32x32xbf16>, vector<256x32xf32> -> vector<256x32xf32>
    %168 = arith.addf %155, %167 : vector<256x32xf32>
    %169 = vector.shape_cast %160 : vector<1x256x32xbf16> to vector<256x32xbf16>
    %c7_70 = arith.constant 7 : index
    %c0_71 = arith.constant 0 : index
    %c0_72 = arith.constant 0 : index
    %170 = vector.load %arg6[%c7_70, %c0_71, %c0_72] : memref<9x32x32xbf16, #tpu.memory_space<vmem>>, vector<1x32x32xbf16>
    %171 = vector.shape_cast %170 : vector<1x32x32xbf16> to vector<32x32xbf16>
    %cst_73 = arith.constant dense<0.000000e+00> : vector<256x32xf32>
    %172 = tpu.matmul %169, %171, %cst_73 {dimension_numbers = #tpu.dot_dimension_numbers<[1], [0], [0], [1], [0, 0, 1, 1], [], []>} : vector<256x32xbf16>, vector<32x32xbf16>, vector<256x32xf32> -> vector<256x32xf32>
    %173 = arith.addf %168, %172 : vector<256x32xf32>
    %174 = vector.extract_strided_slice %160 {offsets = [0, 16, 0], sizes = [1, 240, 32], strides = [1, 1, 1]} : vector<1x256x32xbf16> to vector<1x240x32xbf16>
    %175 = vector.extract_strided_slice %160 {offsets = [0, 0, 0], sizes = [1, 16, 32], strides = [1, 1, 1]} : vector<1x256x32xbf16> to vector<1x16x32xbf16>
    %176 = tpu.concatenate %174, %175 in 1 : vector<1x240x32xbf16>, vector<1x16x32xbf16> -> vector<1x256x32xbf16>
    %177 = vector.shape_cast %176 : vector<1x256x32xbf16> to vector<256x32xbf16>
    %c8_74 = arith.constant 8 : index
    %c0_75 = arith.constant 0 : index
    %c0_76 = arith.constant 0 : index
    %178 = vector.load %arg6[%c8_74, %c0_75, %c0_76] : memref<9x32x32xbf16, #tpu.memory_space<vmem>>, vector<1x32x32xbf16>
    %179 = vector.shape_cast %178 : vector<1x32x32xbf16> to vector<32x32xbf16>
    %cst_77 = arith.constant dense<0.000000e+00> : vector<256x32xf32>
    %180 = tpu.matmul %177, %179, %cst_77 {dimension_numbers = #tpu.dot_dimension_numbers<[1], [0], [0], [1], [0, 0, 1, 1], [], []>} : vector<256x32xbf16>, vector<32x32xbf16>, vector<256x32xf32> -> vector<256x32xf32>
    %181 = arith.addf %173, %180 : vector<256x32xf32>
    %c0_78 = arith.constant 0 : index
    %c0_79 = arith.constant 0 : index
    %182 = vector.load %arg7[%c0_78, %c0_79] : memref<1x32xf32, #tpu.memory_space<vmem>>, vector<1x32xf32>
    %183 = vector.broadcast %182 : vector<1x32xf32> to vector<256x32xf32>
    %184 = arith.addf %181, %183 : vector<256x32xf32>
    %185 = vector.shape_cast %184 : vector<256x32xf32> to vector<1x256x32xf32>
    %cst_80 = arith.constant dense<0.000000e+00> : vector<1x32xf32>
    %186 = vector.multi_reduction <add>, %185, %cst_80 [1] : vector<1x256x32xf32> to vector<1x32xf32>
    %cst_81 = arith.constant 2.560000e+02 : f32
    %187 = vector.broadcast %cst_81 : f32 to vector<1x32xf32>
    %188 = arith.divf %186, %187 : vector<1x32xf32>
    %c0_82 = arith.constant 0 : index
    %c0_83 = arith.constant 0 : index
    %189 = vector.load %arg8[%c0_82, %c0_83] : memref<32x8xf32, #tpu.memory_space<vmem>>, vector<32x8xf32>
    %cst_84 = arith.constant dense<0.000000e+00> : vector<1x8xf32>
    %190 = tpu.matmul %188, %189, %cst_84 {dimension_numbers = #tpu.dot_dimension_numbers<[1], [0], [0], [1], [0, 0, 1, 1], [], []>} : vector<1x32xf32>, vector<32x8xf32>, vector<1x8xf32> -> vector<1x8xf32>
    %c0_85 = arith.constant 0 : index
    %c0_86 = arith.constant 0 : index
    %191 = vector.load %arg9[%c0_85, %c0_86] : memref<1x8xf32, #tpu.memory_space<vmem>>, vector<1x8xf32>
    %192 = arith.addf %190, %191 : vector<1x8xf32>
    %cst_87 = arith.constant 0.000000e+00 : f32
    %193 = vector.broadcast %cst_87 : f32 to vector<1x8xf32>
    %194 = arith.maximumf %192, %193 : vector<1x8xf32>
    %c0_88 = arith.constant 0 : index
    %c0_89 = arith.constant 0 : index
    %195 = vector.load %arg10[%c0_88, %c0_89] : memref<8x32xf32, #tpu.memory_space<vmem>>, vector<8x32xf32>
    %cst_90 = arith.constant dense<0.000000e+00> : vector<1x32xf32>
    %196 = tpu.matmul %194, %195, %cst_90 {dimension_numbers = #tpu.dot_dimension_numbers<[1], [0], [0], [1], [0, 0, 1, 1], [], []>} : vector<1x8xf32>, vector<8x32xf32>, vector<1x32xf32> -> vector<1x32xf32>
    %c0_91 = arith.constant 0 : index
    %c0_92 = arith.constant 0 : index
    %197 = vector.load %arg11[%c0_91, %c0_92] : memref<1x32xf32, #tpu.memory_space<vmem>>, vector<1x32xf32>
    %198 = arith.addf %196, %197 : vector<1x32xf32>
    %199 = arith.negf %198 : vector<1x32xf32>
    %200 = math.exp %199 : vector<1x32xf32>
    %cst_93 = arith.constant 1.000000e+00 : f32
    %201 = vector.broadcast %cst_93 : f32 to vector<1x32xf32>
    %202 = arith.addf %201, %200 : vector<1x32xf32>
    %203 = arith.divf %201, %202 : vector<1x32xf32>
    %204 = vector.shape_cast %203 : vector<1x32xf32> to vector<1x1x32xf32>
    %205 = vector.broadcast %204 : vector<1x1x32xf32> to vector<1x256x32xf32>
    %206 = arith.mulf %185, %205 : vector<1x256x32xf32>
    %207 = vector.shape_cast %206 : vector<1x256x32xf32> to vector<1x16x16x32xf32>
    %208 = arith.addf %0, %207 : vector<1x16x16x32xf32>
    %c0_94 = arith.constant 0 : index
    %c0_95 = arith.constant 0 : index
    %c0_96 = arith.constant 0 : index
    %c0_97 = arith.constant 0 : index
    %209 = vector.load %arg12[%c0_94, %c0_95, %c0_96, %c0_97] : memref<1x16x16x32xf32, #tpu.memory_space<vmem>>, vector<1x16x16x32xf32>
    tpu.vector_store %arg12[%c0_94, %c0_95, %c0_96, %c0_97], %208 {strides = array<i32>} : memref<1x16x16x32xf32, #tpu.memory_space<vmem>>, vector<1x16x16x32xf32>,
    return
  }
  func.func @transform_0(%arg0: i32) -> (i32, i32, i32, i32) {
    %c0_i32 = arith.constant 0 : i32
    %c0_i32_0 = arith.constant 0 : i32
    %c0_i32_1 = arith.constant 0 : i32
    %c0_i32_2 = arith.constant 0 : i32
    return %arg0, %c0_i32, %c0_i32_0, %c0_i32_1 : i32, i32, i32, i32
  }
  func.func @transform_1(%arg0: i32) -> (i32, i32) {
    %c0_i32 = arith.constant 0 : i32
    %c0_i32_0 = arith.constant 0 : i32
    %c0_i32_1 = arith.constant 0 : i32
    return %c0_i32, %c0_i32_0 : i32, i32
  }
  func.func @transform_2(%arg0: i32) -> (i32, i32) {
    %c0_i32 = arith.constant 0 : i32
    %c0_i32_0 = arith.constant 0 : i32
    %c0_i32_1 = arith.constant 0 : i32
    return %c0_i32, %c0_i32_0 : i32, i32
  }
  func.func @transform_3(%arg0: i32) -> (i32, i32, i32) {
    %c0_i32 = arith.constant 0 : i32
    %c0_i32_0 = arith.constant 0 : i32
    %c0_i32_1 = arith.constant 0 : i32
    %c0_i32_2 = arith.constant 0 : i32
    return %c0_i32, %c0_i32_0, %c0_i32_1 : i32, i32, i32
  }
  func.func @transform_4(%arg0: i32) -> (i32, i32) {
    %c0_i32 = arith.constant 0 : i32
    %c0_i32_0 = arith.constant 0 : i32
    %c0_i32_1 = arith.constant 0 : i32
    return %c0_i32, %c0_i32_0 : i32, i32
  }
  func.func @transform_5(%arg0: i32) -> (i32, i32, i32) {
    %c0_i32 = arith.constant 0 : i32
    %c0_i32_0 = arith.constant 0 : i32
    %c0_i32_1 = arith.constant 0 : i32
    %c0_i32_2 = arith.constant 0 : i32
    return %c0_i32, %c0_i32_0, %c0_i32_1 : i32, i32, i32
  }
  func.func @transform_6(%arg0: i32) -> (i32, i32) {
    %c0_i32 = arith.constant 0 : i32
    %c0_i32_0 = arith.constant 0 : i32
    %c0_i32_1 = arith.constant 0 : i32
    return %c0_i32, %c0_i32_0 : i32, i32
  }
  func.func @transform_7(%arg0: i32) -> (i32, i32) {
    %c0_i32 = arith.constant 0 : i32
    %c0_i32_0 = arith.constant 0 : i32
    %c0_i32_1 = arith.constant 0 : i32
    return %c0_i32, %c0_i32_0 : i32, i32
  }
  func.func @transform_8(%arg0: i32) -> (i32, i32) {
    %c0_i32 = arith.constant 0 : i32
    %c0_i32_0 = arith.constant 0 : i32
    %c0_i32_1 = arith.constant 0 : i32
    return %c0_i32, %c0_i32_0 : i32, i32
  }
  func.func @transform_9(%arg0: i32) -> (i32, i32) {
    %c0_i32 = arith.constant 0 : i32
    %c0_i32_0 = arith.constant 0 : i32
    %c0_i32_1 = arith.constant 0 : i32
    return %c0_i32, %c0_i32_0 : i32, i32
  }
  func.func @transform_10(%arg0: i32) -> (i32, i32) {
    %c0_i32 = arith.constant 0 : i32
    %c0_i32_0 = arith.constant 0 : i32
    %c0_i32_1 = arith.constant 0 : i32
    return %c0_i32, %c0_i32_0 : i32, i32
  }
  func.func @transform_11(%arg0: i32) -> (i32, i32, i32, i32) {
    %c0_i32 = arith.constant 0 : i32
    %c0_i32_0 = arith.constant 0 : i32
    %c0_i32_1 = arith.constant 0 : i32
    %c0_i32_2 = arith.constant 0 : i32
    return %arg0, %c0_i32, %c0_i32_0, %c0_i32_1 : i32, i32, i32, i32
  }
}

</mosaic_0001>

<bundles_post_ra>
// kernel: _rcab_forward.1
= control target key start
LH: loop header
LB: loop body
LE: loop exit
PB: predicated region body
PF: predicated region fallthrough
CT: control target
= control target key end

     0   :  { %16 = vsyncpa [#allocation3], 0  ;;  %s10505_s0 = inlined_call_operand.vmem [shape: f32[2,16,16,32], index: 0, kind: input, shape index: {}]   ;;  %s10506_s1 = inlined_call_operand.vmem [shape: f32[1,32], index: 1, kind: input, shape index: {}]   ;;  %s10507_s2 = inlined_call_operand.vmem [shape: f32[1,32], index: 2, kind: input, shape index: {}]   ;;  %s10508_s3 = inlined_call_operand.vmem [shape: bf16[9,32,32], index: 3, kind: input, shape index: {}]   ;;  %s10509_s4 = inlined_call_operand.vmem [shape: f32[1,32], index: 4, kind: input, shape index: {}]   ;;  %s10510_s5 = inlined_call_operand.vmem [shape: bf16[9,32,32], index: 5, kind: input, shape index: {}]   ;;  %s10511_s6 = inlined_call_operand.vmem [shape: f32[1,32], index: 6, kind: input, shape index: {}]   ;;  %s10512_s7 = inlined_call_operand.vmem [shape: f32[32,8], index: 7, kind: input, shape index: {}]   ;;  %s10513_s8 = inlined_call_operand.vmem [shape: f32[1,8], index: 8, kind: input, shape index: {}]   ;;  %s10514_s9 = inlined_call_operand.vmem [shape: f32[8,32], index: 9, kind: input, shape index: {}]   ;;  %s10515_s10 = inlined_call_operand.vmem [shape: f32[1,32], index: 10, kind: input, shape index: {}]   ;;  %s10516_s11 = inlined_call_operand.hbm [shape: f32[2,16,16,32], index: 11, kind: output, shape index: {}]  }
   0x1   :  { %18 = vsyncpa [#allocation3 + $0x1], 0  ;;  %s8317_s17 = smov 0   ;;  %s8319_s18 = smov 0  }
   0x2   :  { %s8321_s19 = smov 0   ;;  %s8323_s20 = smov 0  }
   0x3 LB: > { %s8338_s21 = sadd.s32 4294967295, %s8249_s20   ;;  %s6075_s22 = sadd.s32 4294967294, %s8249_s20   ;;  %s8249_s20 = sphi %s8323_s20, %s10587_s20   ;;  %s8245_s19 = sphi %s8321_s19, %s10586_s19   ;;  %s8241_s18 = sphi %s8319_s18, %s10585_s18   ;;  %s8237_s17 = sphi %s8317_s17, %s10584_s17  }
   0x4   : > { %s8342_s23 = sadd.s32 1, %s8249_s20   ;;  %s267_s24 = sadd.s32 1, %s8245_s19 }
   0x5   : > { %s264_s25 = ssub.s32 %s8249_s20, %s8342_s23  ;;  %p277_p0 = scmp.ne.s32.totalorder %s8245_s19, %s8241_s18 }
   0x6   : > { %p265_p1 = scmp.eq.s32.totalorder %s264_s25, 0  ;;  %p278_p2 = scmp.eq.s32.totalorder %s8338_s21, 1 }
   0x7   : > { %p283_p3 = scmp.ne.s32.totalorder %s8241_s18, %s8237_s17  ;;  %p284_p4 = scmp.eq.s32.totalorder %s6075_s22, 1 }
   0x8   : > { %s8353_s26 = scalar_select %p265_p1, %s8245_s19, %s267_s24  }
   0x9   : > { %p8355_p5 = por %p278_p2, %p277_p0  ;;  %p8359_p6 = por %p284_p4, %p283_p3 }
   0xa   : > { %p6078_p7 = scmp.ge.s32.totalorder %s8249_s20, 1  ;;  %p340_p8 = scmp.lt.s32.totalorder %s8249_s20, 3 }
   0xc   : > { %p341_p9 = pnand %p6078_p7, %p340_p8 }
   0xe   : > { %344 = sbr.rel (%p341_p9) target bundleno = 2314 (0x90a), region = 64 }
  0x15   : > { %p380_p10 = scmp.lt.s32.totalorder %s8338_s21, 1  ;;  %vm418_vm0 = vcmask 261120   ;;  %v8041_v52 = vld [vmem:[%s10508_s3 + $0x10] sm:$0xff]   ;;  %v8042_v59 = vld [vmem:[%s10508_s3 + $0x18] sm:$0xff]   ;;  %vm1041_vm1 = vcmask 1040384   ;;  %vm2445_vm2 = vcmask 1046528  }
  0x16   : > { %6815 = vmatprep.subr.bf16.mxu0 %v8041_v52  ;;  %vm8252_vm3 = vmmov 0   ;;  %vm5819_vm4 = vcmask 64512   ;;  %s377_s13 = sand.u32 1, %s8241_s18   ;;  %s6483_s22 = sshll.u32 %s8338_s21, 12 }
  0x17   : > { %s381_s29 = scalar_select %p380_p10, %s8338_s21, 1  ;;  %6816 = vmatpush3.bf16.msra.mxu0 %v8041_v52 }
  0x18   : > { %6817 = vmatprep.subr.bf16.mxu0 %v8042_v59  ;;  %s10293_s15 = sshll.u32 %s377_s13, 8  ;;  %s10464_s21 = scalar_lea.sflag [#allocation3], %s377_s13 }
  0x19   : > { %s6482_s30 = sshll.u32 %s381_s29, 8  ;;  %s10350_s16 = scalar_lea.vmem [#allocation2], %s10293_s15 }
  0x1a   : > { %s8370_s14 = scalar_lea.vmem %s10505_s0, %s6482_s30  ;;  %s6013_s24 = sshll.u32 %s10350_s16, 4  ;;  %s10428_s24 = int_to_ptr.vmem [resolvable:$true] %s6013_s24 }
  0x1b   : > { %v8373_v0 = vld [vmem:[%s8370_s14 + $0x10] sm:$0xff]  ;;  %v8376_v1 = vld [vmem:[%s8370_s14] sm:$0xff]  ;;  %v8379_v2 = vld [vmem:[%s8370_s14 + $0x18] sm:$0xff]  ;;  %6818 = vmatpush3.bf16.msra.mxu0 %v8042_v59  ;;  %s10424_s30 = scalar_lea.hbm %s10516_s11, %s6483_s22  ;;  %s8254_s12 = smov [#allocation2]  }
  0x1c   : > { %v425_v3 = vsel %vm418_vm0, %v8373_v0, 0.0  ;;  %v419_v4 = vsel %vm418_vm0, %v8376_v1, 0.0  ;;  %v8386_v5 = vld [vmem:[%s8370_s14 + $0x8] sm:$0xff]  ;;  %v428_v6 = vsel %vm418_vm0, %v8379_v2, 0.0  ;;  %v515_v9 = vmul.f32 %v8376_v1, %v8376_v1  ;;  %v8408_v17 = vld [vmem:[%s8370_s14 + $0x20] sm:$0xff]  ;;  %v8415_v20 = vld [vmem:[%s8370_s14 + $0x38] sm:$0xff] }
  0x1d   : > { %426 = vadd.xlane.f32.xlu1 %v425_v3  ;;  %420 = vadd.xlane.f32.xlu0 %v419_v4  ;;  %v422_v7 = vsel %vm418_vm0, %v8386_v5, 0.0  ;;  %v516_v8 = vmul.f32 %v8386_v5, %v8386_v5  ;;  %v518_v12 = vmul.f32 %v8379_v2, %v8379_v2  ;;  %v517_v13 = vmul.f32 %v8373_v0, %v8373_v0  ;;  %v8405_v16 = vld [vmem:[%s8370_s14 + $0x28] sm:$0xff]  ;;  %v8418_v21 = vld [vmem:[%s8370_s14 + $0x30] sm:$0xff]  ;;  %v8432_v27 = vld [vmem:[%s8370_s14 + $0x40] sm:$0xff]  ;;  %s8191_s15 = sshll.u32 %s8254_s12, 4  ;;  %s8192_s15 = int_to_ptr.vmem [resolvable:$false] %s8191_s15 }
  0x1e   : > { %v547_v11 = vsel %vm418_vm0, %v515_v9, 0.0  ;;  %v434_v18 = vsel %vm418_vm0, %v8405_v16, 0.0  ;;  %v431_v19 = vsel %vm418_vm0, %v8408_v17, 0.0  ;;  %v520_v22 = vmul.f32 %v8405_v16, %v8405_v16  ;;  %v8429_v26 = vld [vmem:[%s8370_s14 + $0x48] sm:$0xff]  ;;  %v8439_v30 = vld [vmem:[%s8370_s14 + $0x58] sm:$0xff]  ;;  %v8442_v31 = vld [vmem:[%s8370_s14 + $0x50] sm:$0xff]  ;;  %p8194_p0 = scmp.lt.s32.totalorder %s10428_s24, %s8192_s15 }
  0x1f   : > { %v550_v10 = vsel %vm418_vm0, %v516_v8, 0.0  ;;  %v556_v14 = vsel %vm418_vm0, %v518_v12, 0.0  ;;  %v553_v15 = vsel %vm418_vm0, %v517_v13, 0.0  ;;  %v519_v23 = vmul.f32 %v8408_v17, %v8408_v17  ;;  %v8469_v48 = vld [vmem:[%s8370_s14 + $0x68] sm:$0xff]  ;;  %v8472_v49 = vld [vmem:[%s8370_s14 + $0x60] sm:$0xff]  ;;  %v8482_v53 = vld [vmem:[%s8370_s14 + $0x78] sm:$0xff] }
  0x20   : > { %v440_v24 = vsel %vm418_vm0, %v8415_v20, 0.0  ;;  %v437_v25 = vsel %vm418_vm0, %v8418_v21, 0.0  ;;  %v522_v28 = vmul.f32 %v8415_v20, %v8415_v20  ;;  %v521_v29 = vmul.f32 %v8418_v21, %v8418_v21  ;;  %v8485_v54 = vld [vmem:[%s8370_s14 + $0x70] sm:$0xff]  ;;  %v413_v52 = vld [vmem:[%s8370_s14 + $0xd8] sm:$0xff]  ;;  %s8193_s22 = scalar_lea.vmem %s8192_s15, 8192 }
  0x21   : > { %429 = vadd.xlane.f32.xlu1 %v428_v6  ;;  %423 = vadd.xlane.f32.xlu0 %v422_v7  ;;  %v562_v32 = vsel %vm418_vm0, %v520_v22, 0.0  ;;  %v559_v33 = vsel %vm418_vm0, %v519_v23, 0.0  ;;  %v446_v34 = vsel %vm418_vm0, %v8429_v26, 0.0  ;;  %v443_v35 = vsel %vm418_vm0, %v8432_v27, 0.0  ;;  %v8507_v6 = vld [vmem:[%s8370_s14 + $0x88] sm:$0xff]  ;;  %v8510_v7 = vld [vmem:[%s8370_s14 + $0x80] sm:$0xff] }
  0x22   : > { %v568_v36 = vsel %vm418_vm0, %v522_v28, 0.0  ;;  %v565_v37 = vsel %vm418_vm0, %v521_v29, 0.0  ;;  %v452_v38 = vsel %vm418_vm0, %v8439_v30, 0.0  ;;  %v449_v39 = vsel %vm418_vm0, %v8442_v31, 0.0  ;;  %v8539_v28 = vld [vmem:[%s8370_s14 + $0xa8] sm:$0xff]  ;;  %v8542_v29 = vld [vmem:[%s8370_s14 + $0xa0] sm:$0xff] }
  0x23   : > { %v524_v40 = vmul.f32 %v8429_v26, %v8429_v26  ;;  %v523_v41 = vmul.f32 %v8432_v27, %v8432_v27  ;;  %v526_v44 = vmul.f32 %v8439_v30, %v8439_v30  ;;  %v525_v45 = vmul.f32 %v8442_v31, %v8442_v31 }
  0x24   : > { %v458_v50 = vsel %vm418_vm0, %v8469_v48, 0.0  ;;  %v455_v51 = vsel %vm418_vm0, %v8472_v49, 0.0  ;;  %v464_v55 = vsel %vm418_vm0, %v8482_v53, 0.0  ;;  %v461_v56 = vsel %vm418_vm0, %v8485_v54, 0.0 }
  0x25   : > { %551 = vadd.xlane.f32.xlu1 %v550_v10  ;;  %548 = vadd.xlane.f32.xlu0 %v547_v11  ;;  %v574_v42 = vsel %vm418_vm0, %v524_v40, 0.0  ;;  %v571_v43 = vsel %vm418_vm0, %v523_v41, 0.0  ;;  %v580_v46 = vsel %vm418_vm0, %v526_v44, 0.0  ;;  %v577_v47 = vsel %vm418_vm0, %v525_v45, 0.0  ;;  %v8517_v10 = vld [vmem:[%s8370_s14 + $0x98] sm:$0xff]  ;;  %v8520_v11 = vld [vmem:[%s8370_s14 + $0x90] sm:$0xff] }
  0x26   : > { %v528_v57 = vmul.f32 %v8469_v48, %v8469_v48  ;;  %v527_v58 = vmul.f32 %v8472_v49, %v8472_v49  ;;  %v530_v62 = vmul.f32 %v8482_v53, %v8482_v53  ;;  %v529_v63 = vmul.f32 %v8485_v54, %v8485_v54 }
  0x27   : > { %v470_v8 = vsel %vm418_vm0, %v8507_v6, 0.0  ;;  %v467_v9 = vsel %vm418_vm0, %v8510_v7, 0.0  ;;  %v476_v12 = vsel %vm418_vm0, %v8517_v10, 0.0  ;;  %v473_v13 = vsel %vm418_vm0, %v8520_v11, 0.0 }
  0x28   : > { %v586_v60 = vsel %vm418_vm0, %v528_v57, 0.0  ;;  %v583_v61 = vsel %vm418_vm0, %v527_v58, 0.0  ;;  %v592_v3 = vsel %vm418_vm0, %v530_v62, 0.0  ;;  %v589_v4 = vsel %vm418_vm0, %v529_v63, 0.0 }
  0x29   : > { %557 = vadd.xlane.f32.xlu1 %v556_v14  ;;  %554 = vadd.xlane.f32.xlu0 %v553_v15  ;;  %v532_v14 = vmul.f32 %v8507_v6, %v8507_v6  ;;  %v531_v15 = vmul.f32 %v8510_v7, %v8510_v7  ;;  %v534_v22 = vmul.f32 %v8517_v10, %v8517_v10 }
  0x2a   : > { %v533_v23 = vmul.f32 %v8520_v11, %v8520_v11  ;;  %v542_v62 = vmul.f32 %v413_v52, %v413_v52 }
  0x2d   : > { %435 = vadd.xlane.f32.xlu1 %v434_v18  ;;  %432 = vadd.xlane.f32.xlu0 %v431_v19  ;;  %v598_v18 = vsel %vm418_vm0, %v532_v14, 0.0  ;;  %v595_v19 = vsel %vm418_vm0, %v531_v15, 0.0  ;;  %v417_v14 = vld [vmem:[%s8370_s14 + $0xf8] sm:$0xff]  ;;  %v416_v15 = vld [vmem:[%s8370_s14 + $0xf0] sm:$0xff] }
  0x31   : > { %441 = vadd.xlane.f32.xlu1 %v440_v24  ;;  %438 = vadd.xlane.f32.xlu0 %v437_v25  ;;  %v604_v24 = vsel %vm418_vm0, %v534_v22, 0.0  ;;  %v601_v25 = vsel %vm418_vm0, %v533_v23, 0.0 }
  0x35   : > { %563 = vadd.xlane.f32.xlu1 %v562_v32  ;;  %560 = vadd.xlane.f32.xlu0 %v559_v33  ;;  %v482_v32 = vsel %vm418_vm0, %v8539_v28, 0.0  ;;  %v479_v33 = vsel %vm418_vm0, %v8542_v29, 0.0 }
  0x39   : > { %569 = vadd.xlane.f32.xlu1 %v568_v36  ;;  %566 = vadd.xlane.f32.xlu0 %v565_v37 }
  0x3d   : > { %447 = vadd.xlane.f32.xlu1 %v446_v34  ;;  %444 = vadd.xlane.f32.xlu0 %v443_v35  ;;  %v8549_v34 = vld [vmem:[%s8370_s14 + $0xb8] sm:$0xff]  ;;  %v8552_v35 = vld [vmem:[%s8370_s14 + $0xb0] sm:$0xff] }
  0x3e   : > { %v488_v36 = vsel %vm418_vm0, %v8549_v34, 0.0  ;;  %v485_v37 = vsel %vm418_vm0, %v8552_v35, 0.0 }
  0x41   : > { %453 = vadd.xlane.f32.xlu1 %v452_v38  ;;  %450 = vadd.xlane.f32.xlu0 %v449_v39  ;;  %v536_v38 = vmul.f32 %v8539_v28, %v8539_v28  ;;  %v535_v39 = vmul.f32 %v8542_v29, %v8542_v29 }
  0x43   : > { %v610_v40 = vsel %vm418_vm0, %v536_v38, 0.0  ;;  %v607_v41 = vsel %vm418_vm0, %v535_v39, 0.0  ;;  %v8597_v38 = vld [vmem:[%s10508_s3] sm:$0xff]  }
  0x44   : > { %6851 = vmatprep.subr.bf16.mxu0 %v8597_v38 }
  0x45   : > { %575 = vadd.xlane.f32.xlu1 %v574_v42  ;;  %572 = vadd.xlane.f32.xlu0 %v571_v43  ;;  %v538_v42 = vmul.f32 %v8549_v34, %v8549_v34  ;;  %v537_v43 = vmul.f32 %v8552_v35, %v8552_v35 }
  0x47   : > { %v616_v44 = vsel %vm418_vm0, %v538_v42, 0.0  ;;  %v613_v45 = vsel %vm418_vm0, %v537_v43, 0.0 }
  0x49   : > { %581 = vadd.xlane.f32.xlu1 %v580_v46  ;;  %578 = vadd.xlane.f32.xlu0 %v577_v47  ;;  %v411_v46 = vld [vmem:[%s8370_s14 + $0xc8] sm:$0xff]  ;;  %v410_v47 = vld [vmem:[%s8370_s14 + $0xc0] sm:$0xff] }
  0x4a   : > { %v540_v58 = vmul.f32 %v411_v46, %v411_v46  ;;  %v539_v59 = vmul.f32 %v410_v47, %v410_v47 }
  0x4d   : > { %459 = vadd.xlane.f32.xlu1 %v458_v50  ;;  %456 = vadd.xlane.f32.xlu0 %v455_v51  ;;  %v494_v50 = vsel %vm418_vm0, %v411_v46, 0.0  ;;  %v491_v51 = vsel %vm418_vm0, %v410_v47, 0.0 }
  0x51   : > { %465 = vadd.xlane.f32.xlu1 %v464_v55  ;;  %462 = vadd.xlane.f32.xlu0 %v461_v56  ;;  %v412_v55 = vld [vmem:[%s8370_s14 + $0xd0] sm:$0xff]  ;;  %v500_v56 = vsel %vm418_vm0, %v413_v52, 0.0 }
  0x52   : > { %v497_v57 = vsel %vm418_vm0, %v412_v55, 0.0  ;;  %v541_v63 = vmul.f32 %v412_v55, %v412_v55 }
  0x55   : > { %587 = vadd.xlane.f32.xlu1 %v586_v60  ;;  %584 = vadd.xlane.f32.xlu0 %v583_v61  ;;  %v622_v60 = vsel %vm418_vm0, %v540_v58, 0.0  ;;  %v619_v61 = vsel %vm418_vm0, %v539_v59, 0.0 }
  0x59   : > { %593 = vadd.xlane.f32.xlu1 %v592_v3  ;;  %590 = vadd.xlane.f32.xlu0 %v589_v4  ;;  %v628_v3 = vsel %vm418_vm0, %v542_v62, 0.0  ;;  %v625_v4 = vsel %vm418_vm0, %v541_v63, 0.0 }
  0x5d   : > { %471 = vadd.xlane.f32.xlu1 %v470_v8  ;;  %468 = vadd.xlane.f32.xlu0 %v467_v9  ;;  %v415_v8 = vld [vmem:[%s8370_s14 + $0xe8] sm:$0xff]  ;;  %v414_v9 = vld [vmem:[%s8370_s14 + $0xe0] sm:$0xff] }
  0x5e   : > { %v544_v22 = vmul.f32 %v415_v8, %v415_v8  ;;  %v543_v23 = vmul.f32 %v414_v9, %v414_v9 }
  0x61   : > { %477 = vadd.xlane.f32.xlu1 %v476_v12  ;;  %474 = vadd.xlane.f32.xlu0 %v473_v13  ;;  %v506_v12 = vsel %vm418_vm0, %v415_v8, 0.0  ;;  %v503_v13 = vsel %vm418_vm0, %v414_v9, 0.0 }
  0x65   : > { %599 = vadd.xlane.f32.xlu1 %v598_v18  ;;  %596 = vadd.xlane.f32.xlu0 %v595_v19  ;;  %v512_v18 = vsel %vm418_vm0, %v417_v14, 0.0  ;;  %v509_v19 = vsel %vm418_vm0, %v416_v15, 0.0 }
  0x69   : > { %605 = vadd.xlane.f32.xlu1 %v604_v24  ;;  %602 = vadd.xlane.f32.xlu0 %v601_v25  ;;  %v634_v24 = vsel %vm418_vm0, %v544_v22, 0.0  ;;  %v631_v25 = vsel %vm418_vm0, %v543_v23, 0.0 }
  0x6d   : > { %483 = vadd.xlane.f32.xlu1 %v482_v32  ;;  %480 = vadd.xlane.f32.xlu0 %v479_v33  ;;  %v546_v32 = vmul.f32 %v417_v14, %v417_v14  ;;  %v545_v33 = vmul.f32 %v416_v15, %v416_v15 }
  0x71   : > { %489 = vadd.xlane.f32.xlu1 %v488_v36  ;;  %486 = vadd.xlane.f32.xlu0 %v485_v37  ;;  %v640_v36 = vsel %vm418_vm0, %v546_v32, 0.0  ;;  %v637_v37 = vsel %vm418_vm0, %v545_v33, 0.0 }
  0x75   : > { %611 = vadd.xlane.f32.xlu1 %v610_v40  ;;  %608 = vadd.xlane.f32.xlu0 %v607_v41 }
  0x79   : > { %617 = vadd.xlane.f32.xlu1 %v616_v44  ;;  %614 = vadd.xlane.f32.xlu0 %v613_v45 }
  0x7d   : > { %495 = vadd.xlane.f32.xlu1 %v494_v50  ;;  %492 = vadd.xlane.f32.xlu0 %v491_v51 }
  0x81   : > { %501 = vadd.xlane.f32.xlu1 %v500_v56  ;;  %498 = vadd.xlane.f32.xlu0 %v497_v57 }
  0x85   : > { %623 = vadd.xlane.f32.xlu1 %v622_v60  ;;  %620 = vadd.xlane.f32.xlu0 %v619_v61 }
  0x89   : > { %629 = vadd.xlane.f32.xlu1 %v628_v3  ;;  %626 = vadd.xlane.f32.xlu0 %v625_v4 }
  0x8d   : > { %507 = vadd.xlane.f32.xlu1 %v506_v12  ;;  %504 = vadd.xlane.f32.xlu0 %v503_v13 }
  0x91   : > { %513 = vadd.xlane.f32.xlu1 %v512_v18  ;;  %510 = vadd.xlane.f32.xlu0 %v509_v19 }
  0x95   : > { %635 = vadd.xlane.f32.xlu1 %v634_v24  ;;  %632 = vadd.xlane.f32.xlu0 %v631_v25 }
  0x99   : > { %641 = vadd.xlane.f32.xlu1 %v640_v36  ;;  %638 = vadd.xlane.f32.xlu0 %v637_v37 }
  0xaa   : > { %v427_v39 = vpop.xlane.xlu1 %426  ;;  %v421_v40 = vpop.xlane.xlu0 %420 }
  0xab   : > { %v643_v43 = vmul.f32 0.03125, %v421_v40  ;;  %v8600_v45 = vmul.f32 0.03125, %v427_v39 }
  0xad   : > { %v707_v51 = vmul.f32 %v643_v43, %v643_v43  ;;  %v709_v59 = vmul.f32 %v8600_v45, %v8600_v45  ;;  %v835_v25 = vsub.f32 %v8376_v1, %v643_v43 }
  0xae   : > { %v430_v41 = vpop.xlane.xlu1 %429  ;;  %v424_v42 = vpop.xlane.xlu0 %423 }
  0xaf   : > { %v644_v44 = vmul.f32 0.03125, %v424_v42  ;;  %v8602_v46 = vmul.f32 0.03125, %v430_v41  ;;  %v8621_v41 = vld [vmem:[%s10506_s1] ss:$0 sm:$0xff] }
  0xb1   : > { %v708_v52 = vmul.f32 %v644_v44, %v644_v44  ;;  %v710_v60 = vmul.f32 %v8602_v46, %v8602_v46  ;;  %v836_v32 = vsub.f32 %v8386_v5, %v644_v44 }
  0xb2   : > { %v552_v47 = vpop.xlane.xlu1 %551  ;;  %v549_v50 = vpop.xlane.xlu0 %548 }
  0xb3   : > { %v676_v55 = vmul.f32 0.03125, %v552_v47  ;;  %v675_v56 = vmul.f32 0.03125, %v549_v50  ;;  %v837_v50 = vsub.f32 %v8373_v0, %v8600_v45 }
  0xb5   : > { %v740_v57 = vsub.f32 %v676_v55, %v708_v52  ;;  %v739_v58 = vsub.f32 %v675_v56, %v707_v51  ;;  %v8632_v56 = vld [vmem:[%s10507_s2] ss:$0 sm:$0xff] }
  0xb6   : > { %v558_v61 = vpop.xlane.xlu1 %557  ;;  %v555_v62 = vpop.xlane.xlu0 %554 }
  0xb7   : > { %v772_v63 = vadd.f32 1e-05, %v740_v57  ;;  %v771_v3 = vadd.f32 1e-05, %v739_v58  ;;  %v678_v4 = vmul.f32 0.03125, %v558_v61  ;;  %v677_v8 = vmul.f32 0.03125, %v555_v62 }
  0xb8   : > { %v838_v57 = vsub.f32 %v8379_v2, %v8602_v46 }
  0xb9   : > { %8077 = vrsqrt.f32 %v772_v63  ;;  %v742_v9 = vsub.f32 %v678_v4, %v710_v60  ;;  %v741_v12 = vsub.f32 %v677_v8, %v709_v59 }
  0xba   : > { %8079 = vrsqrt.f32 %v771_v3  ;;  %v436_v13 = vpop.xlane.xlu1 %435  ;;  %v433_v14 = vpop.xlane.xlu0 %432 }
  0xbb   : > { %v774_v15 = vadd.f32 1e-05, %v742_v9  ;;  %v773_v18 = vadd.f32 1e-05, %v741_v12  ;;  %v8608_v23 = vmul.f32 0.03125, %v436_v13  ;;  %v8610_v24 = vmul.f32 0.03125, %v433_v14 }
  0xbd   : > { %8081 = vrsqrt.f32 %v774_v15  ;;  %v712_v42 = vmul.f32 %v8608_v23, %v8608_v23  ;;  %v711_v1 = vmul.f32 %v8610_v24, %v8610_v24 }
  0xbe   : > { %8083 = vrsqrt.f32 %v773_v18  ;;  %v442_v19 = vpop.xlane.xlu1 %441  ;;  %v439_v22 = vpop.xlane.xlu0 %438 }
  0xbf   : > { %v8614_v33 = vmul.f32 0.03125, %v442_v19  ;;  %v8616_v36 = vmul.f32 0.03125, %v439_v22 }
  0xc1   : > { %v714_v58 = vmul.f32 %v8614_v33, %v8614_v33  ;;  %v713_v59 = vmul.f32 %v8616_v36, %v8616_v36 }
  0xc2   : > { %v564_v37 = vpop.xlane.xlu1 %563  ;;  %v561_v39 = vpop.xlane.xlu0 %560 }
  0xc3   : > { %v8078_v40 = vpop.eup %8077  ;;  %v680_v43 = vmul.f32 0.03125, %v564_v37  ;;  %v679_v5 = vmul.f32 0.03125, %v561_v39 }
  0xc4   : > { %v8080_v44 = vpop.eup %8079  ;;  %v868_v47 = vmul.f32 %v8078_v40, %v836_v32 }
  0xc5   : > { %v867_v51 = vmul.f32 %v8080_v44, %v835_v25  ;;  %v744_v52 = vsub.f32 %v680_v43, %v712_v42  ;;  %v743_v55 = vsub.f32 %v679_v5, %v711_v1 }
  0xc6   : > { %v570_v60 = vpop.xlane.xlu1 %569  ;;  %v567_v61 = vpop.xlane.xlu0 %566  ;;  %v907_v0 = vmul.f32 %v8621_v41, %v868_v47  ;;  %v840_v47 = vsub.f32 %v8405_v16, %v8608_v23 }
  0xc7   : > { %v8082_v45 = vpop.eup %8081  ;;  %v776_v62 = vadd.f32 1e-05, %v744_v52  ;;  %v775_v63 = vadd.f32 1e-05, %v743_v55  ;;  %v682_v3 = vmul.f32 0.03125, %v570_v60  ;;  %v681_v4 = vmul.f32 0.03125, %v567_v61 }
  0xc8   : > { %v8084_v8 = vpop.eup %8083  ;;  %v870_v9 = vmul.f32 %v8082_v45, %v838_v57  ;;  %v906_v12 = vmul.f32 %v8621_v41, %v867_v51  ;;  %v946_v2 = vadd.f32 %v8632_v56, %v907_v0  ;;  %v842_v57 = vsub.f32 %v8415_v20, %v8614_v33 }
  0xc9   : > { %v869_v46 = vmul.f32 %v8084_v8, %v837_v50  ;;  %8085 = vrsqrt.f32 %v776_v62  ;;  %v746_v13 = vsub.f32 %v682_v3, %v714_v58  ;;  %v745_v14 = vsub.f32 %v681_v4, %v713_v59 }
  0xca   : > { %8087 = vrsqrt.f32 %v775_v63  ;;  %v448_v15 = vpop.xlane.xlu1 %447  ;;  %v445_v18 = vpop.xlane.xlu0 %444  ;;  %v945_v19 = vadd.f32 %v8632_v56, %v906_v12  ;;  %v993_v22 = vrot.slane %v946_v2, 7  ;;  %v909_v25 = vmul.f32 %v8621_v41, %v870_v9 }
  0xcb   : > { %v908_v32 = vmul.f32 %v8621_v41, %v869_v46  ;;  %v778_v37 = vadd.f32 1e-05, %v746_v13  ;;  %v777_v39 = vadd.f32 1e-05, %v745_v14  ;;  %v2447_v1 = vrot.slane %v946_v2, 1 }
  0xcc   : > { %v1042_v40 = vrot.slane %v945_v19, 7  ;;  %v2446_v42 = vrot.slane %v945_v19, 1  ;;  %v8646_v43 = vmul.f32 0.03125, %v448_v15  ;;  %v8648_v5 = vmul.f32 0.03125, %v445_v18 }
  0xcd   : > { %8089 = vrsqrt.f32 %v778_v37  ;;  %v947_v44 = vadd.f32 %v8632_v56, %v908_v32  ;;  %v839_v50 = vsub.f32 %v8408_v17, %v8610_v24  ;;  %v948_v60 = vadd.f32 %v8632_v56, %v909_v25  ;;  %v8044_v37 = vld [vmem:[%s10508_s3 + $0x8] sm:$0xff]  }
  0xce   : > { %8091 = vrsqrt.f32 %v777_v39  ;;  %v454_v51 = vpop.xlane.xlu1 %453  ;;  %v451_v52 = vpop.xlane.xlu0 %450  ;;  %v1043_v55 = vsel %vm1041_vm1, %v1042_v40, %v993_v22  ;;  %v1106_v59 = vsel %vm1041_vm1, %v993_v22, %v1042_v40  ;;  %v8664_v23 = vpack.c.bf16 %v946_v2, %v945_v19 }
  0xcf   : > { %v8658_v58 = vmul.f32 0.03125, %v454_v51  ;;  %v8662_v61 = vpack.c.bf16 %v1043_v55, %v1106_v59  ;;  %v1044_v16 = vrot.slane %v947_v44, 7  ;;  %v2448_v17 = vsel %vm2445_vm2, %v2446_v42, %v2447_v1 }
  0xd0   : > { %v841_v24 = vsub.f32 %v8418_v21, %v8616_v36  ;;  %v716_v0 = vmul.f32 %v8646_v43, %v8646_v43  ;;  %v715_v20 = vmul.f32 %v8648_v5, %v8648_v5  ;;  %v8673_v33 = vmul.f32 0.03125, %v451_v52 }
  0xd1   : > { %6819 = vmatprep.mubr.msk.bf16.mxu0 %vm418_vm0, %v8662_v61  ;;  %v994_v63 = vrot.slane %v948_v60, 7  ;;  %v8677_v3 = vpack.c.bf16 %v948_v60, %v947_v44  ;;  %v2542_v4 = vsel %vm2445_vm2, %v2447_v1, %v2446_v42  ;;  %v2449_v8 = vrot.slane %v947_v44, 1 }
  0xd2   : > { %v576_v45 = vpop.xlane.xlu1 %575  ;;  %v573_v62 = vpop.xlane.xlu0 %572  ;;  %v8680_v12 = vpack.c.bf16 %v2542_v4, %v2448_v17  ;;  %v2450_v2 = vrot.slane %v948_v60, 1  ;;  %v718_v14 = vmul.f32 %v8658_v58, %v8658_v58  ;;  %v717_v40 = vmul.f32 %v8673_v33, %v8673_v33  ;;  %v8707_v4 = vld [vmem:[%s10508_s3 + $0x20] sm:$0xff]  }
  0xd3   : > { %v8086_v21 = vpop.eup %8085  ;;  %v684_v36 = vmul.f32 0.03125, %v576_v45  ;;  %v683_v9 = vmul.f32 0.03125, %v573_v62  ;;  %v1045_v15 = vsel %vm1041_vm1, %v1044_v16, %v994_v63  ;;  %v1107_v18 = vsel %vm1041_vm1, %v994_v63, %v1044_v16 }
  0xd4   : > { %v8088_v46 = vpop.eup %8087  ;;  %v872_v13 = vmul.f32 %v8086_v21, %v840_v47  ;;  %v8686_v32 = vpack.c.bf16 %v1045_v15, %v1107_v18  ;;  %v2451_v44 = vsel %vm2445_vm2, %v2449_v8, %v2450_v2  ;;  %v2543_v47 = vsel %vm2445_vm2, %v2450_v2, %v2449_v8 }
  0xd5   : > { %v871_v19 = vmul.f32 %v8088_v46, %v839_v50  ;;  %v748_v22 = vsub.f32 %v684_v36, %v716_v0  ;;  %v747_v25 = vsub.f32 %v683_v9, %v715_v20  ;;  %v8701_v20 = vpack.c.bf16 %v2543_v47, %v2451_v44 }
  0xd6   : > { %v911_v39 = vmul.f32 %v8621_v41, %v872_v13  ;;  %v582_v42 = vpop.xlane.xlu1 %581  ;;  %v579_v1 = vpop.xlane.xlu0 %578  ;;  %6820 = vmatmul.mubr.msk.bf16.vlgmr.msra.gmra.mrb[0].mxu0 %vm418_vm0, %v8686_v32  ;;  %v844_v15 = vsub.f32 %v8429_v26, %v8646_v43  ;;  %v846_v26 = vsub.f32 %v8439_v30, %v8658_v58  ;;  %v845_v43 = vsub.f32 %v8442_v31, %v8673_v33 }
  0xd7   : > { %v8090_v50 = vpop.eup %8089  ;;  %v910_v51 = vmul.f32 %v8621_v41, %v871_v19  ;;  %v780_v52 = vadd.f32 1e-05, %v748_v22  ;;  %v779_v55 = vadd.f32 1e-05, %v747_v25  ;;  %v686_v59 = vmul.f32 0.03125, %v582_v42  ;;  %6852 = vmatpush3.bf16.msra.mxu0 %v8597_v38 }
  0xd8   : > { %v8092_v60 = vpop.eup %8091  ;;  %v874_v16 = vmul.f32 %v8090_v50, %v842_v57  ;;  %v685_v17 = vmul.f32 0.03125, %v579_v1  ;;  %v950_v0 = vadd.f32 %v8632_v56, %v911_v39  ;;  %6853 = vmatprep.subr.bf16.mxu0 %v8044_v37  ;;  %v843_v22 = vsub.f32 %v8432_v27, %v8648_v5 }
  0xd9   : > { %v873_v45 = vmul.f32 %v8092_v60, %v841_v24  ;;  %8093 = vrsqrt.f32 %v780_v52  ;;  %v750_v62 = vsub.f32 %v686_v59, %v718_v14  ;;  %v949_v63 = vadd.f32 %v8632_v56, %v910_v51 }
  0xda   : > { %v913_v57 = vmul.f32 %v8621_v41, %v874_v16  ;;  %8095 = vrsqrt.f32 %v779_v55  ;;  %v749_v8 = vsub.f32 %v685_v17, %v717_v40  ;;  %v460_v21 = vpop.xlane.xlu1 %459  ;;  %v457_v36 = vpop.xlane.xlu0 %456  ;;  %v995_v38 = vrot.slane %v950_v0, 7 }
  0xdb   : > { %v912_v9 = vmul.f32 %v8621_v41, %v873_v45  ;;  %v782_v24 = vadd.f32 1e-05, %v750_v62  ;;  %v1046_v46 = vrot.slane %v949_v63, 7  ;;  %6854 = vmatpush3.bf16.msra.mxu0 %v8044_v37  ;;  %v8712_v14 = vpack.c.bf16 %v950_v0, %v949_v63 }
  0xdc   : > { %v781_v2 = vadd.f32 1e-05, %v749_v8  ;;  %v952_v13 = vadd.f32 %v8632_v56, %v913_v57  ;;  %v8716_v18 = vmul.f32 0.03125, %v460_v21  ;;  %v8718_v19 = vmul.f32 0.03125, %v457_v36  ;;  %6887 = vmatprep.subr.bf16.mxu0 %v8707_v4 }
  0xdd   : > { %8097 = vrsqrt.f32 %v782_v24  ;;  %v1047_v37 = vsel %vm1041_vm1, %v1046_v46, %v995_v38  ;;  %v1108_v40 = vsel %vm1041_vm1, %v995_v38, %v1046_v46  ;;  %v951_v1 = vadd.f32 %v8632_v56, %v912_v9 }
  0xde   : > { %8099 = vrsqrt.f32 %v781_v2  ;;  %v466_v25 = vpop.xlane.xlu1 %465  ;;  %v463_v39 = vpop.xlane.xlu0 %462  ;;  %v8729_v42 = vpack.c.bf16 %v1047_v37, %v1108_v40  ;;  %v996_v27 = vrot.slane %v952_v13, 7  ;;  %v2452_v5 = vrot.slane %v949_v63, 1 }
  0xdf   : > { %v8732_v44 = vmul.f32 0.03125, %v466_v25  ;;  %v2453_v47 = vrot.slane %v950_v0, 1  ;;  %v720_v50 = vmul.f32 %v8716_v18, %v8716_v18  ;;  %v719_v51 = vmul.f32 %v8718_v19, %v8718_v19 }
  0xe0   : > { %v8738_v52 = vmul.f32 0.03125, %v463_v39  ;;  %6823 = vmatprep.mubr.msk.bf16.mxu0 %vm418_vm0, %v8729_v42  ;;  %v2456_v30 = vrot.slane %v952_v13, 1  ;;  %v1048_v33 = vrot.slane %v951_v1, 7  ;;  %v8742_v55 = vpack.c.bf16 %v952_v13, %v951_v1 }
  0xe1   : > { %v2454_v59 = vsel %vm2445_vm2, %v2452_v5, %v2453_v47  ;;  %v2544_v60 = vsel %vm2445_vm2, %v2453_v47, %v2452_v5  ;;  %v2455_v62 = vrot.slane %v951_v1, 1  ;;  %v722_v8 = vmul.f32 %v8732_v44, %v8732_v44 }
  0xe2   : > { %v588_v31 = vpop.xlane.xlu1 %587  ;;  %v585_v58 = vpop.xlane.xlu0 %584  ;;  %v8746_v45 = vpack.c.bf16 %v2544_v60, %v2454_v59  ;;  %v1049_v21 = vsel %vm1041_vm1, %v1048_v33, %v996_v27  ;;  %v1109_v36 = vsel %vm1041_vm1, %v996_v27, %v1048_v33  ;;  %v721_v13 = vmul.f32 %v8738_v52, %v8738_v52 }
  0xe3   : > { %v8094_v16 = vpop.eup %8093  ;;  %v688_v17 = vmul.f32 0.03125, %v588_v31  ;;  %v687_v0 = vmul.f32 0.03125, %v585_v58  ;;  %v8752_v2 = vpack.c.bf16 %v1049_v21, %v1109_v36  ;;  %v2545_v37 = vsel %vm2445_vm2, %v2456_v30, %v2455_v62 }
  0xe4   : > { %v8096_v63 = vpop.eup %8095  ;;  %v876_v57 = vmul.f32 %v8094_v16, %v844_v15  ;;  %v2457_v15 = vsel %vm2445_vm2, %v2455_v62, %v2456_v30 }
  0xe5   : > { %v875_v38 = vmul.f32 %v8096_v63, %v843_v22  ;;  %v752_v9 = vsub.f32 %v688_v17, %v720_v50  ;;  %v751_v24 = vsub.f32 %v687_v0, %v719_v51  ;;  %6824 = vmatmul.mubr.msk.bf16.gmra.mrb[4].mxu0 %vm418_vm0, %v8752_v2  ;;  %v8763_v58 = vpack.c.bf16 %v2545_v37, %v2457_v15 }
  0xe6   : > { %v915_v46 = vmul.f32 %v8621_v41, %v876_v57  ;;  %v594_v25 = vpop.xlane.xlu1 %593  ;;  %v591_v39 = vpop.xlane.xlu0 %590  ;;  %v850_v15 = vsub.f32 %v8482_v53, %v8732_v44 }
  0xe7   : > { %v8098_v40 = vpop.eup %8097  ;;  %v914_v1 = vmul.f32 %v8621_v41, %v875_v38  ;;  %v784_v27 = vadd.f32 1e-05, %v752_v9  ;;  %v783_v22 = vadd.f32 1e-05, %v751_v24  ;;  %v690_v5 = vmul.f32 0.03125, %v594_v25 }
  0xe8   : > { %v8100_v47 = vpop.eup %8099  ;;  %v878_v50 = vmul.f32 %v8098_v40, %v846_v26  ;;  %v689_v51 = vmul.f32 0.03125, %v591_v39  ;;  %v954_v31 = vadd.f32 %v8632_v56, %v915_v46  ;;  %v847_v24 = vsub.f32 %v8472_v49, %v8718_v19 }
  0xe9   : > { %v877_v33 = vmul.f32 %v8100_v47, %v845_v43  ;;  %8101 = vrsqrt.f32 %v784_v27  ;;  %v754_v59 = vsub.f32 %v690_v5, %v722_v8  ;;  %v953_v30 = vadd.f32 %v8632_v56, %v914_v1 }
  0xea   : > { %v917_v60 = vmul.f32 %v8621_v41, %v878_v50  ;;  %8103 = vrsqrt.f32 %v783_v22  ;;  %v753_v16 = vsub.f32 %v689_v51, %v721_v13  ;;  %v472_v17 = vpop.xlane.xlu1 %471  ;;  %v469_v0 = vpop.xlane.xlu0 %468  ;;  %v997_v62 = vrot.slane %v954_v31, 7 }
  0xeb   : > { %v916_v63 = vmul.f32 %v8621_v41, %v877_v33  ;;  %v786_v26 = vadd.f32 1e-05, %v754_v59  ;;  %v1050_v21 = vrot.slane %v953_v30, 7  ;;  %v8769_v38 = vpack.c.bf16 %v954_v31, %v953_v30 }
  0xec   : > { %v785_v57 = vadd.f32 1e-05, %v753_v16  ;;  %v956_v36 = vadd.f32 %v8632_v56, %v917_v60  ;;  %v848_v43 = vsub.f32 %v8469_v48, %v8716_v18  ;;  %v8773_v8 = vmul.f32 0.03125, %v472_v17 }
  0xed   : > { %8105 = vrsqrt.f32 %v786_v26  ;;  %v8775_v9 = vmul.f32 0.03125, %v469_v0  ;;  %v1051_v25 = vsel %vm1041_vm1, %v1050_v21, %v997_v62  ;;  %v1110_v39 = vsel %vm1041_vm1, %v997_v62, %v1050_v21 }
  0xee   : > { %8107 = vrsqrt.f32 %v785_v57  ;;  %v478_v46 = vpop.xlane.xlu1 %477  ;;  %v475_v13 = vpop.xlane.xlu0 %474  ;;  %v849_v48 = vsub.f32 %v8485_v54, %v8738_v52  ;;  %v8785_v18 = vpack.c.bf16 %v1051_v25, %v1110_v39  ;;  %v955_v37 = vadd.f32 %v8632_v56, %v916_v63 }
  0xef   : > { %v8788_v40 = vmul.f32 0.03125, %v478_v46  ;;  %v998_v49 = vrot.slane %v956_v36, 7  ;;  %v2458_v19 = vrot.slane %v953_v30, 1  ;;  %v2459_v1 = vrot.slane %v954_v31, 1 }
  0xf0   : > { %v724_v27 = vmul.f32 %v8773_v8, %v8773_v8  ;;  %v723_v22 = vmul.f32 %v8775_v9, %v8775_v9  ;;  %v8794_v5 = vmul.f32 0.03125, %v475_v13  ;;  %6827 = vmatprep.mubr.msk.bf16.mxu0 %vm418_vm0, %v8785_v18  ;;  %v2462_v53 = vrot.slane %v956_v36, 1 }
  0xf1   : > { %v1052_v52 = vrot.slane %v955_v37, 7  ;;  %v8798_v47 = vpack.c.bf16 %v956_v36, %v955_v37  ;;  %v2460_v50 = vsel %vm2445_vm2, %v2458_v19, %v2459_v1  ;;  %v2546_v51 = vsel %vm2445_vm2, %v2459_v1, %v2458_v19 }
  0xf2   : > { %v600_v54 = vpop.xlane.xlu1 %599  ;;  %v597_v44 = vpop.xlane.xlu0 %596  ;;  %v8802_v30 = vpack.c.bf16 %v2546_v51, %v2460_v50  ;;  %v2461_v60 = vrot.slane %v955_v37, 1  ;;  %v726_v0 = vmul.f32 %v8788_v40, %v8788_v40  ;;  %v725_v13 = vmul.f32 %v8794_v5, %v8794_v5 }
  0xf3   : > { %v8102_v31 = vpop.eup %8101  ;;  %v692_v33 = vmul.f32 0.03125, %v600_v54  ;;  %v691_v59 = vmul.f32 0.03125, %v597_v44  ;;  %v1053_v62 = vsel %vm1041_vm1, %v1052_v52, %v998_v49  ;;  %v1111_v63 = vsel %vm1041_vm1, %v998_v49, %v1052_v52 }
  0xf4   : > { %10532 = vst [vmem:[#allocation5_spill] sm:$0xff] %v8802_v30  ;;  %v8104_v16 = vpop.eup %8103  ;;  %v880_v17 = vmul.f32 %v8102_v31, %v848_v43  ;;  %v8808_v36 = vpack.c.bf16 %v1053_v62, %v1111_v63  ;;  %v2463_v43 = vsel %vm2445_vm2, %v2461_v60, %v2462_v53  ;;  %v2547_v37 = vsel %vm2445_vm2, %v2462_v53, %v2461_v60 }
  0xf5   : > { %v879_v26 = vmul.f32 %v8104_v16, %v847_v24  ;;  %v756_v57 = vsub.f32 %v692_v33, %v724_v27  ;;  %v755_v21 = vsub.f32 %v691_v59, %v723_v22  ;;  %v8819_v50 = vpack.c.bf16 %v2547_v37, %v2463_v43 }
  0xf6   : > { %v919_v46 = vmul.f32 %v8621_v41, %v880_v17  ;;  %v606_v25 = vpop.xlane.xlu1 %605  ;;  %v603_v39 = vpop.xlane.xlu0 %602  ;;  %6828 = vmatmul.mubr.msk.bf16.gmra.mrb[8].mxu0 %vm418_vm0, %v8808_v36 }
  0xf7   : > { %v8106_v19 = vpop.eup %8105  ;;  %v918_v1 = vmul.f32 %v8621_v41, %v879_v26  ;;  %v788_v49 = vadd.f32 1e-05, %v756_v57  ;;  %v787_v24 = vadd.f32 1e-05, %v755_v21  ;;  %v694_v27 = vmul.f32 0.03125, %v606_v25  ;;  %10533 = vst [vmem:[#allocation6_spill] sm:$0xff] %v8819_v50 }
  0xf8   : > { %v8108_v22 = vpop.eup %8107  ;;  %v882_v54 = vmul.f32 %v8106_v19, %v850_v15  ;;  %v693_v44 = vmul.f32 0.03125, %v603_v39  ;;  %v958_v52 = vadd.f32 %v8632_v56, %v919_v46  ;;  %v854_v19 = vsub.f32 %v8517_v10, %v8788_v40 }
  0xf9   : > { %v881_v51 = vmul.f32 %v8108_v22, %v849_v48  ;;  %8109 = vrsqrt.f32 %v788_v49  ;;  %v758_v31 = vsub.f32 %v694_v27, %v726_v0  ;;  %v957_v53 = vadd.f32 %v8632_v56, %v918_v1 }
  0xfa   : > { %v921_v33 = vmul.f32 %v8621_v41, %v882_v54  ;;  %8111 = vrsqrt.f32 %v787_v24  ;;  %v757_v59 = vsub.f32 %v693_v44, %v725_v13  ;;  %v484_v60 = vpop.xlane.xlu1 %483  ;;  %v481_v16 = vpop.xlane.xlu0 %480  ;;  %v999_v17 = vrot.slane %v958_v52, 7 }
  0xfb   : > { %v920_v62 = vmul.f32 %v8621_v41, %v881_v51  ;;  %v790_v15 = vadd.f32 1e-05, %v758_v31  ;;  %v1054_v26 = vrot.slane %v957_v53, 7  ;;  %v8825_v21 = vpack.c.bf16 %v958_v52, %v957_v53 }
  0xfc   : > { %v789_v63 = vadd.f32 1e-05, %v757_v59  ;;  %v960_v57 = vadd.f32 %v8632_v56, %v921_v33  ;;  %v852_v48 = vsub.f32 %v8507_v6, %v8773_v8  ;;  %v8829_v0 = vmul.f32 0.03125, %v484_v60 }
  0xfd   : > { %8113 = vrsqrt.f32 %v790_v15  ;;  %v8831_v46 = vmul.f32 0.03125, %v481_v16  ;;  %v851_v13 = vsub.f32 %v8510_v7, %v8775_v9  ;;  %v1055_v43 = vsel %vm1041_vm1, %v1054_v26, %v999_v17 }
  0xfe   : > { %8115 = vrsqrt.f32 %v789_v63  ;;  %v490_v25 = vpop.xlane.xlu1 %489  ;;  %v487_v39 = vpop.xlane.xlu0 %486  ;;  %v1112_v37 = vsel %vm1041_vm1, %v999_v17, %v1054_v26  ;;  %v853_v6 = vsub.f32 %v8520_v11, %v8794_v5  ;;  %v959_v1 = vadd.f32 %v8632_v56, %v920_v62 }
  0xff   : > { %v8841_v8 = vpack.c.bf16 %v1055_v43, %v1112_v37  ;;  %v8844_v49 = vmul.f32 0.03125, %v490_v25  ;;  %v1000_v7 = vrot.slane %v960_v57, 7  ;;  %v2464_v9 = vrot.slane %v957_v53, 1 }
 0x100   : > { %v2465_v24 = vrot.slane %v958_v52, 1  ;;  %v728_v27 = vmul.f32 %v8829_v0, %v8829_v0  ;;  %v727_v22 = vmul.f32 %v8831_v46, %v8831_v46  ;;  %v8850_v54 = vmul.f32 0.03125, %v487_v39 }
 0x101   : > { %6831 = vmatprep.mubr.msk.bf16.mxu0 %vm418_vm0, %v8841_v8  ;;  %v2468_v10 = vrot.slane %v960_v57, 1  ;;  %v1056_v5 = vrot.slane %v959_v1, 7  ;;  %v8854_v44 = vpack.c.bf16 %v960_v57, %v959_v1  ;;  %v2467_v60 = vrot.slane %v959_v1, 1 }
 0x102   : > { %v612_v11 = vpop.xlane.xlu1 %611  ;;  %v609_v40 = vpop.xlane.xlu0 %608  ;;  %v2466_v51 = vsel %vm2445_vm2, %v2464_v9, %v2465_v24  ;;  %v2548_v52 = vsel %vm2445_vm2, %v2465_v24, %v2464_v9  ;;  %v730_v62 = vmul.f32 %v8844_v49, %v8844_v49  ;;  %v729_v37 = vmul.f32 %v8850_v54, %v8850_v54 }
 0x103   : > { %v8110_v31 = vpop.eup %8109  ;;  %v696_v53 = vmul.f32 0.03125, %v612_v11  ;;  %v695_v33 = vmul.f32 0.03125, %v609_v40  ;;  %v8858_v59 = vpack.c.bf16 %v2548_v52, %v2466_v51  ;;  %v1057_v15 = vsel %vm1041_vm1, %v1056_v5, %v1000_v7 }
 0x104   : > { %v8112_v16 = vpop.eup %8111  ;;  %v884_v17 = vmul.f32 %v8110_v31, %v852_v48  ;;  %v1113_v63 = vsel %vm1041_vm1, %v1000_v7, %v1056_v5  ;;  %v2469_v48 = vsel %vm2445_vm2, %v2467_v60, %v2468_v10  ;;  %v2549_v24 = vsel %vm2445_vm2, %v2468_v10, %v2467_v60 }
 0x105   : > { %10534 = vst [vmem:[#allocation7_spill] sm:$0xff] %v8858_v59  ;;  %v883_v26 = vmul.f32 %v8112_v16, %v851_v13  ;;  %v760_v57 = vsub.f32 %v696_v53, %v728_v27  ;;  %v759_v25 = vsub.f32 %v695_v33, %v727_v22  ;;  %v8864_v39 = vpack.c.bf16 %v1057_v15, %v1113_v63 }
 0x106   : > { %v923_v43 = vmul.f32 %v8621_v41, %v884_v17  ;;  %v618_v1 = vpop.xlane.xlu1 %617  ;;  %v615_v9 = vpop.xlane.xlu0 %614  ;;  %v8875_v31 = vpack.c.bf16 %v2549_v24, %v2469_v48 }
 0x107   : > { %v8114_v11 = vpop.eup %8113  ;;  %v922_v40 = vmul.f32 %v8621_v41, %v883_v26  ;;  %v792_v7 = vadd.f32 1e-05, %v760_v57  ;;  %v791_v13 = vadd.f32 1e-05, %v759_v25  ;;  %6832 = vmatmul.mubr.msk.bf16.gmra.mrb[12].mxu0 %vm418_vm0, %v8864_v39  ;;  %v698_v27 = vmul.f32 0.03125, %v618_v1 }
 0x108   : > { %v8116_v22 = vpop.eup %8115  ;;  %v886_v5 = vmul.f32 %v8114_v11, %v854_v19  ;;  %v697_v51 = vmul.f32 0.03125, %v615_v9  ;;  %v962_v52 = vadd.f32 %v8632_v56, %v923_v43  ;;  %10535 = vst [vmem:[#allocation8_spill] sm:$0xff] %v8875_v31 }
 0x109   : > { %v885_v53 = vmul.f32 %v8116_v22, %v853_v6  ;;  %8117 = vrsqrt.f32 %v792_v7  ;;  %v762_v33 = vsub.f32 %v698_v27, %v730_v62  ;;  %v961_v10 = vadd.f32 %v8632_v56, %v922_v40 }
 0x10a   : > { %v925_v60 = vmul.f32 %v8621_v41, %v886_v5  ;;  %8119 = vrsqrt.f32 %v791_v13  ;;  %v761_v16 = vsub.f32 %v697_v51, %v729_v37  ;;  %v496_v17 = vpop.xlane.xlu1 %495  ;;  %v493_v15 = vpop.xlane.xlu0 %492  ;;  %v1001_v63 = vrot.slane %v962_v52, 7 }
 0x10b   : > { %v924_v26 = vmul.f32 %v8621_v41, %v885_v53  ;;  %v794_v19 = vadd.f32 1e-05, %v762_v33  ;;  %v1058_v25 = vrot.slane %v961_v10, 7  ;;  %v8881_v1 = vpack.c.bf16 %v962_v52, %v961_v10 }
 0x10c   : > { %v793_v57 = vadd.f32 1e-05, %v761_v16  ;;  %v964_v43 = vadd.f32 %v8632_v56, %v925_v60  ;;  %v856_v6 = vsub.f32 %v8539_v28, %v8829_v0  ;;  %v8885_v62 = vmul.f32 0.03125, %v496_v17 }
 0x10d   : > { %8121 = vrsqrt.f32 %v794_v19  ;;  %v8887_v9 = vmul.f32 0.03125, %v493_v15  ;;  %v855_v37 = vsub.f32 %v8542_v29, %v8831_v46  ;;  %v1059_v11 = vsel %vm1041_vm1, %v1058_v25, %v1001_v63 }
 0x10e   : > { %8123 = vrsqrt.f32 %v793_v57  ;;  %v502_v48 = vpop.xlane.xlu1 %501  ;;  %v499_v24 = vpop.xlane.xlu0 %498  ;;  %v1114_v40 = vsel %vm1041_vm1, %v1001_v63, %v1058_v25  ;;  %v858_v7 = vsub.f32 %v8549_v34, %v8844_v49  ;;  %v857_v28 = vsub.f32 %v8552_v35, %v8850_v54 }
 0x10f   : > { %v8897_v0 = vpack.c.bf16 %v1059_v11, %v1114_v40  ;;  %v963_v13 = vadd.f32 %v8632_v56, %v924_v26  ;;  %v8900_v27 = vmul.f32 0.03125, %v502_v48  ;;  %v1002_v29 = vrot.slane %v964_v43, 7 }
 0x110   : > { %v2470_v46 = vrot.slane %v961_v10, 1  ;;  %v2471_v22 = vrot.slane %v962_v52, 1  ;;  %v732_v5 = vmul.f32 %v8885_v62, %v8885_v62  ;;  %v731_v51 = vmul.f32 %v8887_v9, %v8887_v9 }
 0x111   : > { %v8906_v53 = vmul.f32 0.03125, %v499_v24  ;;  %6835 = vmatprep.mubr.msk.bf16.mxu0 %vm418_vm0, %v8897_v0  ;;  %v2474_v34 = vrot.slane %v964_v43, 1  ;;  %v1060_v54 = vrot.slane %v963_v13, 7  ;;  %v8910_v33 = vpack.c.bf16 %v964_v43, %v963_v13 }
 0x112   : > { %v624_v35 = vpop.xlane.xlu1 %623  ;;  %v621_v49 = vpop.xlane.xlu0 %620  ;;  %v2472_v10 = vsel %vm2445_vm2, %v2470_v46, %v2471_v22  ;;  %v2550_v52 = vsel %vm2445_vm2, %v2471_v22, %v2470_v46  ;;  %v2473_v63 = vrot.slane %v963_v13, 1  ;;  %v734_v57 = vmul.f32 %v8900_v27, %v8900_v27 }
 0x113   : > { %v8118_v60 = vpop.eup %8117  ;;  %v700_v16 = vmul.f32 0.03125, %v624_v35  ;;  %v699_v17 = vmul.f32 0.03125, %v621_v49  ;;  %v8914_v15 = vpack.c.bf16 %v2550_v52, %v2472_v10  ;;  %v1061_v25 = vsel %vm1041_vm1, %v1060_v54, %v1002_v29 }
 0x114   : > { %v8120_v26 = vpop.eup %8119  ;;  %v888_v19 = vmul.f32 %v8118_v60, %v856_v6  ;;  %v1115_v43 = vsel %vm1041_vm1, %v1002_v29, %v1060_v54  ;;  %v733_v22 = vmul.f32 %v8906_v53, %v8906_v53  ;;  %v2475_v6 = vsel %vm2445_vm2, %v2473_v63, %v2474_v34 }
 0x115   : > { %10536 = vst [vmem:[#allocation9_spill] sm:$0xff] %v8914_v15  ;;  %v887_v48 = vmul.f32 %v8120_v26, %v855_v37  ;;  %v764_v24 = vsub.f32 %v700_v16, %v732_v5  ;;  %v763_v11 = vsub.f32 %v699_v17, %v731_v51  ;;  %v8920_v40 = vpack.c.bf16 %v1061_v25, %v1115_v43 }
 0x116   : > { %v927_v46 = vmul.f32 %v8621_v41, %v888_v19  ;;  %v630_v13 = vpop.xlane.xlu1 %629  ;;  %v627_v35 = vpop.xlane.xlu0 %626  ;;  %v2551_v49 = vsel %vm2445_vm2, %v2474_v34, %v2473_v63 }
 0x117   : > { %v8122_v10 = vpop.eup %8121  ;;  %v926_v52 = vmul.f32 %v8621_v41, %v887_v48  ;;  %v796_v29 = vadd.f32 1e-05, %v764_v24  ;;  %v795_v37 = vadd.f32 1e-05, %v763_v11  ;;  %6836 = vmatmul.mubr.msk.bf16.gmra.mrb[16].mxu0 %vm418_vm0, %v8920_v40  ;;  %v702_v5 = vmul.f32 0.03125, %v630_v13 }
 0x118   : > { %v8124_v51 = vpop.eup %8123  ;;  %v890_v54 = vmul.f32 %v8122_v10, %v858_v7  ;;  %v701_v60 = vmul.f32 0.03125, %v627_v35  ;;  %v966_v16 = vadd.f32 %v8632_v56, %v927_v46  ;;  %v8931_v17 = vpack.c.bf16 %v2551_v49, %v2475_v6  ;;  %v8145_v35 = vld [vmem:[%s8370_s14 + $0xc8] sm:$0xff]  ;;  %v8146_v10 = vld [vmem:[%s8370_s14 + $0xc0] sm:$0xff] }
 0x119   : > { %v889_v26 = vmul.f32 %v8124_v51, %v857_v28  ;;  %8125 = vrsqrt.f32 %v796_v29  ;;  %v766_v34 = vsub.f32 %v702_v5, %v734_v57  ;;  %v965_v63 = vadd.f32 %v8632_v56, %v926_v52 }
 0x11a   : > { %10537 = vst [vmem:[#allocation10_spill] sm:$0xff] %v8931_v17  ;;  %v929_v19 = vmul.f32 %v8621_v41, %v890_v54  ;;  %8127 = vrsqrt.f32 %v795_v37  ;;  %v765_v25 = vsub.f32 %v701_v60, %v733_v22  ;;  %v508_v43 = vpop.xlane.xlu1 %507  ;;  %v505_v48 = vpop.xlane.xlu0 %504  ;;  %v1003_v24 = vrot.slane %v966_v16, 7  ;;  %v8147_v54 = vld [vmem:[%s8370_s14 + $0xd8] sm:$0xff] }
 0x11b   : > { %v928_v7 = vmul.f32 %v8621_v41, %v889_v26  ;;  %v798_v11 = vadd.f32 1e-05, %v766_v34  ;;  %v1062_v13 = vrot.slane %v965_v63, 7  ;;  %v8937_v57 = vpack.c.bf16 %v966_v16, %v965_v63  ;;  %v8148_v26 = vld [vmem:[%s8370_s14 + $0xd0] sm:$0xff] }
 0x11c   : > { %v797_v46 = vadd.f32 1e-05, %v765_v25  ;;  %v968_v28 = vadd.f32 %v8632_v56, %v929_v19  ;;  %v860_v6 = vsub.f32 %v8145_v35, %v8885_v62  ;;  %v8941_v49 = vmul.f32 0.03125, %v508_v43 }
 0x11d   : > { %8129 = vrsqrt.f32 %v798_v11  ;;  %v8943_v22 = vmul.f32 0.03125, %v505_v48  ;;  %v859_v52 = vsub.f32 %v8146_v10, %v8887_v9  ;;  %v1063_v5 = vsel %vm1041_vm1, %v1062_v13, %v1003_v24 }
 0x11e   : > { %8131 = vrsqrt.f32 %v797_v46  ;;  %v514_v29 = vpop.xlane.xlu1 %513  ;;  %v511_v37 = vpop.xlane.xlu0 %510  ;;  %v1116_v51 = vsel %vm1041_vm1, %v1003_v24, %v1062_v13  ;;  %v862_v60 = vsub.f32 %v8147_v54, %v8900_v27  ;;  %v861_v62 = vsub.f32 %v8148_v26, %v8906_v53 }
 0x11f   : > { %v8953_v34 = vpack.c.bf16 %v1063_v5, %v1116_v51  ;;  %v967_v19 = vadd.f32 %v8632_v56, %v928_v7  ;;  %v8956_v25 = vmul.f32 0.03125, %v514_v29  ;;  %v1004_v9 = vrot.slane %v968_v28, 7 }
 0x120   : > { %v2476_v43 = vrot.slane %v965_v63, 1  ;;  %v2477_v48 = vrot.slane %v966_v16, 1  ;;  %v736_v11 = vmul.f32 %v8941_v49, %v8941_v49  ;;  %v735_v24 = vmul.f32 %v8943_v22, %v8943_v22 }
 0x121   : > { %v8962_v46 = vmul.f32 0.03125, %v511_v37  ;;  %6839 = vmatprep.mubr.msk.bf16.mxu0 %vm418_vm0, %v8953_v34  ;;  %v2480_v27 = vrot.slane %v968_v28, 1  ;;  %v1064_v7 = vrot.slane %v967_v19, 7  ;;  %v8966_v35 = vpack.c.bf16 %v968_v28, %v967_v19 }
 0x122   : > { %v636_v53 = vpop.xlane.xlu1 %635  ;;  %v633_v13 = vpop.xlane.xlu0 %632  ;;  %v2478_v63 = vsel %vm2445_vm2, %v2476_v43, %v2477_v48  ;;  %v2552_v16 = vsel %vm2445_vm2, %v2477_v48, %v2476_v43  ;;  %v2479_v37 = vrot.slane %v967_v19, 1  ;;  %v738_v17 = vmul.f32 %v8956_v25, %v8956_v25 }
 0x123   : > { %v8126_v10 = vpop.eup %8125  ;;  %v704_v29 = vmul.f32 0.03125, %v636_v53  ;;  %v703_v5 = vmul.f32 0.03125, %v633_v13  ;;  %v8970_v51 = vpack.c.bf16 %v2552_v16, %v2478_v63  ;;  %v1065_v15 = vsel %vm1041_vm1, %v1064_v7, %v1004_v9 }
 0x124   : > { %v8128_v54 = vpop.eup %8127  ;;  %v892_v26 = vmul.f32 %v8126_v10, %v860_v6  ;;  %v1117_v28 = vsel %vm1041_vm1, %v1004_v9, %v1064_v7  ;;  %v737_v48 = vmul.f32 %v8962_v46, %v8962_v46  ;;  %v2481_v6 = vsel %vm2445_vm2, %v2479_v37, %v2480_v27 }
 0x125   : > { %v891_v31 = vmul.f32 %v8128_v54, %v859_v52  ;;  %v768_v59 = vsub.f32 %v704_v29, %v736_v11  ;;  %v767_v50 = vsub.f32 %v703_v5, %v735_v24  ;;  %v8976_v30 = vpack.c.bf16 %v1065_v15, %v1117_v28 }
 0x126   : > { %v931_v43 = vmul.f32 %v8621_v41, %v892_v26  ;;  %v642_v19 = vpop.xlane.xlu1 %641  ;;  %v639_v53 = vpop.xlane.xlu0 %638  ;;  %v2553_v13 = vsel %vm2445_vm2, %v2480_v27, %v2479_v37 }
 0x127   : > { %v8130_v63 = vpop.eup %8129  ;;  %v930_v16 = vmul.f32 %v8621_v41, %v891_v31  ;;  %v800_v9 = vadd.f32 1e-05, %v768_v59  ;;  %v799_v52 = vadd.f32 1e-05, %v767_v50  ;;  %6840 = vmatmul.mubr.msk.bf16.gmra.mrb[20].mxu0 %vm418_vm0, %v8976_v30  ;;  %v706_v15 = vmul.f32 0.03125, %v642_v19 }
 0x128   : > { %v8132_v11 = vpop.eup %8131  ;;  %v894_v24 = vmul.f32 %v8130_v63, %v862_v60  ;;  %v705_v7 = vmul.f32 0.03125, %v639_v53  ;;  %v970_v10 = vadd.f32 %v8632_v56, %v931_v43  ;;  %v8987_v29 = vpack.c.bf16 %v2553_v13, %v2481_v6 }
 0x129   : > { %v893_v5 = vmul.f32 %v8132_v11, %v861_v62  ;;  %8133 = vrsqrt.f32 %v800_v9  ;;  %v770_v54 = vsub.f32 %v706_v15, %v738_v17  ;;  %v969_v27 = vadd.f32 %v8632_v56, %v930_v16 }
 0x12a   : > { %v933_v31 = vmul.f32 %v8621_v41, %v894_v24  ;;  %8135 = vrsqrt.f32 %v799_v52  ;;  %v769_v50 = vsub.f32 %v705_v7, %v737_v48  ;;  %v1005_v59 = vrot.slane %v970_v10, 7 }
 0x12b   : > { %v932_v37 = vmul.f32 %v8621_v41, %v893_v5  ;;  %v802_v26 = vadd.f32 1e-05, %v770_v54  ;;  %v1066_v28 = vrot.slane %v969_v27, 7  ;;  %v8992_v60 = vpack.c.bf16 %v970_v10, %v969_v27 }
 0x12c   : > { %v801_v19 = vadd.f32 1e-05, %v769_v50  ;;  %v972_v43 = vadd.f32 %v8632_v56, %v933_v31  ;;  %v2482_v53 = vrot.slane %v969_v27, 1  ;;  %v2483_v62 = vrot.slane %v970_v10, 1  ;;  %v8149_v10 = vld [vmem:[%s8370_s14 + $0xe8] sm:$0xff] }
 0x12d   : > { %8137 = vrsqrt.f32 %v802_v26  ;;  %v1067_v17 = vsel %vm1041_vm1, %v1066_v28, %v1005_v59  ;;  %v1118_v6 = vsel %vm1041_vm1, %v1005_v59, %v1066_v28  ;;  %v971_v48 = vadd.f32 %v8632_v56, %v932_v37  ;;  %v8150_v59 = vld [vmem:[%s8370_s14 + $0xe0] sm:$0xff] }
 0x12e   : > { %8139 = vrsqrt.f32 %v801_v19  ;;  %v8998_v13 = vpack.c.bf16 %v1067_v17, %v1118_v6  ;;  %v1006_v41 = vrot.slane %v972_v43, 7  ;;  %v2484_v63 = vsel %vm2445_vm2, %v2482_v53, %v2483_v62 }
 0x12f   : > { %v1068_v16 = vrot.slane %v971_v48, 7  ;;  %v9001_v9 = vpack.c.bf16 %v972_v43, %v971_v48  ;;  %v2554_v52 = vsel %vm2445_vm2, %v2483_v62, %v2482_v53  ;;  %v2485_v15 = vrot.slane %v971_v48, 1  ;;  %v8152_v62 = vld [vmem:[%s10506_s1] ss:$0 sm:$0xff]  ;;  %v8153_v48 = vld [vmem:[%s8370_s14 + $0xf0] sm:$0xff] }
 0x130   : > { %6843 = vmatprep.mubr.msk.bf16.mxu0 %vm418_vm0, %v8998_v13  ;;  %v9006_v11 = vpack.c.bf16 %v2554_v52, %v2484_v63  ;;  %v2486_v24 = vrot.slane %v972_v43, 1  ;;  %v864_v5 = vsub.f32 %v8149_v10, %v8941_v49  ;;  %v863_v37 = vsub.f32 %v8150_v59, %v8943_v22  ;;  %v8151_v49 = vld [vmem:[%s8370_s14 + $0xf8] sm:$0xff]  ;;  %v8154_v52 = vld [vmem:[%s10507_s2] ss:$0 sm:$0xff] }
 0x131   : > { %v1069_v56 = vsel %vm1041_vm1, %v1068_v16, %v1006_v41  ;;  %v1119_v7 = vsel %vm1041_vm1, %v1006_v41, %v1068_v16  ;;  %v866_v53 = vsub.f32 %v8151_v49, %v8956_v25  ;;  %v865_v22 = vsub.f32 %v8153_v48, %v8962_v46 }
 0x132   : > { %v9012_v54 = vpack.c.bf16 %v1069_v56, %v1119_v7  ;;  %v2487_v27 = vsel %vm2445_vm2, %v2485_v15, %v2486_v24  ;;  %v2555_v31 = vsel %vm2445_vm2, %v2486_v24, %v2485_v15 }
 0x133   : > { %v8134_v50 = vpop.eup %8133  ;;  %v9018_v26 = vpack.c.bf16 %v2555_v31, %v2487_v27 }
 0x134   : > { %v8136_v28 = vpop.eup %8135  ;;  %v896_v19 = vmul.f32 %v8134_v50, %v864_v5  ;;  %6844 = vmatmul.mubr.msk.bf16.gmra.mrb[24].mxu0 %vm418_vm0, %v9012_v54 }
 0x135   : > { %v895_v43 = vmul.f32 %v8136_v28, %v863_v37 }
 0x136   : > { %v935_v17 = vmul.f32 %v8152_v62, %v896_v19 }
 0x137   : > { %v8138_v6 = vpop.eup %8137  ;;  %v934_v41 = vmul.f32 %v8152_v62, %v895_v43 }
 0x138   : > { %v8140_v63 = vpop.eup %8139  ;;  %v898_v16 = vmul.f32 %v8138_v6, %v866_v53  ;;  %v974_v15 = vadd.f32 %v8154_v52, %v935_v17 }
 0x139   : > { %v897_v24 = vmul.f32 %v8140_v63, %v865_v22  ;;  %v973_v56 = vadd.f32 %v8154_v52, %v934_v41 }
 0x13a   : > { %v937_v25 = vmul.f32 %v8152_v62, %v898_v16  ;;  %v1007_v7 = vrot.slane %v974_v15, 7  ;;  %v2489_v10 = vrot.slane %v974_v15, 1 }
 0x13b   : > { %v936_v5 = vmul.f32 %v8152_v62, %v897_v24  ;;  %v1070_v27 = vrot.slane %v973_v56, 7  ;;  %v9032_v31 = vpack.c.bf16 %v974_v15, %v973_v56  ;;  %v2488_v50 = vrot.slane %v973_v56, 1  ;;  %v8046_v56 = vld [vmem:[%s10508_s3 + $0x28] sm:$0xff]  }
 0x13c   : > { %v976_v59 = vadd.f32 %v8154_v52, %v937_v25  ;;  %v8047_v25 = vld [vmem:[%s10508_s3 + $0x30] sm:$0xff]  }
 0x13d   : > { %v1071_v46 = vsel %vm1041_vm1, %v1070_v27, %v1007_v7  ;;  %v1120_v37 = vsel %vm1041_vm1, %v1007_v7, %v1070_v27  ;;  %v975_v28 = vadd.f32 %v8154_v52, %v936_v5  ;;  %v2490_v19 = vsel %vm2445_vm2, %v2488_v50, %v2489_v10  ;;  %v8049_v7 = vld [vmem:[%s10508_s3 + $0x40] sm:$0xff]  }
 0x13e   : > { %v1136_v43 = vpack.c.bf16 %v1071_v46, %v1120_v37  ;;  %v1008_v49 = vrot.slane %v976_v59, 7  ;;  %v2492_v53 = vrot.slane %v976_v59, 1  ;;  %v2556_v17 = vsel %vm2445_vm2, %v2489_v10, %v2488_v50 }
 0x13f   : > { %v1072_v6 = vrot.slane %v975_v28, 7  ;;  %v9038_v48 = vpack.c.bf16 %v976_v59, %v975_v28  ;;  %v2491_v62 = vrot.slane %v975_v28, 1  ;;  %v9040_v22 = vpack.c.bf16 %v2556_v17, %v2490_v19 }
 0x140   : > { %6847 = vmatprep.mubr.msk.bf16.mxu0 %vm418_vm0, %v1136_v43 }
 0x141   : > { %v1073_v41 = vsel %vm1041_vm1, %v1072_v6, %v1008_v49  ;;  %v1121_v63 = vsel %vm1041_vm1, %v1008_v49, %v1072_v6  ;;  %v2493_v16 = vsel %vm2445_vm2, %v2491_v62, %v2492_v53  ;;  %v2557_v52 = vsel %vm2445_vm2, %v2492_v53, %v2491_v62 }
 0x142   : > { %v1137_v15 = vpack.c.bf16 %v1073_v41, %v1121_v63  ;;  %v9047_v24 = vpack.c.bf16 %v2557_v52, %v2493_v16 }
 0x144   : > { %6848 = vmatmul.mubr.msk.bf16.gmra.mrb[28].mxu0 %vm418_vm0, %v1137_v15 }
 0x145   : > { %6855 = vmatprep.mubr.msk.bf16.mxu0 %vm418_vm0, %v1137_v15 }
 0x14c   : > { %6856 = vmatmul.mubr.msk.bf16.vlgmr.msra.gmra.mrb[0].mxu0 %vm418_vm0, %v8662_v61 }
 0x14d   : > { %6888 = vmatpush3.bf16.msra.mxu0 %v8707_v4  ;;  %6859 = vmatprep.mubr.msk.bf16.mxu0 %vm418_vm0, %v8686_v32  ;;  %v8048_v4 = vld [vmem:[%s10508_s3 + $0x38] sm:$0xff]  }
 0x14e   : > { %6889 = vmatprep.subr.bf16.mxu0 %v8046_v56 }
 0x151   : > { %6890 = vmatpush3.bf16.msra.mxu0 %v8046_v56 }
 0x152   : > { %6923 = vmatprep.subr.bf16.mxu0 %v8047_v25 }
 0x154   : > { %6860 = vmatmul.mubr.msk.bf16.gmra.mrb[4].mxu0 %vm418_vm0, %v8729_v42 }
 0x155   : > { %6863 = vmatprep.mubr.msk.bf16.mxu0 %vm418_vm0, %v8752_v2 }
 0x15c   : > { %6864 = vmatmul.mubr.msk.bf16.gmra.mrb[8].mxu0 %vm418_vm0, %v8785_v18 }
 0x15d   : > { %6867 = vmatprep.mubr.msk.bf16.mxu0 %vm418_vm0, %v8808_v36 }
 0x164   : > { %6868 = vmatmul.mubr.msk.bf16.gmra.mrb[12].mxu0 %vm418_vm0, %v8841_v8 }
 0x165   : > { %6871 = vmatprep.mubr.msk.bf16.mxu0 %vm418_vm0, %v8864_v39 }
 0x16c   : > { %6872 = vmatmul.mubr.msk.bf16.gmra.mrb[16].mxu0 %vm418_vm0, %v8897_v0 }
 0x16d   : > { %6875 = vmatprep.mubr.msk.bf16.mxu0 %vm418_vm0, %v8920_v40 }
 0x174   : > { %6876 = vmatmul.mubr.msk.bf16.gmra.mrb[20].mxu0 %vm418_vm0, %v8953_v34 }
 0x175   : > { %6879 = vmatprep.mubr.msk.bf16.mxu0 %vm418_vm0, %v8976_v30 }
 0x17c   : > { %6880 = vmatmul.mubr.msk.bf16.gmra.mrb[24].mxu0 %vm418_vm0, %v8998_v13 }
 0x17d   : > { %6883 = vmatprep.mubr.msk.bf16.mxu0 %vm418_vm0, %v9012_v54 }
 0x184   : > { %6884 = vmatmul.mubr.msk.bf16.gmra.mrb[28].mxu0 %vm418_vm0, %v1136_v43 }
 0x185   : > { %6891 = vmatprep.mubr.msk.bf16.mxu0 %vm418_vm0, %v8686_v32  ;;  %v8050_v32 = vld [vmem:[%s10508_s3 + $0x48] sm:$0xff]  }
 0x18c   : > { %6892 = vmatmul.mubr.msk.bf16.vlgmr.msra.gmra.mrb[0].mxu0 %vm418_vm0, %v8729_v42  ;;  %v8051_v42 = vld [vmem:[%s10508_s3 + $0x50] sm:$0xff]  }
 0x18d   : > { %6924 = vmatpush3.bf16.msra.mxu0 %v8047_v25  ;;  %6895 = vmatprep.mubr.msk.bf16.mxu0 %vm418_vm0, %v8752_v2  ;;  %v8053_v2 = vld [vmem:[%s10508_s3 + $0x60] sm:$0xff]  }
 0x18e   : > { %6925 = vmatprep.subr.bf16.mxu0 %v8048_v4 }
 0x191   : > { %6926 = vmatpush3.bf16.msra.mxu0 %v8048_v4 }
 0x192   : > { %6959 = vmatprep.subr.bf16.mxu0 %v8049_v7 }
 0x194   : > { %6896 = vmatmul.mubr.msk.bf16.gmra.mrb[4].mxu0 %vm418_vm0, %v8785_v18  ;;  %v8054_v18 = vld [vmem:[%s10508_s3 + $0x68] sm:$0xff]  }
 0x195   : > { %6899 = vmatprep.mubr.msk.bf16.mxu0 %vm418_vm0, %v8808_v36  ;;  %v10542_v36 = vld [vmem:[#allocation9_spill] sm:$0xff] }
 0x19c   : > { %6900 = vmatmul.mubr.msk.bf16.gmra.mrb[8].mxu0 %vm418_vm0, %v8841_v8  ;;  %v8058_v8 = vld [vmem:[%s10508_s3 + $0x88] sm:$0xff]  }
 0x19d   : > { %6903 = vmatprep.mubr.msk.bf16.mxu0 %vm418_vm0, %v8864_v39 }
 0x1a4   : > { %6904 = vmatmul.mubr.msk.bf16.gmra.mrb[12].mxu0 %vm418_vm0, %v8897_v0 }
 0x1a5   : > { %6907 = vmatprep.mubr.msk.bf16.mxu0 %vm418_vm0, %v8920_v40 }
 0x1ac   : > { %6908 = vmatmul.mubr.msk.bf16.gmra.mrb[16].mxu0 %vm418_vm0, %v8953_v34 }
 0x1ad   : > { %6911 = vmatprep.mubr.msk.bf16.mxu0 %vm418_vm0, %v8976_v30  ;;  %v8055_v30 = vld [vmem:[%s10508_s3 + $0x70] sm:$0xff]  }
 0x1b4   : > { %6912 = vmatmul.mubr.msk.bf16.gmra.mrb[20].mxu0 %vm418_vm0, %v8998_v13 }
 0x1b5   : > { %6915 = vmatprep.mubr.msk.bf16.mxu0 %vm418_vm0, %v9012_v54 }
 0x1bc   : > { %6916 = vmatmul.mubr.msk.bf16.gmra.mrb[24].mxu0 %vm418_vm0, %v1136_v43 }
 0x1bd   : > { %6919 = vmatprep.mubr.msk.bf16.mxu0 %vm418_vm0, %v1137_v15 }
 0x1c4   : > { %6920 = vmatmul.mubr.msk.bf16.gmra.mrb[28].mxu0 %vm418_vm0, %v8662_v61  ;;  %v8052_v61 = vld [vmem:[%s10508_s3 + $0x58] sm:$0xff]  }
 0x1c5   : > { %6927 = vmatprep.mubr.msk.bf16.mxu0 %vm418_vm0, %v9038_v48 }
 0x1cc   : > { %6928 = vmatmul.mubr.msk.bf16.vlgmr.msra.gmra.mrb[0].mxu0 %vm418_vm0, %v8664_v23 }
 0x1cd   : > { %6960 = vmatpush3.bf16.msra.mxu0 %v8049_v7  ;;  %6931 = vmatprep.mubr.msk.bf16.mxu0 %vm418_vm0, %v8677_v3 }
 0x1ce   : > { %6961 = vmatprep.subr.bf16.mxu0 %v8050_v32 }
 0x1d1   : > { %6962 = vmatpush3.bf16.msra.mxu0 %v8050_v32 }
 0x1d2   : > { %6995 = vmatprep.subr.bf16.mxu0 %v8051_v42 }
 0x1d4   : > { %6932 = vmatmul.mubr.msk.bf16.gmra.mrb[4].mxu0 %vm418_vm0, %v8712_v14 }
 0x1d5   : > { %6935 = vmatprep.mubr.msk.bf16.mxu0 %vm418_vm0, %v8742_v55 }
 0x1dc   : > { %6936 = vmatmul.mubr.msk.bf16.gmra.mrb[8].mxu0 %vm418_vm0, %v8769_v38 }
 0x1dd   : > { %6939 = vmatprep.mubr.msk.bf16.mxu0 %vm418_vm0, %v8798_v47 }
 0x1e4   : > { %6940 = vmatmul.mubr.msk.bf16.gmra.mrb[12].mxu0 %vm418_vm0, %v8825_v21 }
 0x1e5   : > { %6943 = vmatprep.mubr.msk.bf16.mxu0 %vm418_vm0, %v8854_v44 }
 0x1ec   : > { %6944 = vmatmul.mubr.msk.bf16.gmra.mrb[16].mxu0 %vm418_vm0, %v8881_v1 }
 0x1ed   : > { %6947 = vmatprep.mubr.msk.bf16.mxu0 %vm418_vm0, %v8910_v33 }
 0x1f4   : > { %6948 = vmatmul.mubr.msk.bf16.gmra.mrb[20].mxu0 %vm418_vm0, %v8937_v57 }
 0x1f5   : > { %6951 = vmatprep.mubr.msk.bf16.mxu0 %vm418_vm0, %v8966_v35 }
 0x1fc   : > { %6952 = vmatmul.mubr.msk.bf16.gmra.mrb[24].mxu0 %vm418_vm0, %v8992_v60 }
 0x1fd   : > { %6955 = vmatprep.mubr.msk.bf16.mxu0 %vm418_vm0, %v9001_v9 }
 0x204   : > { %6956 = vmatmul.mubr.msk.bf16.gmra.mrb[28].mxu0 %vm418_vm0, %v9032_v31 }
 0x205   : > { %6963 = vmatprep.mubr.msk.bf16.mxu0 %vm418_vm0, %v8664_v23 }
 0x20c   : > { %6964 = vmatmul.mubr.msk.bf16.vlgmr.msra.gmra.mrb[0].mxu0 %vm418_vm0, %v8677_v3 }
 0x20d   : > { %6996 = vmatpush3.bf16.msra.mxu0 %v8051_v42  ;;  %6967 = vmatprep.mubr.msk.bf16.mxu0 %vm418_vm0, %v8712_v14 }
 0x20e   : > { %6997 = vmatprep.subr.bf16.mxu0 %v8052_v61 }
 0x211   : > { %6998 = vmatpush3.bf16.msra.mxu0 %v8052_v61 }
 0x212   : > { %7031 = vmatprep.subr.bf16.mxu0 %v8053_v2 }
 0x214   : > { %6968 = vmatmul.mubr.msk.bf16.gmra.mrb[4].mxu0 %vm418_vm0, %v8742_v55 }
 0x215   : > { %6971 = vmatprep.mubr.msk.bf16.mxu0 %vm418_vm0, %v8769_v38 }
 0x21c   : > { %6972 = vmatmul.mubr.msk.bf16.gmra.mrb[8].mxu0 %vm418_vm0, %v8798_v47 }
 0x21d   : > { %6975 = vmatprep.mubr.msk.bf16.mxu0 %vm418_vm0, %v8825_v21 }
 0x224   : > { %6976 = vmatmul.mubr.msk.bf16.gmra.mrb[12].mxu0 %vm418_vm0, %v8854_v44 }
 0x225   : > { %6979 = vmatprep.mubr.msk.bf16.mxu0 %vm418_vm0, %v8881_v1 }
 0x22c   : > { %6980 = vmatmul.mubr.msk.bf16.gmra.mrb[16].mxu0 %vm418_vm0, %v8910_v33 }
 0x22d   : > { %6983 = vmatprep.mubr.msk.bf16.mxu0 %vm418_vm0, %v8937_v57 }
 0x234   : > { %6984 = vmatmul.mubr.msk.bf16.gmra.mrb[20].mxu0 %vm418_vm0, %v8966_v35 }
 0x235   : > { %6987 = vmatprep.mubr.msk.bf16.mxu0 %vm418_vm0, %v8992_v60 }
 0x23c   : > { %6988 = vmatmul.mubr.msk.bf16.gmra.mrb[24].mxu0 %vm418_vm0, %v9001_v9 }
 0x23d   : > { %6991 = vmatprep.mubr.msk.bf16.mxu0 %vm418_vm0, %v9032_v31 }
 0x244   : > { %6992 = vmatmul.mubr.msk.bf16.gmra.mrb[28].mxu0 %vm418_vm0, %v9038_v48 }
 0x245   : > { %6999 = vmatprep.mubr.msk.bf16.mxu0 %vm418_vm0, %v8677_v3  ;;  %v8056_v3 = vld [vmem:[%s10508_s3 + $0x78] sm:$0xff]  }
 0x24c   : > { %7000 = vmatmul.mubr.msk.bf16.vlgmr.msra.gmra.mrb[0].mxu0 %vm418_vm0, %v8712_v14  ;;  %v8057_v14 = vld [vmem:[%s10508_s3 + $0x80] sm:$0xff]  }
 0x24d   : > { %7032 = vmatpush3.bf16.msra.mxu0 %v8053_v2  ;;  %7003 = vmatprep.mubr.msk.bf16.mxu0 %vm418_vm0, %v8742_v55  ;;  %v10539_v55 = vld [vmem:[#allocation6_spill] sm:$0xff] }
 0x24e   : > { %7033 = vmatprep.subr.bf16.mxu0 %v8054_v18 }
 0x251   : > { %7034 = vmatpush3.bf16.msra.mxu0 %v8054_v18 }
 0x252   : > { %7067 = vmatprep.subr.bf16.mxu0 %v8055_v30 }
 0x254   : > { %7004 = vmatmul.mubr.msk.bf16.gmra.mrb[4].mxu0 %vm418_vm0, %v8769_v38  ;;  %v10540_v38 = vld [vmem:[#allocation7_spill] sm:$0xff] }
 0x255   : > { %7007 = vmatprep.mubr.msk.bf16.mxu0 %vm418_vm0, %v8798_v47  ;;  %v10541_v47 = vld [vmem:[#allocation8_spill] sm:$0xff] }
 0x25c   : > { %7008 = vmatmul.mubr.msk.bf16.gmra.mrb[8].mxu0 %vm418_vm0, %v8825_v21  ;;  %v10543_v21 = vld [vmem:[#allocation10_spill] sm:$0xff] }
 0x25d   : > { %7011 = vmatprep.mubr.msk.bf16.mxu0 %vm418_vm0, %v8854_v44 }
 0x264   : > { %7012 = vmatmul.mubr.msk.bf16.gmra.mrb[12].mxu0 %vm418_vm0, %v8881_v1 }
 0x265   : > { %7015 = vmatprep.mubr.msk.bf16.mxu0 %vm418_vm0, %v8910_v33 }
 0x26c   : > { %7016 = vmatmul.mubr.msk.bf16.gmra.mrb[16].mxu0 %vm418_vm0, %v8937_v57 }
 0x26d   : > { %7019 = vmatprep.mubr.msk.bf16.mxu0 %vm418_vm0, %v8966_v35 }
 0x274   : > { %7020 = vmatmul.mubr.msk.bf16.gmra.mrb[20].mxu0 %vm418_vm0, %v8992_v60 }
 0x275   : > { %7023 = vmatprep.mubr.msk.bf16.mxu0 %vm418_vm0, %v9001_v9 }
 0x27c   : > { %7024 = vmatmul.mubr.msk.bf16.gmra.mrb[24].mxu0 %vm418_vm0, %v9032_v31 }
 0x27d   : > { %7027 = vmatprep.mubr.msk.bf16.mxu0 %vm418_vm0, %v9038_v48 }
 0x284   : > { %7028 = vmatmul.mubr.msk.bf16.gmra.mrb[28].mxu0 %vm418_vm0, %v8664_v23  ;;  %v10538_v23 = vld [vmem:[#allocation5_spill] sm:$0xff] }
 0x285   : > { %7035 = vmatprep.mubr.msk.bf16.mxu0 %vm418_vm0, %v9047_v24 }
 0x28c   : > { %7036 = vmatmul.mubr.msk.bf16.vlgmr.msra.gmra.mrb[0].mxu0 %vm418_vm0, %v8680_v12 }
 0x28d   : > { %7068 = vmatpush3.bf16.msra.mxu0 %v8055_v30  ;;  %7039 = vmatprep.mubr.msk.bf16.mxu0 %vm418_vm0, %v8701_v20 }
 0x28e   : > { %7069 = vmatprep.subr.bf16.mxu0 %v8056_v3 }
 0x291   : > { %7070 = vmatpush3.bf16.msra.mxu0 %v8056_v3 }
 0x292   : > { %7103 = vmatprep.subr.bf16.mxu0 %v8057_v14 }
 0x294   : > { %7040 = vmatmul.mubr.msk.bf16.gmra.mrb[4].mxu0 %vm418_vm0, %v8746_v45 }
 0x295   : > { %7043 = vmatprep.mubr.msk.bf16.mxu0 %vm418_vm0, %v8763_v58 }
 0x29c   : > { %7044 = vmatmul.mubr.msk.bf16.gmra.mrb[8].mxu0 %vm418_vm0, %v10538_v23 }
 0x29d   : > { %7047 = vmatprep.mubr.msk.bf16.mxu0 %vm418_vm0, %v10539_v55 }
 0x2a4   : > { %7048 = vmatmul.mubr.msk.bf16.gmra.mrb[12].mxu0 %vm418_vm0, %v10540_v38 }
 0x2a5   : > { %7051 = vmatprep.mubr.msk.bf16.mxu0 %vm418_vm0, %v10541_v47 }
 0x2ac   : > { %7052 = vmatmul.mubr.msk.bf16.gmra.mrb[16].mxu0 %vm418_vm0, %v10542_v36 }
 0x2ad   : > { %7055 = vmatprep.mubr.msk.bf16.mxu0 %vm418_vm0, %v10543_v21 }
 0x2b4   : > { %7056 = vmatmul.mubr.msk.bf16.gmra.mrb[20].mxu0 %vm418_vm0, %v8970_v51 }
 0x2b5   : > { %7059 = vmatprep.mubr.msk.bf16.mxu0 %vm418_vm0, %v8987_v29 }
 0x2bc   : > { %7060 = vmatmul.mubr.msk.bf16.gmra.mrb[24].mxu0 %vm418_vm0, %v9006_v11 }
 0x2bd   : > { %7063 = vmatprep.mubr.msk.bf16.mxu0 %vm418_vm0, %v9018_v26 }
 0x2c4   : > { %7064 = vmatmul.mubr.msk.bf16.gmra.mrb[28].mxu0 %vm418_vm0, %v9040_v22 }
 0x2c5   : > { %7071 = vmatprep.mubr.msk.bf16.mxu0 %vm418_vm0, %v8680_v12 }
 0x2cc   : > { %7072 = vmatmul.mubr.msk.bf16.vlgmr.msra.gmra.mrb[0].mxu0 %vm418_vm0, %v8701_v20 }
 0x2cd   : > { %7104 = vmatpush3.bf16.msra.mxu0 %v8057_v14  ;;  %7075 = vmatprep.mubr.msk.bf16.mxu0 %vm418_vm0, %v8746_v45 }
 0x2ce   : > { %7105 = vmatprep.subr.bf16.mxu0 %v8058_v8 }
 0x2d1   : > { %7106 = vmatpush3.bf16.msra.mxu0 %v8058_v8 }
 0x2d4   : > { %7076 = vmatmul.mubr.msk.bf16.gmra.mrb[4].mxu0 %vm418_vm0, %v8763_v58 }
 0x2d5   : > { %7079 = vmatprep.mubr.msk.bf16.mxu0 %vm418_vm0, %v10538_v23 }
 0x2dc   : > { %7080 = vmatmul.mubr.msk.bf16.gmra.mrb[8].mxu0 %vm418_vm0, %v10539_v55 }
 0x2dd   : > { %7083 = vmatprep.mubr.msk.bf16.mxu0 %vm418_vm0, %v10540_v38 }
 0x2e4   : > { %7084 = vmatmul.mubr.msk.bf16.gmra.mrb[12].mxu0 %vm418_vm0, %v10541_v47 }
 0x2e5   : > { %7087 = vmatprep.mubr.msk.bf16.mxu0 %vm418_vm0, %v10542_v36 }
 0x2ec   : > { %7088 = vmatmul.mubr.msk.bf16.gmra.mrb[16].mxu0 %vm418_vm0, %v10543_v21 }
 0x2ed   : > { %7091 = vmatprep.mubr.msk.bf16.mxu0 %vm418_vm0, %v8970_v51 }
 0x2f4   : > { %7092 = vmatmul.mubr.msk.bf16.gmra.mrb[20].mxu0 %vm418_vm0, %v8987_v29 }
 0x2f5   : > { %7095 = vmatprep.mubr.msk.bf16.mxu0 %vm418_vm0, %v9006_v11 }
 0x2fc   : > { %7096 = vmatmul.mubr.msk.bf16.gmra.mrb[24].mxu0 %vm418_vm0, %v9018_v26 }
 0x2fd   : > { %7099 = vmatprep.mubr.msk.bf16.mxu0 %vm418_vm0, %v9040_v22 }
 0x304   : > { %7100 = vmatmul.mubr.msk.bf16.gmra.mrb[28].mxu0 %vm418_vm0, %v9047_v24 }
 0x305   : > { %7107 = vmatprep.mubr.msk.bf16.mxu0 %vm418_vm0, %v8701_v20  ;;  %v8059_v20 = vld [vmem:[%s10510_s5 + $0x10] sm:$0xff]  }
 0x306   : > { %7139 = vmatprep.subr.bf16.mxu1 %v8059_v20 }
 0x307   : > { %7140 = vmatpush3.bf16.msra.mxu1 %v8059_v20 }
 0x30c   : > { %7108 = vmatmul.mubr.msk.bf16.vlgmr.msra.gmra.mrb[0].mxu0 %vm418_vm0, %v8746_v45  ;;  %v8060_v45 = vld [vmem:[%s10510_s5 + $0x18] sm:$0xff]  }
 0x30d   : > { %7111 = vmatprep.mubr.msk.bf16.mxu0 %vm418_vm0, %v8763_v58  ;;  %7141 = vmatprep.subr.bf16.mxu1 %v8060_v45  ;;  %v9351_v58 = vld [vmem:[%s10510_s5] sm:$0xff]  }
 0x30e   : > { %7142 = vmatpush3.bf16.msra.mxu1 %v8060_v45 }
 0x30f   : > { %7175 = vmatprep.subr.bf16.mxu1 %v9351_v58 }
 0x314   : > { %7112 = vmatmul.mubr.msk.bf16.gmra.mrb[4].mxu0 %vm418_vm0, %v10538_v23 }
 0x315   : > { %7115 = vmatprep.mubr.msk.bf16.mxu0 %vm418_vm0, %v10539_v55 }
 0x31c   : > { %7116 = vmatmul.mubr.msk.bf16.gmra.mrb[8].mxu0 %vm418_vm0, %v10540_v38 }
 0x31d   : > { %7119 = vmatprep.mubr.msk.bf16.mxu0 %vm418_vm0, %v10541_v47  ;;  %v8062_v47 = vld [vmem:[%s10510_s5 + $0x8] sm:$0xff]  }
 0x324   : > { %7120 = vmatmul.mubr.msk.bf16.gmra.mrb[12].mxu0 %vm418_vm0, %v10542_v36 }
 0x325   : > { %7123 = vmatprep.mubr.msk.bf16.mxu0 %vm418_vm0, %v10543_v21 }
 0x32c   : > { %7124 = vmatmul.mubr.msk.bf16.gmra.mrb[16].mxu0 %vm418_vm0, %v8970_v51 }
 0x32d   : > { %7127 = vmatprep.mubr.msk.bf16.mxu0 %vm418_vm0, %v8987_v29 }
 0x334   : > { %7128 = vmatmul.mubr.msk.bf16.gmra.mrb[20].mxu0 %vm418_vm0, %v9006_v11 }
 0x335   : > { %7131 = vmatprep.mubr.msk.bf16.mxu0 %vm418_vm0, %v9018_v26 }
 0x33c   : > { %7132 = vmatmul.mubr.msk.bf16.gmra.mrb[24].mxu0 %vm418_vm0, %v9040_v22 }
 0x33d   : > { %7135 = vmatprep.mubr.msk.bf16.mxu0 %vm418_vm0, %v9047_v24 }
 0x344   : > { %7136 = vmatmul.mubr.msk.bf16.gmra.mrb[28].mxu0 %vm418_vm0, %v8680_v12  ;;  %v9357_v12 = vld [vmem:[%s10509_s4] ss:$0 sm:$0xff] }
 0x3df   : > { %v7109_v44 = vpop.f32.mrb[0].mxu0 }
 0x3e0   : > { %v3261_v39 = vadd.f32 %v7109_v44, %v9357_v12  ;;  %v3093_v1 = vpop.f32.mrb[1].mxu0 }
 0x3e1   : > { %v3259_v0 = vadd.f32 %v9357_v12, %v3093_v1  ;;  %v7110_v33 = vpop.f32.mrb[2].mxu0 }
 0x3e2   : > { %v3293_v40 = vmul.f32 0.01, %v3261_v39  ;;  %v3262_v57 = vadd.f32 %v7110_v33, %v9357_v12  ;;  %v3096_v34 = vpop.f32.mrb[3].mxu0 }
 0x3e3   : > { %v3291_v35 = vmul.f32 0.01, %v3259_v0  ;;  %v3260_v51 = vadd.f32 %v9357_v12, %v3096_v34 }
 0x3e4   : > { %v9363_v29 = vmax.f32 %v3261_v39, %v3293_v40  ;;  %v3294_v60 = vmul.f32 0.01, %v3262_v57 }
 0x3e5   : > { %v3323_v13 = vmax.f32 %v3259_v0, %v3291_v35  ;;  %v3292_v9 = vmul.f32 0.01, %v3260_v51 }
 0x3e6   : > { %v3421_v11 = vrot.slane %v9363_v29, 7  ;;  %v9366_v54 = vmax.f32 %v3262_v57, %v3294_v60  ;;  %v4825_v26 = vrot.slane %v9363_v29, 1 }
 0x3e7   : > { %v3419_v10 = vrot.slane %v3323_v13, 7  ;;  %v4822_v5 = vrot.slane %v3323_v13, 1  ;;  %v3324_v27 = vmax.f32 %v3260_v51, %v3292_v9  ;;  %v7113_v31 = vpop.f32.mrb[4].mxu0 }
 0x3e8   : > { %v3372_v50 = vrot.slane %v9366_v54, 7  ;;  %v9372_v59 = vpack.c.bf16 %v9366_v54, %v9363_v29  ;;  %v4826_v46 = vrot.slane %v9366_v54, 1  ;;  %v3265_v37 = vadd.f32 %v7113_v31, %v9357_v12  ;;  %v3109_v28 = vpop.f32.mrb[5].mxu0 }
 0x3e9   : > { %v3371_v19 = vrot.slane %v3324_v27, 7  ;;  %v9376_v43 = vpack.c.bf16 %v3324_v27, %v3323_v13  ;;  %v4823_v49 = vrot.slane %v3324_v27, 1  ;;  %v3263_v53 = vadd.f32 %v9357_v12, %v3109_v28  ;;  %v7114_v17 = vpop.f32.mrb[6].mxu0 }
 0x3ea   : > { %v3297_v6 = vmul.f32 0.01, %v3265_v37  ;;  %v3266_v48 = vadd.f32 %v7114_v17, %v9357_v12  ;;  %v3112_v62 = vpop.f32.mrb[7].mxu0  ;;  %v3422_v22 = vsel %vm1041_vm1, %v3421_v11, %v3372_v50  ;;  %v3484_v41 = vsel %vm1041_vm1, %v3372_v50, %v3421_v11 }
 0x3eb   : > { %v4824_v63 = vsel %vm2445_vm2, %v4822_v5, %v4823_v49  ;;  %v4918_v16 = vsel %vm2445_vm2, %v4823_v49, %v4822_v5  ;;  %v3295_v52 = vmul.f32 0.01, %v3263_v53  ;;  %v3264_v15 = vadd.f32 %v9357_v12, %v3112_v62  ;;  %v9431_v5 = vld [vmem:[%s10510_s5 + $0x20] sm:$0xff]  }
 0x3ec   : > { %v9385_v24 = vpack.c.bf16 %v4918_v16, %v4824_v63  ;;  %v9387_v56 = vmax.f32 %v3265_v37, %v3297_v6  ;;  %v3298_v25 = vmul.f32 0.01, %v3266_v48  ;;  %v3420_v4 = vsel %vm1041_vm1, %v3419_v10, %v3371_v19 }
 0x3ed   : > { %v3327_v7 = vmax.f32 %v3263_v53, %v3295_v52  ;;  %v3296_v32 = vmul.f32 0.01, %v3264_v15  ;;  %v3483_v42 = vsel %vm1041_vm1, %v3371_v19, %v3419_v10  ;;  %v9391_v61 = vpack.c.bf16 %v3422_v22, %v3484_v41 }
 0x3ee   : > { %v3425_v2 = vrot.slane %v9387_v56, 7  ;;  %v4831_v18 = vrot.slane %v9387_v56, 1  ;;  %v9395_v30 = vmax.f32 %v3266_v48, %v3298_v25  ;;  %v9397_v3 = vpack.c.bf16 %v3420_v4, %v3483_v42 }
 0x3ef   : > { %v3423_v14 = vrot.slane %v3327_v7, 7  ;;  %v4828_v23 = vrot.slane %v3327_v7, 1  ;;  %v3328_v55 = vmax.f32 %v3264_v15, %v3296_v32  ;;  %v7117_v38 = vpop.f32.mrb[8].mxu0  ;;  %v4827_v36 = vsel %vm2445_vm2, %v4825_v26, %v4826_v46 }
 0x3f0   : > { %v3374_v21 = vrot.slane %v9395_v30, 7  ;;  %v9410_v8 = vpack.c.bf16 %v9395_v30, %v9387_v56  ;;  %v4832_v20 = vrot.slane %v9395_v30, 1  ;;  %7143 = vmatprep.mubr.msk.bf16.mxu1 %vm418_vm0, %v9397_v3  ;;  %v3269_v45 = vadd.f32 %v7117_v38, %v9357_v12  ;;  %v3125_v44 = vpop.f32.mrb[9].mxu0 }
 0x3f1   : > { %v3373_v39 = vrot.slane %v3328_v55, 7  ;;  %v9416_v1 = vpack.c.bf16 %v3328_v55, %v3327_v7  ;;  %v4829_v0 = vrot.slane %v3328_v55, 1  ;;  %7144 = vmatmul.mubr.msk.bf16.vlgmr.msra.gmra.mrb[0].mxu1 %vm418_vm0, %v9391_v61  ;;  %v3267_v33 = vadd.f32 %v9357_v12, %v3125_v44  ;;  %v7118_v40 = vpop.f32.mrb[10].mxu0 }
 0x3f2   : > { %v3301_v57 = vmul.f32 0.01, %v3269_v45  ;;  %7176 = vmatpush3.bf16.msra.mxu1 %v9351_v58  ;;  %v3270_v34 = vadd.f32 %v7118_v40, %v9357_v12  ;;  %v3128_v35 = vpop.f32.mrb[11].mxu0  ;;  %v3426_v51 = vsel %vm1041_vm1, %v3425_v2, %v3374_v21  ;;  %v3486_v60 = vsel %vm1041_vm1, %v3374_v21, %v3425_v2 }
 0x3f3   : > { %v3299_v13 = vmul.f32 0.01, %v3267_v33  ;;  %v3268_v9 = vadd.f32 %v9357_v12, %v3128_v35  ;;  %v3424_v11 = vsel %vm1041_vm1, %v3423_v14, %v3373_v39  ;;  %v3485_v10 = vsel %vm1041_vm1, %v3373_v39, %v3423_v14  ;;  %7177 = vmatprep.subr.bf16.mxu1 %v8062_v47 }
 0x3f4   : > { %v9433_v58 = vmax.f32 %v3269_v45, %v3301_v57  ;;  %v3302_v27 = vmul.f32 0.01, %v3270_v34  ;;  %v9435_v31 = vpack.c.bf16 %v3424_v11, %v3485_v10  ;;  %v9437_v50 = vpack.c.bf16 %v3426_v51, %v3486_v60 }
 0x3f5   : > { %v9439_v37 = vmax.f32 %v3267_v33, %v3299_v13  ;;  %v3300_v28 = vmul.f32 0.01, %v3268_v9  ;;  %v4919_v19 = vsel %vm2445_vm2, %v4826_v46, %v4825_v26  ;;  %v4830_v49 = vsel %vm2445_vm2, %v4828_v23, %v4829_v0 }
 0x3f6   : > { %v3429_v53 = vrot.slane %v9433_v58, 7  ;;  %v4837_v17 = vrot.slane %v9433_v58, 1  ;;  %v9449_v6 = vmax.f32 %v3270_v34, %v3302_v27  ;;  %7147 = vmatprep.mubr.msk.bf16.mxu1 %vm418_vm0, %v9435_v31  ;;  %7178 = vmatpush3.bf16.msra.mxu1 %v8062_v47  ;;  %v9453_v48 = vpack.c.bf16 %v4919_v19, %v4827_v36 }
 0x3f7   : > { %v3427_v29 = vrot.slane %v9439_v37, 7  ;;  %v4834_v54 = vrot.slane %v9439_v37, 1  ;;  %v9457_v62 = vmax.f32 %v3268_v9, %v3300_v28  ;;  %v7121_v26 = vpop.f32.mrb[12].mxu0  ;;  %7211 = vmatprep.subr.bf16.mxu1 %v9431_v5  ;;  %v4920_v46 = vsel %vm2445_vm2, %v4829_v0, %v4828_v23 }
 0x3f8   : > { %10544 = vst [vmem:[#allocation5_spill] sm:$0xff] %v9453_v48  ;;  %v3376_v22 = vrot.slane %v9449_v6, 7  ;;  %v9464_v41 = vpack.c.bf16 %v9449_v6, %v9433_v58  ;;  %v4838_v63 = vrot.slane %v9449_v6, 1  ;;  %v3273_v16 = vadd.f32 %v7121_v26, %v9357_v12  ;;  %v3141_v52 = vpop.f32.mrb[13].mxu0 }
 0x3f9   : > { %v3375_v15 = vrot.slane %v9457_v62, 7  ;;  %v9471_v25 = vpack.c.bf16 %v9457_v62, %v9439_v37  ;;  %v4835_v4 = vrot.slane %v9457_v62, 1  ;;  %7148 = vmatmul.mubr.msk.bf16.gmra.mrb[4].mxu1 %vm418_vm0, %v9437_v50  ;;  %v3271_v7 = vadd.f32 %v9357_v12, %v3141_v52  ;;  %v7122_v32 = vpop.f32.mrb[14].mxu0 }
 0x3fa   : > { %v3305_v42 = vmul.f32 0.01, %v3273_v16  ;;  %v3274_v2 = vadd.f32 %v7122_v32, %v9357_v12  ;;  %v3144_v14 = vpop.f32.mrb[15].mxu0  ;;  %v3430_v23 = vsel %vm1041_vm1, %v3429_v53, %v3376_v22  ;;  %v3488_v55 = vsel %vm1041_vm1, %v3376_v22, %v3429_v53 }
 0x3fb   : > { %v3303_v38 = vmul.f32 0.01, %v3271_v7  ;;  %v3272_v47 = vadd.f32 %v9357_v12, %v3144_v14  ;;  %v3428_v36 = vsel %vm1041_vm1, %v3427_v29, %v3375_v15  ;;  %v3487_v21 = vsel %vm1041_vm1, %v3375_v15, %v3427_v29 }
 0x3fc   : > { %v9483_v45 = vmax.f32 %v3273_v16, %v3305_v42  ;;  %v3306_v44 = vmul.f32 0.01, %v3274_v2  ;;  %v9485_v39 = vpack.c.bf16 %v3428_v36, %v3487_v21  ;;  %v9487_v0 = vpack.c.bf16 %v3430_v23, %v3488_v55 }
 0x3fd   : > { %v9489_v33 = vmax.f32 %v3271_v7, %v3303_v38  ;;  %v3304_v40 = vmul.f32 0.01, %v3272_v47  ;;  %v9491_v57 = vpack.c.bf16 %v4920_v46, %v4830_v49  ;;  %v4833_v34 = vsel %vm2445_vm2, %v4831_v18, %v4832_v20 }
 0x3fe   : > { %v3433_v35 = vrot.slane %v9483_v45, 7  ;;  %v9500_v60 = vmax.f32 %v3274_v2, %v3306_v44  ;;  %7151 = vmatprep.mubr.msk.bf16.mxu1 %vm418_vm0, %v9485_v39  ;;  %v4921_v13 = vsel %vm2445_vm2, %v4832_v20, %v4831_v18  ;;  %v4836_v21 = vsel %vm2445_vm2, %v4834_v54, %v4835_v4 }
 0x3ff   : > { %10545 = vst [vmem:[#allocation6_spill] sm:$0xff] %v9491_v57  ;;  %v3431_v9 = vrot.slane %v9489_v33, 7  ;;  %v4840_v11 = vrot.slane %v9489_v33, 1  ;;  %v9511_v10 = vmax.f32 %v3272_v47, %v3304_v40  ;;  %v7125_v27 = vpop.f32.mrb[16].mxu0  ;;  %v9513_v28 = vpack.c.bf16 %v4921_v13, %v4833_v34 }
 0x400   : > { %v3378_v19 = vrot.slane %v9500_v60, 7  ;;  %v9518_v49 = vpack.c.bf16 %v9500_v60, %v9483_v45  ;;  %v3277_v30 = vadd.f32 %v7125_v27, %v9357_v12  ;;  %v3157_v18 = vpop.f32.mrb[17].mxu0  ;;  %v4922_v44 = vsel %vm2445_vm2, %v4835_v4, %v4834_v54 }
 0x401   : > { %10546 = vst [vmem:[#allocation7_spill] sm:$0xff] %v9513_v28  ;;  %v3377_v20 = vrot.slane %v9511_v10, 7  ;;  %v9525_v53 = vpack.c.bf16 %v9511_v10, %v9489_v33  ;;  %v4841_v29 = vrot.slane %v9511_v10, 1  ;;  %7152 = vmatmul.mubr.msk.bf16.gmra.mrb[8].mxu1 %vm418_vm0, %v9487_v0  ;;  %v3275_v62 = vadd.f32 %v9357_v12, %v3157_v18  ;;  %v7126_v26 = vpop.f32.mrb[18].mxu0 }
 0x402   : > { %v3309_v46 = vmul.f32 0.01, %v3277_v30  ;;  %v3278_v22 = vadd.f32 %v7126_v26, %v9357_v12  ;;  %v3160_v16 = vpop.f32.mrb[19].mxu0  ;;  %v3434_v52 = vsel %vm1041_vm1, %v3433_v35, %v3378_v19  ;;  %v3490_v15 = vsel %vm1041_vm1, %v3378_v19, %v3433_v35 }
 0x403   : > { %v3307_v7 = vmul.f32 0.01, %v3275_v62  ;;  %v3276_v32 = vadd.f32 %v9357_v12, %v3160_v16  ;;  %v3432_v42 = vsel %vm1041_vm1, %v3431_v9, %v3377_v20  ;;  %v3489_v2 = vsel %vm1041_vm1, %v3377_v20, %v3431_v9 }
 0x404   : > { %v9537_v14 = vmax.f32 %v3277_v30, %v3309_v46  ;;  %v3310_v23 = vmul.f32 0.01, %v3278_v22  ;;  %v9539_v55 = vpack.c.bf16 %v3432_v42, %v3489_v2  ;;  %v9541_v38 = vpack.c.bf16 %v3434_v52, %v3490_v15 }
 0x405   : > { %v9543_v47 = vmax.f32 %v3275_v62, %v3307_v7  ;;  %v3308_v36 = vmul.f32 0.01, %v3276_v32  ;;  %v9557_v13 = vpack.c.bf16 %v4922_v44, %v4836_v21  ;;  %v4839_v54 = vsel %vm2445_vm2, %v4837_v17, %v4838_v63 }
 0x406   : > { %v3437_v40 = vrot.slane %v9537_v14, 7  ;;  %v9553_v35 = vmax.f32 %v3278_v22, %v3310_v23  ;;  %7155 = vmatprep.mubr.msk.bf16.mxu1 %vm418_vm0, %v9539_v55 }
 0x407   : > { %10547 = vst [vmem:[#allocation8_spill] sm:$0xff] %v9557_v13  ;;  %v3435_v9 = vrot.slane %v9543_v47, 7  ;;  %v9561_v19 = vmax.f32 %v3276_v32, %v3308_v36  ;;  %v7129_v37 = vpop.f32.mrb[20].mxu0  ;;  %v10556_v48 = vrot.slane %v9543_v47, 1 }
 0x408   : > { %v3380_v4 = vrot.slane %v9553_v35, 7  ;;  %v9571_v30 = vpack.c.bf16 %v9553_v35, %v9537_v14  ;;  %v3281_v20 = vadd.f32 %v7129_v37, %v9357_v12  ;;  %v3173_v62 = vpop.f32.mrb[21].mxu0 }
 0x409   : > { %v3379_v26 = vrot.slane %v9561_v19, 7  ;;  %v9578_v46 = vpack.c.bf16 %v9561_v19, %v9543_v47  ;;  %7156 = vmatmul.mubr.msk.bf16.gmra.mrb[12].mxu1 %vm418_vm0, %v9541_v38  ;;  %v3279_v16 = vadd.f32 %v9357_v12, %v3173_v62  ;;  %v7130_v52 = vpop.f32.mrb[22].mxu0  ;;  %v10555_v57 = vrot.slane %v9561_v19, 1 }
 0x40a   : > { %v3313_v15 = vmul.f32 0.01, %v3281_v20  ;;  %v3282_v7 = vadd.f32 %v7130_v52, %v9357_v12  ;;  %v3176_v32 = vpop.f32.mrb[23].mxu0  ;;  %v3438_v42 = vsel %vm1041_vm1, %v3437_v40, %v3380_v4  ;;  %v3492_v2 = vsel %vm1041_vm1, %v3380_v4, %v3437_v40 }
 0x40b   : > { %v3311_v23 = vmul.f32 0.01, %v3279_v16  ;;  %v3280_v36 = vadd.f32 %v9357_v12, %v3176_v32  ;;  %v3436_v21 = vsel %vm1041_vm1, %v3435_v9, %v3379_v26  ;;  %v3491_v44 = vsel %vm1041_vm1, %v3379_v26, %v3435_v9 }
 0x40c   : > { %v9590_v37 = vmax.f32 %v3281_v20, %v3313_v15  ;;  %v3314_v34 = vmul.f32 0.01, %v3282_v7  ;;  %v9592_v62 = vpack.c.bf16 %v3436_v21, %v3491_v44  ;;  %v9594_v18 = vpack.c.bf16 %v3438_v42, %v3492_v2 }
 0x40d   : > { %v9596_v52 = vmax.f32 %v3279_v16, %v3311_v23  ;;  %v3312_v27 = vmul.f32 0.01, %v3280_v36  ;;  %v4923_v40 = vsel %vm2445_vm2, %v4838_v63, %v4837_v17  ;;  %v4842_v9 = vsel %vm2445_vm2, %v4840_v11, %v4841_v29 }
 0x40e   : > { %v3441_v4 = vrot.slane %v9590_v37, 7  ;;  %v9610_v26 = vmax.f32 %v3282_v7, %v3314_v34  ;;  %7159 = vmatprep.mubr.msk.bf16.mxu1 %vm418_vm0, %v9592_v62  ;;  %v9614_v58 = vpack.c.bf16 %v4923_v40, %v4839_v54  ;;  %v4924_v15 = vsel %vm2445_vm2, %v4841_v29, %v4840_v11 }
 0x40f   : > { %v3439_v6 = vrot.slane %v9596_v52, 7  ;;  %v9618_v63 = vmax.f32 %v3280_v36, %v3312_v27  ;;  %v7133_v16 = vpop.f32.mrb[24].mxu0  ;;  %v9655_v56 = vpack.c.bf16 %v4924_v15, %v4842_v9 }
 0x410   : > { %10548 = vst [vmem:[#allocation9_spill] sm:$0xff] %v9614_v58  ;;  %v3382_v34 = vrot.slane %v9610_v26, 7  ;;  %v9628_v7 = vpack.c.bf16 %v9610_v26, %v9590_v37  ;;  %v3285_v32 = vadd.f32 %v7133_v16, %v9357_v12  ;;  %v3189_v42 = vpop.f32.mrb[25].mxu0 }
 0x411   : > { %v3381_v27 = vrot.slane %v9618_v63, 7  ;;  %v9635_v33 = vpack.c.bf16 %v9618_v63, %v9596_v52  ;;  %7160 = vmatmul.mubr.msk.bf16.gmra.mrb[16].mxu1 %vm418_vm0, %v9594_v18  ;;  %v3283_v11 = vadd.f32 %v9357_v12, %v3189_v42  ;;  %v7134_v29 = vpop.f32.mrb[26].mxu0  ;;  %10549 = vst [vmem:[#allocation10_spill] sm:$0xff] %v9655_v56 }
 0x412   : > { %v3317_v2 = vmul.f32 0.01, %v3285_v32  ;;  %v3286_v23 = vadd.f32 %v7134_v29, %v9357_v12  ;;  %v3192_v36 = vpop.f32.mrb[27].mxu0  ;;  %v3442_v21 = vsel %vm1041_vm1, %v3441_v4, %v3382_v34  ;;  %v3494_v44 = vsel %vm1041_vm1, %v3382_v34, %v3441_v4 }
 0x413   : > { %v3315_v40 = vmul.f32 0.01, %v3283_v11  ;;  %v3284_v16 = vadd.f32 %v9357_v12, %v3192_v36  ;;  %v3440_v20 = vsel %vm1041_vm1, %v3439_v6, %v3381_v27  ;;  %v3493_v54 = vsel %vm1041_vm1, %v3381_v27, %v3439_v6 }
 0x414   : > { %v9647_v17 = vmax.f32 %v3285_v32, %v3317_v2  ;;  %v3318_v10 = vmul.f32 0.01, %v3286_v23  ;;  %v9649_v42 = vpack.c.bf16 %v3440_v20, %v3493_v54  ;;  %v9651_v22 = vpack.c.bf16 %v3442_v21, %v3494_v44 }
 0x415   : > { %v9653_v29 = vmax.f32 %v3283_v11, %v3315_v40  ;;  %v3316_v51 = vmul.f32 0.01, %v3284_v16  ;;  %v10550_v4 = vrot.slane %v9500_v60, 1  ;;  %v10551_v34 = vrot.slane %v9483_v45, 1 }
 0x416   : > { %v3445_v6 = vrot.slane %v9647_v17, 7  ;;  %v9664_v27 = vmax.f32 %v3286_v23, %v3318_v10  ;;  %7163 = vmatprep.mubr.msk.bf16.mxu1 %vm418_vm0, %v9649_v42 }
 0x417   : > { %v4845_v36 = vsel %vm2445_vm2, %v10551_v34, %v10550_v4  ;;  %v10552_v20 = vmov %v10551_v34  ;;  %v10553_v9 = vmov %v10550_v4  ;;  %v3443_v54 = vrot.slane %v9653_v29, 7  ;;  %v7137_v21 = vpop.f32.mrb[28].mxu0 }
 0x418   : > { %v4925_v15 = vsel %vm2445_vm2, %v10553_v9, %v10552_v20  ;;  %v9675_v2 = vmax.f32 %v3284_v16, %v3316_v51  ;;  %v3384_v10 = vrot.slane %v9664_v27, 7  ;;  %v9682_v23 = vpack.c.bf16 %v9664_v27, %v9647_v17  ;;  %v3205_v40 = vpop.f32.mrb[29].mxu0 }
 0x419   : > { %v9677_v44 = vpack.c.bf16 %v4925_v15, %v4845_v36  ;;  %v3289_v60 = vadd.f32 %v7137_v21, %v9357_v12  ;;  %7164 = vmatmul.mubr.msk.bf16.gmra.mrb[20].mxu1 %vm418_vm0, %v9651_v22  ;;  %v3287_v34 = vadd.f32 %v9357_v12, %v3205_v40  ;;  %v7138_v36 = vpop.f32.mrb[30].mxu0 }
 0x41a   : > { %v3383_v4 = vrot.slane %v9675_v2, 7  ;;  %v9689_v51 = vpack.c.bf16 %v9675_v2, %v9653_v29  ;;  %v4859_v16 = vrot.slane %v9675_v2, 1  ;;  %v3290_v9 = vadd.f32 %v7138_v36, %v9357_v12  ;;  %v3208_v15 = vpop.f32.mrb[31].mxu0 }
 0x41b   : > { %10554 = vst [vmem:[#allocation11_spill] sm:$0xff] %v9677_v44  ;;  %v3321_v20 = vmul.f32 0.01, %v3289_v60  ;;  %v3446_v21 = vsel %vm1041_vm1, %v3445_v6, %v3384_v10  ;;  %v3496_v32 = vsel %vm1041_vm1, %v3384_v10, %v3445_v6  ;;  %v3319_v45 = vmul.f32 0.01, %v3287_v34 }
 0x41c   : > { %v3288_v11 = vadd.f32 %v9357_v12, %v3208_v15  ;;  %v3444_v44 = vsel %vm1041_vm1, %v3443_v54, %v3383_v4  ;;  %v3495_v2 = vsel %vm1041_vm1, %v3383_v4, %v3443_v54  ;;  %v3322_v58 = vmul.f32 0.01, %v3290_v9 }
 0x41d   : > { %v3353_v56 = vmax.f32 %v3289_v60, %v3321_v20  ;;  %v9701_v13 = vpack.c.bf16 %v3444_v44, %v3495_v2  ;;  %v9703_v40 = vpack.c.bf16 %v3446_v21, %v3496_v32  ;;  %v3351_v28 = vmax.f32 %v3287_v34, %v3319_v45 }
 0x41e   : > { %v3320_v36 = vmul.f32 0.01, %v3288_v11  ;;  %v4848_v6 = vsel %vm2445_vm2, %v10556_v48, %v10555_v57  ;;  %v10557_v12 = vmov %v10556_v48  ;;  %v10558_v10 = vmov %v10555_v57 }
 0x41f   : > { %v4926_v54 = vsel %vm2445_vm2, %v10558_v10, %v10557_v12  ;;  %v3449_v60 = vrot.slane %v3353_v56, 7  ;;  %v4867_v4 = vrot.slane %v3353_v56, 1  ;;  %v3354_v44 = vmax.f32 %v3290_v9, %v3322_v58  ;;  %7167 = vmatprep.mubr.msk.bf16.mxu1 %vm418_vm0, %v9701_v13 }
 0x420   : > { %v9717_v32 = vpack.c.bf16 %v4926_v54, %v4848_v6  ;;  %v3447_v45 = vrot.slane %v3351_v28, 7  ;;  %v4864_v34 = vrot.slane %v3351_v28, 1  ;;  %v3352_v20 = vmax.f32 %v3288_v11, %v3320_v36 }
 0x421   : > { %v10559_v15 = vrot.slane %v9553_v35, 1  ;;  %v10560_v48 = vrot.slane %v9537_v14, 1  ;;  %v3386_v47 = vrot.slane %v3354_v44, 7  ;;  %v9724_v19 = vpack.c.bf16 %v3354_v44, %v3353_v56  ;;  %7168 = vmatmul.mubr.msk.bf16.gmra.mrb[24].mxu1 %vm418_vm0, %v9703_v40 }
 0x422   : > { %v4868_v21 = vrot.slane %v3354_v44, 1  ;;  %v3385_v6 = vrot.slane %v3352_v20, 7  ;;  %v9731_v12 = vpack.c.bf16 %v3352_v20, %v3351_v28  ;;  %v4865_v11 = vrot.slane %v3352_v20, 1 }
 0x423   : > { %v4851_v57 = vsel %vm2445_vm2, %v10560_v48, %v10559_v15  ;;  %v10561_v58 = vmov %v10560_v48  ;;  %v10562_v9 = vmov %v10559_v15  ;;  %v3450_v10 = vsel %vm1041_vm1, %v3449_v60, %v3386_v47 }
 0x424   : > { %v4927_v2 = vsel %vm2445_vm2, %v10562_v9, %v10561_v58  ;;  %v3498_v56 = vsel %vm1041_vm1, %v3386_v47, %v3449_v60  ;;  %v4869_v54 = vsel %vm2445_vm2, %v4867_v4, %v4868_v21  ;;  %v4933_v14 = vsel %vm2445_vm2, %v4868_v21, %v4867_v4 }
 0x425   : > { %v9735_v36 = vpack.c.bf16 %v4927_v2, %v4851_v57  ;;  %v3448_v35 = vsel %vm1041_vm1, %v3447_v45, %v3385_v6  ;;  %v3497_v44 = vsel %vm1041_vm1, %v3385_v6, %v3447_v45  ;;  %v3514_v28 = vpack.c.bf16 %v3450_v10, %v3498_v56 }
 0x426   : > { %v9743_v15 = vpack.c.bf16 %v4933_v14, %v4869_v54  ;;  %v3513_v20 = vpack.c.bf16 %v3448_v35, %v3497_v44  ;;  %v10563_v48 = vrot.slane %v9618_v63, 1  ;;  %v10564_v57 = vrot.slane %v9596_v52, 1 }
 0x427   : > { %v10567_v21 = vrot.slane %v9610_v26, 1  ;;  %v10568_v45 = vrot.slane %v9590_v37, 1  ;;  %v10571_v52 = vrot.slane %v9653_v29, 1  ;;  %v10573_v37 = vrot.slane %v9664_v27, 1  ;;  %v8065_v27 = vld [vmem:[%s10510_s5 + $0x30] sm:$0xff]  }
 0x428   : > { %v4854_v58 = vsel %vm2445_vm2, %v10564_v57, %v10563_v48  ;;  %v10565_v60 = vmov %v10564_v57  ;;  %v10566_v47 = vmov %v10563_v48  ;;  %7171 = vmatprep.mubr.msk.bf16.mxu1 %vm418_vm0, %v3513_v20  ;;  %v10574_v26 = vrot.slane %v9647_v17, 1  ;;  %v8064_v17 = vld [vmem:[%s10510_s5 + $0x28] sm:$0xff]  }
 0x429   : > { %v4928_v4 = vsel %vm2445_vm2, %v10566_v47, %v10565_v60  ;;  %v4857_v9 = vsel %vm2445_vm2, %v10568_v45, %v10567_v21  ;;  %v10569_v6 = vmov %v10568_v45  ;;  %v10570_v10 = vmov %v10567_v21  ;;  %7172 = vmatmul.mubr.msk.bf16.gmra.mrb[28].mxu1 %vm418_vm0, %v3514_v28 }
 0x42a   : > { %v9760_v2 = vpack.c.bf16 %v4928_v4, %v4854_v58  ;;  %v4929_v56 = vsel %vm2445_vm2, %v10570_v10, %v10569_v6  ;;  %v4860_v63 = vsel %vm2445_vm2, %v10571_v52, %v4859_v16  ;;  %v10572_v54 = vmov %v10571_v52  ;;  %7179 = vmatprep.mubr.msk.bf16.mxu1 %vm418_vm0, %v3514_v28 }
 0x42b   : > { %v4930_v14 = vsel %vm2445_vm2, %v4859_v16, %v10572_v54  ;;  %v9774_v35 = vpack.c.bf16 %v4929_v56, %v4857_v9  ;;  %v4863_v48 = vsel %vm2445_vm2, %v10574_v26, %v10573_v37  ;;  %v10575_v57 = vmov %v10574_v26 }
 0x42c   : > { %v9776_v44 = vpack.c.bf16 %v4930_v14, %v4860_v63  ;;  %v10576_v58 = vmov %v10573_v37  ;;  %v4866_v16 = vsel %vm2445_vm2, %v4864_v34, %v4865_v11  ;;  %v4932_v47 = vsel %vm2445_vm2, %v4865_v11, %v4864_v34  ;;  %v8067_v34 = vld [vmem:[%s10510_s5 + $0x40] sm:$0xff]  }
 0x42d   : > { %v4931_v29 = vsel %vm2445_vm2, %v10576_v58, %v10575_v57  ;;  %v9792_v4 = vpack.c.bf16 %v4932_v47, %v4866_v16 }
 0x42e   : > { %v9788_v60 = vpack.c.bf16 %v4931_v29, %v4863_v48 }
 0x431   : > { %7180 = vmatmul.mubr.msk.bf16.vlgmr.msra.gmra.mrb[0].mxu1 %vm418_vm0, %v9397_v3 }
 0x432   : > { %7212 = vmatpush3.bf16.msra.mxu1 %v9431_v5  ;;  %7183 = vmatprep.mubr.msk.bf16.mxu1 %vm418_vm0, %v9391_v61  ;;  %v8066_v5 = vld [vmem:[%s10510_s5 + $0x38] sm:$0xff]  }
 0x433   : > { %7213 = vmatprep.subr.bf16.mxu1 %v8064_v17 }
 0x436   : > { %7214 = vmatpush3.bf16.msra.mxu1 %v8064_v17 }
 0x437   : > { %7247 = vmatprep.subr.bf16.mxu1 %v8065_v27 }
 0x439   : > { %7184 = vmatmul.mubr.msk.bf16.gmra.mrb[4].mxu1 %vm418_vm0, %v9435_v31 }
 0x43a   : > { %7187 = vmatprep.mubr.msk.bf16.mxu1 %vm418_vm0, %v9437_v50 }
 0x441   : > { %7188 = vmatmul.mubr.msk.bf16.gmra.mrb[8].mxu1 %vm418_vm0, %v9485_v39 }
 0x442   : > { %7191 = vmatprep.mubr.msk.bf16.mxu1 %vm418_vm0, %v9487_v0 }
 0x449   : > { %7192 = vmatmul.mubr.msk.bf16.gmra.mrb[12].mxu1 %vm418_vm0, %v9539_v55 }
 0x44a   : > { %7195 = vmatprep.mubr.msk.bf16.mxu1 %vm418_vm0, %v9541_v38 }
 0x451   : > { %7196 = vmatmul.mubr.msk.bf16.gmra.mrb[16].mxu1 %vm418_vm0, %v9592_v62 }
 0x452   : > { %7199 = vmatprep.mubr.msk.bf16.mxu1 %vm418_vm0, %v9594_v18 }
 0x459   : > { %7200 = vmatmul.mubr.msk.bf16.gmra.mrb[20].mxu1 %vm418_vm0, %v9649_v42 }
 0x45a   : > { %7203 = vmatprep.mubr.msk.bf16.mxu1 %vm418_vm0, %v9651_v22 }
 0x461   : > { %7204 = vmatmul.mubr.msk.bf16.gmra.mrb[24].mxu1 %vm418_vm0, %v9701_v13 }
 0x462   : > { %7207 = vmatprep.mubr.msk.bf16.mxu1 %vm418_vm0, %v9703_v40 }
 0x469   : > { %7208 = vmatmul.mubr.msk.bf16.gmra.mrb[28].mxu1 %vm418_vm0, %v3513_v20 }
 0x46a   : > { %7215 = vmatprep.mubr.msk.bf16.mxu1 %vm418_vm0, %v9391_v61  ;;  %v8068_v61 = vld [vmem:[%s10510_s5 + $0x48] sm:$0xff]  }
 0x471   : > { %7216 = vmatmul.mubr.msk.bf16.vlgmr.msra.gmra.mrb[0].mxu1 %vm418_vm0, %v9435_v31  ;;  %v8069_v31 = vld [vmem:[%s10510_s5 + $0x50] sm:$0xff]  }
 0x472   : > { %7248 = vmatpush3.bf16.msra.mxu1 %v8065_v27  ;;  %7219 = vmatprep.mubr.msk.bf16.mxu1 %vm418_vm0, %v9437_v50  ;;  %v8071_v50 = vld [vmem:[%s10510_s5 + $0x60] sm:$0xff]  }
 0x473   : > { %7249 = vmatprep.subr.bf16.mxu1 %v8066_v5 }
 0x476   : > { %7250 = vmatpush3.bf16.msra.mxu1 %v8066_v5 }
 0x477   : > { %7283 = vmatprep.subr.bf16.mxu1 %v8067_v34 }
 0x479   : > { %7220 = vmatmul.mubr.msk.bf16.gmra.mrb[4].mxu1 %vm418_vm0, %v9485_v39  ;;  %v8072_v39 = vld [vmem:[%s10510_s5 + $0x68] sm:$0xff]  }
 0x47a   : > { %7223 = vmatprep.mubr.msk.bf16.mxu1 %vm418_vm0, %v9487_v0  ;;  %v8073_v0 = vld [vmem:[%s10510_s5 + $0x70] sm:$0xff]  }
 0x481   : > { %7224 = vmatmul.mubr.msk.bf16.gmra.mrb[8].mxu1 %vm418_vm0, %v9539_v55  ;;  %v10583_v55 = vld [vmem:[#allocation11_spill] sm:$0xff] }
 0x482   : > { %7227 = vmatprep.mubr.msk.bf16.mxu1 %vm418_vm0, %v9541_v38  ;;  %v8076_v38 = vld [vmem:[%s10510_s5 + $0x88] sm:$0xff]  }
 0x489   : > { %7228 = vmatmul.mubr.msk.bf16.gmra.mrb[12].mxu1 %vm418_vm0, %v9592_v62 }
 0x48a   : > { %7231 = vmatprep.mubr.msk.bf16.mxu1 %vm418_vm0, %v9594_v18  ;;  %v5739_v18 = vld [vmem:[%s10512_s7 + $0x8] sm:$0xff] }
 0x491   : > { %7232 = vmatmul.mubr.msk.bf16.gmra.mrb[16].mxu1 %vm418_vm0, %v9649_v42  ;;  %v10105_v42 = vld [vmem:[%s10511_s6] ss:$0 sm:$0xff] }
 0x492   : > { %7235 = vmatprep.mubr.msk.bf16.mxu1 %vm418_vm0, %v9651_v22  ;;  %v5740_v22 = vld [vmem:[%s10512_s7 + $0x10] sm:$0xff] }
 0x499   : > { %7236 = vmatmul.mubr.msk.bf16.gmra.mrb[20].mxu1 %vm418_vm0, %v9701_v13  ;;  %v8251_v13 = vmov 0.0|0.0  }
 0x49a   : > { %7239 = vmatprep.mubr.msk.bf16.mxu1 %vm418_vm0, %v9703_v40  ;;  %7479 = vmatprep.subr.bf16.mxu0 %v8251_v13 }
 0x4a1   : > { %7240 = vmatmul.mubr.msk.bf16.gmra.mrb[24].mxu1 %vm418_vm0, %v3513_v20 }
 0x4a2   : > { %7243 = vmatprep.mubr.msk.bf16.mxu1 %vm418_vm0, %v3514_v28 }
 0x4a9   : > { %7244 = vmatmul.mubr.msk.bf16.gmra.mrb[28].mxu1 %vm418_vm0, %v9397_v3  ;;  %v8070_v3 = vld [vmem:[%s10510_s5 + $0x58] sm:$0xff]  }
 0x4aa   : > { %7251 = vmatprep.mubr.msk.bf16.mxu1 %vm418_vm0, %v9724_v19 }
 0x4b1   : > { %7252 = vmatmul.mubr.msk.bf16.vlgmr.msra.gmra.mrb[0].mxu1 %vm418_vm0, %v9376_v43 }
 0x4b2   : > { %7284 = vmatpush3.bf16.msra.mxu1 %v8067_v34  ;;  %7255 = vmatprep.mubr.msk.bf16.mxu1 %vm418_vm0, %v9372_v59 }
 0x4b3   : > { %7285 = vmatprep.subr.bf16.mxu1 %v8068_v61 }
 0x4b6   : > { %7286 = vmatpush3.bf16.msra.mxu1 %v8068_v61 }
 0x4b7   : > { %7319 = vmatprep.subr.bf16.mxu1 %v8069_v31 }
 0x4b9   : > { %7256 = vmatmul.mubr.msk.bf16.gmra.mrb[4].mxu1 %vm418_vm0, %v9416_v1 }
 0x4ba   : > { %7259 = vmatprep.mubr.msk.bf16.mxu1 %vm418_vm0, %v9410_v8 }
 0x4c1   : > { %7260 = vmatmul.mubr.msk.bf16.gmra.mrb[8].mxu1 %vm418_vm0, %v9471_v25 }
 0x4c2   : > { %7263 = vmatprep.mubr.msk.bf16.mxu1 %vm418_vm0, %v9464_v41 }
 0x4c9   : > { %7264 = vmatmul.mubr.msk.bf16.gmra.mrb[12].mxu1 %vm418_vm0, %v9525_v53 }
 0x4ca   : > { %7267 = vmatprep.mubr.msk.bf16.mxu1 %vm418_vm0, %v9518_v49 }
 0x4d1   : > { %7268 = vmatmul.mubr.msk.bf16.gmra.mrb[16].mxu1 %vm418_vm0, %v9578_v46 }
 0x4d2   : > { %7271 = vmatprep.mubr.msk.bf16.mxu1 %vm418_vm0, %v9571_v30 }
 0x4d9   : > { %7272 = vmatmul.mubr.msk.bf16.gmra.mrb[20].mxu1 %vm418_vm0, %v9635_v33 }
 0x4da   : > { %7275 = vmatprep.mubr.msk.bf16.mxu1 %vm418_vm0, %v9628_v7 }
 0x4e1   : > { %7276 = vmatmul.mubr.msk.bf16.gmra.mrb[24].mxu1 %vm418_vm0, %v9689_v51 }
 0x4e2   : > { %7279 = vmatprep.mubr.msk.bf16.mxu1 %vm418_vm0, %v9682_v23 }
 0x4e9   : > { %7280 = vmatmul.mubr.msk.bf16.gmra.mrb[28].mxu1 %vm418_vm0, %v9731_v12 }
 0x4ea   : > { %7287 = vmatprep.mubr.msk.bf16.mxu1 %vm418_vm0, %v9376_v43 }
 0x4f1   : > { %7288 = vmatmul.mubr.msk.bf16.vlgmr.msra.gmra.mrb[0].mxu1 %vm418_vm0, %v9372_v59 }
 0x4f2   : > { %7320 = vmatpush3.bf16.msra.mxu1 %v8069_v31  ;;  %7291 = vmatprep.mubr.msk.bf16.mxu1 %vm418_vm0, %v9416_v1 }
 0x4f3   : > { %7321 = vmatprep.subr.bf16.mxu1 %v8070_v3 }
 0x4f6   : > { %7322 = vmatpush3.bf16.msra.mxu1 %v8070_v3 }
 0x4f7   : > { %7355 = vmatprep.subr.bf16.mxu1 %v8071_v50 }
 0x4f9   : > { %7292 = vmatmul.mubr.msk.bf16.gmra.mrb[4].mxu1 %vm418_vm0, %v9410_v8 }
 0x4fa   : > { %7295 = vmatprep.mubr.msk.bf16.mxu1 %vm418_vm0, %v9471_v25 }
 0x501   : > { %7296 = vmatmul.mubr.msk.bf16.gmra.mrb[8].mxu1 %vm418_vm0, %v9464_v41 }
 0x502   : > { %7299 = vmatprep.mubr.msk.bf16.mxu1 %vm418_vm0, %v9525_v53 }
 0x509   : > { %7300 = vmatmul.mubr.msk.bf16.gmra.mrb[12].mxu1 %vm418_vm0, %v9518_v49 }
 0x50a   : > { %7303 = vmatprep.mubr.msk.bf16.mxu1 %vm418_vm0, %v9578_v46 }
 0x511   : > { %7304 = vmatmul.mubr.msk.bf16.gmra.mrb[16].mxu1 %vm418_vm0, %v9571_v30 }
 0x512   : > { %7307 = vmatprep.mubr.msk.bf16.mxu1 %vm418_vm0, %v9635_v33 }
 0x519   : > { %7308 = vmatmul.mubr.msk.bf16.gmra.mrb[20].mxu1 %vm418_vm0, %v9628_v7 }
 0x51a   : > { %7311 = vmatprep.mubr.msk.bf16.mxu1 %vm418_vm0, %v9689_v51 }
 0x521   : > { %7312 = vmatmul.mubr.msk.bf16.gmra.mrb[24].mxu1 %vm418_vm0, %v9682_v23 }
 0x522   : > { %7315 = vmatprep.mubr.msk.bf16.mxu1 %vm418_vm0, %v9731_v12 }
 0x529   : > { %7316 = vmatmul.mubr.msk.bf16.gmra.mrb[28].mxu1 %vm418_vm0, %v9724_v19 }
 0x52a   : > { %7323 = vmatprep.mubr.msk.bf16.mxu1 %vm418_vm0, %v9372_v59  ;;  %v8074_v59 = vld [vmem:[%s10510_s5 + $0x78] sm:$0xff]  }
 0x531   : > { %7324 = vmatmul.mubr.msk.bf16.vlgmr.msra.gmra.mrb[0].mxu1 %vm418_vm0, %v9416_v1  ;;  %v8075_v1 = vld [vmem:[%s10510_s5 + $0x80] sm:$0xff]  }
 0x532   : > { %7356 = vmatpush3.bf16.msra.mxu1 %v8071_v50  ;;  %7327 = vmatprep.mubr.msk.bf16.mxu1 %vm418_vm0, %v9410_v8  ;;  %v10577_v8 = vld [vmem:[#allocation5_spill] sm:$0xff] }
 0x533   : > { %7357 = vmatprep.subr.bf16.mxu1 %v8072_v39 }
 0x536   : > { %7358 = vmatpush3.bf16.msra.mxu1 %v8072_v39 }
 0x537   : > { %7391 = vmatprep.subr.bf16.mxu1 %v8073_v0 }
 0x539   : > { %7328 = vmatmul.mubr.msk.bf16.gmra.mrb[4].mxu1 %vm418_vm0, %v9471_v25  ;;  %v10580_v25 = vld [vmem:[#allocation8_spill] sm:$0xff] }
 0x53a   : > { %7331 = vmatprep.mubr.msk.bf16.mxu1 %vm418_vm0, %v9464_v41  ;;  %v10579_v41 = vld [vmem:[#allocation7_spill] sm:$0xff] }
 0x541   : > { %7332 = vmatmul.mubr.msk.bf16.gmra.mrb[8].mxu1 %vm418_vm0, %v9525_v53  ;;  %v10582_v53 = vld [vmem:[#allocation10_spill] sm:$0xff] }
 0x542   : > { %7335 = vmatprep.mubr.msk.bf16.mxu1 %vm418_vm0, %v9518_v49  ;;  %v10581_v49 = vld [vmem:[#allocation9_spill] sm:$0xff] }
 0x549   : > { %7336 = vmatmul.mubr.msk.bf16.gmra.mrb[12].mxu1 %vm418_vm0, %v9578_v46 }
 0x54a   : > { %7339 = vmatprep.mubr.msk.bf16.mxu1 %vm418_vm0, %v9571_v30  ;;  %v5738_v30 = vld [vmem:[%s10512_s7] sm:$0xff] }
 0x54b   : > { %v7480_v46 = vpack.c.bf16 %v5739_v18, %v5738_v30 }
 0x54d   : > { %7481 = vmatpush3.bf16.msra.mxu0 %v7480_v46 }
 0x54e   : > { %7482 = vmatprep.subr.bf16.mxu0 %v8251_v13 }
 0x551   : > { %7340 = vmatmul.mubr.msk.bf16.gmra.mrb[16].mxu1 %vm418_vm0, %v9635_v33  ;;  %v5817_v33 = vld [vmem:[%s10514_s9] sm:$0xff] }
 0x552   : > { %7343 = vmatprep.mubr.msk.bf16.mxu1 %vm418_vm0, %v9628_v7  ;;  %v8253_v7 = vmov 0.0  }
 0x553   : > { %7471 = vmatprep.mubr.msk.f32.mxu0 %vm8252_vm3, %v8253_v7 }
 0x559   : > { %7344 = vmatmul.mubr.msk.bf16.gmra.mrb[20].mxu1 %vm418_vm0, %v9689_v51 }
 0x55a   : > { %7347 = vmatprep.mubr.msk.bf16.mxu1 %vm418_vm0, %v9682_v23 }
 0x561   : > { %7348 = vmatmul.mubr.msk.bf16.gmra.mrb[24].mxu1 %vm418_vm0, %v9731_v12 }
 0x562   : > { %7351 = vmatprep.mubr.msk.bf16.mxu1 %vm418_vm0, %v9724_v19 }
 0x569   : > { %7352 = vmatmul.mubr.msk.bf16.gmra.mrb[28].mxu1 %vm418_vm0, %v9376_v43  ;;  %v10578_v43 = vld [vmem:[#allocation6_spill] sm:$0xff] }
 0x56a   : > { %7359 = vmatprep.mubr.msk.bf16.mxu1 %vm418_vm0, %v9743_v15 }
 0x571   : > { %7360 = vmatmul.mubr.msk.bf16.vlgmr.msra.gmra.mrb[0].mxu1 %vm418_vm0, %v9385_v24 }
 0x572   : > { %7392 = vmatpush3.bf16.msra.mxu1 %v8073_v0  ;;  %7363 = vmatprep.mubr.msk.bf16.mxu1 %vm418_vm0, %v10577_v8 }
 0x573   : > { %7393 = vmatprep.subr.bf16.mxu1 %v8074_v59 }
 0x576   : > { %7394 = vmatpush3.bf16.msra.mxu1 %v8074_v59 }
 0x577   : > { %7427 = vmatprep.subr.bf16.mxu1 %v8075_v1 }
 0x579   : > { %7364 = vmatmul.mubr.msk.bf16.gmra.mrb[4].mxu1 %vm418_vm0, %v10578_v43 }
 0x57a   : > { %7367 = vmatprep.mubr.msk.bf16.mxu1 %vm418_vm0, %v10579_v41 }
 0x581   : > { %7368 = vmatmul.mubr.msk.bf16.gmra.mrb[8].mxu1 %vm418_vm0, %v10580_v25 }
 0x582   : > { %7371 = vmatprep.mubr.msk.bf16.mxu1 %vm418_vm0, %v10581_v49 }
 0x589   : > { %7372 = vmatmul.mubr.msk.bf16.gmra.mrb[12].mxu1 %vm418_vm0, %v10582_v53 }
 0x58a   : > { %7375 = vmatprep.mubr.msk.bf16.mxu1 %vm418_vm0, %v10583_v55 }
 0x591   : > { %7376 = vmatmul.mubr.msk.bf16.gmra.mrb[16].mxu1 %vm418_vm0, %v9717_v32 }
 0x592   : > { %7379 = vmatprep.mubr.msk.bf16.mxu1 %vm418_vm0, %v9735_v36 }
 0x599   : > { %7380 = vmatmul.mubr.msk.bf16.gmra.mrb[20].mxu1 %vm418_vm0, %v9760_v2 }
 0x59a   : > { %7383 = vmatprep.mubr.msk.bf16.mxu1 %vm418_vm0, %v9774_v35 }
 0x5a1   : > { %7384 = vmatmul.mubr.msk.bf16.gmra.mrb[24].mxu1 %vm418_vm0, %v9776_v44 }
 0x5a2   : > { %7387 = vmatprep.mubr.msk.bf16.mxu1 %vm418_vm0, %v9788_v60 }
 0x5a9   : > { %7388 = vmatmul.mubr.msk.bf16.gmra.mrb[28].mxu1 %vm418_vm0, %v9792_v4 }
 0x5aa   : > { %7395 = vmatprep.mubr.msk.bf16.mxu1 %vm418_vm0, %v9385_v24 }
 0x5b1   : > { %7396 = vmatmul.mubr.msk.bf16.vlgmr.msra.gmra.mrb[0].mxu1 %vm418_vm0, %v10577_v8 }
 0x5b2   : > { %7428 = vmatpush3.bf16.msra.mxu1 %v8075_v1  ;;  %7399 = vmatprep.mubr.msk.bf16.mxu1 %vm418_vm0, %v10578_v43 }
 0x5b3   : > { %7429 = vmatprep.subr.bf16.mxu1 %v8076_v38 }
 0x5b6   : > { %7430 = vmatpush3.bf16.msra.mxu1 %v8076_v38 }
 0x5b7   : > { %7474 = vmatprep.subr.mxu1 %v8253_v7 }
 0x5b9   : > { %7400 = vmatmul.mubr.msk.bf16.gmra.mrb[4].mxu1 %vm418_vm0, %v10579_v41 }
 0x5ba   : > { %7403 = vmatprep.mubr.msk.bf16.mxu1 %vm418_vm0, %v10580_v25 }
 0x5c1   : > { %7404 = vmatmul.mubr.msk.bf16.gmra.mrb[8].mxu1 %vm418_vm0, %v10581_v49 }
 0x5c2   : > { %7407 = vmatprep.mubr.msk.bf16.mxu1 %vm418_vm0, %v10582_v53 }
 0x5c9   : > { %7408 = vmatmul.mubr.msk.bf16.gmra.mrb[12].mxu1 %vm418_vm0, %v10583_v55 }
 0x5ca   : > { %7411 = vmatprep.mubr.msk.bf16.mxu1 %vm418_vm0, %v9717_v32 }
 0x5d1   : > { %7412 = vmatmul.mubr.msk.bf16.gmra.mrb[16].mxu1 %vm418_vm0, %v9735_v36 }
 0x5d2   : > { %7415 = vmatprep.mubr.msk.bf16.mxu1 %vm418_vm0, %v9760_v2 }
 0x5d9   : > { %7416 = vmatmul.mubr.msk.bf16.gmra.mrb[20].mxu1 %vm418_vm0, %v9774_v35 }
 0x5da   : > { %7419 = vmatprep.mubr.msk.bf16.mxu1 %vm418_vm0, %v9776_v44 }
 0x5e1   : > { %7420 = vmatmul.mubr.msk.bf16.gmra.mrb[24].mxu1 %vm418_vm0, %v9788_v60 }
 0x5e2   : > { %7423 = vmatprep.mubr.msk.bf16.mxu1 %vm418_vm0, %v9792_v4 }
 0x5e9   : > { %7424 = vmatmul.mubr.msk.bf16.gmra.mrb[28].mxu1 %vm418_vm0, %v9743_v15 }
 0x5ea   : > { %7431 = vmatprep.mubr.msk.bf16.mxu1 %vm418_vm0, %v10577_v8 }
 0x5f1   : > { %7432 = vmatmul.mubr.msk.bf16.vlgmr.msra.gmra.mrb[0].mxu1 %vm418_vm0, %v10578_v43 }
 0x5f2   : > { %7435 = vmatprep.mubr.msk.bf16.mxu1 %vm418_vm0, %v10579_v41  ;;  %7475 = vmatpush3.msra.mxu1 %v5817_v33 }
 0x5f9   : > { %7436 = vmatmul.mubr.msk.bf16.gmra.mrb[4].mxu1 %vm418_vm0, %v10580_v25 }
 0x5fa   : > { %7439 = vmatprep.mubr.msk.bf16.mxu1 %vm418_vm0, %v10581_v49 }
 0x601   : > { %7440 = vmatmul.mubr.msk.bf16.gmra.mrb[8].mxu1 %vm418_vm0, %v10582_v53 }
 0x602   : > { %7443 = vmatprep.mubr.msk.bf16.mxu1 %vm418_vm0, %v10583_v55 }
 0x609   : > { %7444 = vmatmul.mubr.msk.bf16.gmra.mrb[12].mxu1 %vm418_vm0, %v9717_v32 }
 0x60a   : > { %7447 = vmatprep.mubr.msk.bf16.mxu1 %vm418_vm0, %v9735_v36 }
 0x611   : > { %7448 = vmatmul.mubr.msk.bf16.gmra.mrb[16].mxu1 %vm418_vm0, %v9760_v2 }
 0x612   : > { %7451 = vmatprep.mubr.msk.bf16.mxu1 %vm418_vm0, %v9774_v35 }
 0x619   : > { %7452 = vmatmul.mubr.msk.bf16.gmra.mrb[20].mxu1 %vm418_vm0, %v9776_v44 }
 0x61a   : > { %7455 = vmatprep.mubr.msk.bf16.mxu1 %vm418_vm0, %v9788_v60 }
 0x621   : > { %7456 = vmatmul.mubr.msk.bf16.gmra.mrb[24].mxu1 %vm418_vm0, %v9792_v4 }
 0x622   : > { %7459 = vmatprep.mubr.msk.bf16.mxu1 %vm418_vm0, %v9743_v15 }
 0x629   : > { %7460 = vmatmul.mubr.msk.bf16.gmra.mrb[28].mxu1 %vm418_vm0, %v9385_v24  ;;  %v5741_v24 = vld [vmem:[%s10512_s7 + $0x18] sm:$0xff] }
 0x62a   : > { %v7483_v62 = vpack.c.bf16 %v5741_v24, %v5740_v22  ;;  %7476 = vmatprep.mubr.msk.f32.mxu1 %vm8252_vm3, %v8253_v7 }
 0x62c   : > { %7484 = vmatpush3.bf16.msra.mxu0 %v7483_v62 }
 0x6c4   : > { %v7433_v23 = vpop.f32.mrb[0].mxu1 }
 0x6c5   : > { %v5469_v51 = vpop.f32.mrb[1].mxu1  ;;  %v10111_v12 = vadd.f32 %v7433_v23, %v10105_v42 }
 0x6c6   : > { %v10108_v40 = vadd.f32 %v10105_v42, %v5469_v51  ;;  %v7434_v32 = vpop.f32.mrb[2].mxu1 }
 0x6c7   : > { %v5472_v19 = vpop.f32.mrb[3].mxu1  ;;  %v10119_v28 = vadd.f32 %v7434_v32, %v10105_v42  ;;  %v5670_v21 = vsel %vm418_vm0, %v10111_v12, 0.0 }
 0x6c8   : > { %v10114_v11 = vadd.f32 %v10105_v42, %v5472_v19  ;;  %v5667_v36 = vsel %vm418_vm0, %v10108_v40, 0.0 }
 0x6c9   : > { %v5672_v6 = vsel %vm418_vm0, %v10119_v28, 0.0 }
 0x6ca   : > { %v5668_v15 = vsel %vm418_vm0, %v10114_v11, 0.0 }
 0x6cb   : > { %v5669_v20 = vadd.f32 %v5668_v15, %v5667_v36 }
 0x6cc   : > { %v7437_v45 = vpop.f32.mrb[4].mxu1 }
 0x6cd   : > { %v5671_v9 = vadd.f32 %v5670_v21, %v5669_v20  ;;  %v5485_v2 = vpop.f32.mrb[5].mxu1  ;;  %v10131_v54 = vadd.f32 %v7437_v45, %v10105_v42 }
 0x6ce   : > { %v10128_v10 = vadd.f32 %v10105_v42, %v5485_v2  ;;  %v7438_v56 = vpop.f32.mrb[6].mxu1 }
 0x6cf   : > { %v5673_v52 = vadd.f32 %v5672_v6, %v5671_v9  ;;  %v5488_v63 = vpop.f32.mrb[7].mxu1  ;;  %v10139_v37 = vadd.f32 %v7438_v56, %v10105_v42  ;;  %v5678_v57 = vsel %vm418_vm0, %v10131_v54, 0.0 }
 0x6d0   : > { %v5674_v14 = vsel %vm418_vm0, %v10128_v10, 0.0  ;;  %v10136_v35 = vadd.f32 %v10105_v42, %v5488_v63 }
 0x6d1   : > { %v5675_v44 = vadd.f32 %v5674_v14, %v5673_v52  ;;  %v5680_v16 = vsel %vm418_vm0, %v10139_v37, 0.0 }
 0x6d2   : > { %v5676_v26 = vsel %vm418_vm0, %v10136_v35, 0.0 }
 0x6d3   : > { %v5677_v48 = vadd.f32 %v5676_v26, %v5675_v44 }
 0x6d4   : > { %v7441_v58 = vpop.f32.mrb[8].mxu1 }
 0x6d5   : > { %v5679_v29 = vadd.f32 %v5678_v57, %v5677_v48  ;;  %v5501_v60 = vpop.f32.mrb[9].mxu1  ;;  %v10151_v5 = vadd.f32 %v7441_v58, %v10105_v42 }
 0x6d6   : > { %v10148_v47 = vadd.f32 %v10105_v42, %v5501_v60  ;;  %v7442_v4 = vpop.f32.mrb[10].mxu1 }
 0x6d7   : > { %v5681_v17 = vadd.f32 %v5680_v16, %v5679_v29  ;;  %v5504_v27 = vpop.f32.mrb[11].mxu1  ;;  %v10159_v3 = vadd.f32 %v7442_v4, %v10105_v42  ;;  %v5686_v0 = vsel %vm418_vm0, %v10151_v5, 0.0 }
 0x6d8   : > { %v5682_v34 = vsel %vm418_vm0, %v10148_v47, 0.0  ;;  %v10156_v61 = vadd.f32 %v10105_v42, %v5504_v27 }
 0x6d9   : > { %v5683_v31 = vadd.f32 %v5682_v34, %v5681_v17  ;;  %v5688_v43 = vsel %vm418_vm0, %v10159_v3, 0.0 }
 0x6da   : > { %v5684_v50 = vsel %vm418_vm0, %v10156_v61, 0.0 }
 0x6db   : > { %v5685_v39 = vadd.f32 %v5684_v50, %v5683_v31 }
 0x6dc   : > { %v7445_v59 = vpop.f32.mrb[12].mxu1 }
 0x6dd   : > { %v5687_v8 = vadd.f32 %v5686_v0, %v5685_v39  ;;  %v5517_v1 = vpop.f32.mrb[13].mxu1  ;;  %v10171_v55 = vadd.f32 %v7445_v59, %v10105_v42 }
 0x6de   : > { %v10168_v41 = vadd.f32 %v10105_v42, %v5517_v1  ;;  %v7446_v25 = vpop.f32.mrb[14].mxu1 }
 0x6df   : > { %v5689_v49 = vadd.f32 %v5688_v43, %v5687_v8  ;;  %v5520_v53 = vpop.f32.mrb[15].mxu1  ;;  %v10179_v18 = vadd.f32 %v7446_v25, %v10105_v42  ;;  %v5694_v24 = vsel %vm418_vm0, %v10171_v55, 0.0 }
 0x6e0   : > { %v5690_v38 = vsel %vm418_vm0, %v10168_v41, 0.0  ;;  %v10176_v13 = vadd.f32 %v10105_v42, %v5520_v53 }
 0x6e1   : > { %v5691_v30 = vadd.f32 %v5690_v38, %v5689_v49  ;;  %v5696_v23 = vsel %vm418_vm0, %v10179_v18, 0.0 }
 0x6e2   : > { %v5692_v46 = vsel %vm418_vm0, %v10176_v13, 0.0 }
 0x6e3   : > { %v5693_v22 = vadd.f32 %v5692_v46, %v5691_v30 }
 0x6e4   : > { %v7449_v62 = vpop.f32.mrb[16].mxu1 }
 0x6e5   : > { %v5695_v7 = vadd.f32 %v5694_v24, %v5693_v22  ;;  %v5533_v33 = vpop.f32.mrb[17].mxu1  ;;  %v10191_v15 = vadd.f32 %v7449_v62, %v10105_v42 }
 0x6e6   : > { %v10188_v51 = vadd.f32 %v10105_v42, %v5533_v33  ;;  %v7450_v32 = vpop.f32.mrb[18].mxu1 }
 0x6e7   : > { %v5697_v19 = vadd.f32 %v5696_v23, %v5695_v7  ;;  %v5536_v36 = vpop.f32.mrb[19].mxu1  ;;  %v10199_v9 = vadd.f32 %v7450_v32, %v10105_v42  ;;  %v5702_v56 = vsel %vm418_vm0, %v10191_v15, 0.0 }
 0x6e8   : > { %v5698_v20 = vsel %vm418_vm0, %v10188_v51, 0.0  ;;  %v10196_v21 = vadd.f32 %v10105_v42, %v5536_v36 }
 0x6e9   : > { %v5699_v45 = vadd.f32 %v5698_v20, %v5697_v19  ;;  %v5704_v44 = vsel %vm418_vm0, %v10199_v9, 0.0 }
 0x6ea   : > { %v5700_v2 = vsel %vm418_vm0, %v10196_v21, 0.0 }
 0x6eb   : > { %v5701_v6 = vadd.f32 %v5700_v2, %v5699_v45 }
 0x6ec   : > { %v7453_v52 = vpop.f32.mrb[20].mxu1 }
 0x6ed   : > { %v5703_v63 = vadd.f32 %v5702_v56, %v5701_v6  ;;  %v5549_v14 = vpop.f32.mrb[21].mxu1  ;;  %v10211_v29 = vadd.f32 %v7453_v52, %v10105_v42 }
 0x6ee   : > { %v10208_v26 = vadd.f32 %v10105_v42, %v5549_v14  ;;  %v7454_v48 = vpop.f32.mrb[22].mxu1 }
 0x6ef   : > { %v5705_v57 = vadd.f32 %v5704_v44, %v5703_v63  ;;  %v5552_v58 = vpop.f32.mrb[23].mxu1  ;;  %v10219_v17 = vadd.f32 %v7454_v48, %v10105_v42  ;;  %v5710_v31 = vsel %vm418_vm0, %v10211_v29, 0.0 }
 0x6f0   : > { %v5706_v60 = vsel %vm418_vm0, %v10208_v26, 0.0  ;;  %v10216_v16 = vadd.f32 %v10105_v42, %v5552_v58 }
 0x6f1   : > { %v5707_v4 = vadd.f32 %v5706_v60, %v5705_v57  ;;  %v5712_v59 = vsel %vm418_vm0, %v10219_v17, 0.0 }
 0x6f2   : > { %v5708_v27 = vsel %vm418_vm0, %v10216_v16, 0.0 }
 0x6f3   : > { %v5709_v34 = vadd.f32 %v5708_v27, %v5707_v4 }
 0x6f4   : > { %v7457_v50 = vpop.f32.mrb[24].mxu1 }
 0x6f5   : > { %v5711_v39 = vadd.f32 %v5710_v31, %v5709_v34  ;;  %v5565_v0 = vpop.f32.mrb[25].mxu1  ;;  %v10231_v49 = vadd.f32 %v7457_v50, %v10105_v42 }
 0x6f6   : > { %v10228_v8 = vadd.f32 %v10105_v42, %v5565_v0  ;;  %v7458_v1 = vpop.f32.mrb[26].mxu1  ;;  %v5742_v0 = vld [vmem:[%s10513_s8] sm:$0x1] }
 0x6f7   : > { %v5713_v43 = vadd.f32 %v5712_v59, %v5711_v39  ;;  %v5568_v25 = vpop.f32.mrb[27].mxu1  ;;  %v10239_v46 = vadd.f32 %v7458_v1, %v10105_v42  ;;  %v5718_v62 = vsel %vm418_vm0, %v10231_v49, 0.0 }
 0x6f8   : > { %v5714_v53 = vsel %vm418_vm0, %v10228_v8, 0.0  ;;  %v10236_v38 = vadd.f32 %v10105_v42, %v5568_v25 }
 0x6f9   : > { %v5715_v30 = vadd.f32 %v5714_v53, %v5713_v43  ;;  %v5720_v32 = vsel %vm418_vm0, %v10239_v46, 0.0  ;;  %v5818_v53 = vld [vmem:[%s10515_s10] sm:$0x1] }
 0x6fa   : > { %v5716_v22 = vsel %vm418_vm0, %v10236_v38, 0.0 }
 0x6fb   : > { %v5717_v24 = vadd.f32 %v5716_v22, %v5715_v30 }
 0x6fc   : > { %v7461_v7 = vpop.f32.mrb[28].mxu1 }
 0x6fd   : > { %v5719_v33 = vadd.f32 %v5718_v62, %v5717_v24  ;;  %v5581_v23 = vpop.f32.mrb[29].mxu1  ;;  %v10251_v2 = vadd.f32 %v7461_v7, %v10105_v42 }
 0x6fe   : > { %v10248_v19 = vadd.f32 %v10105_v42, %v5581_v23  ;;  %v7462_v36 = vpop.f32.mrb[30].mxu1  ;;  %v5899_v23 = vlaneseq }
 0x6ff   : > { %v5721_v20 = vadd.f32 %v5720_v32, %v5719_v33  ;;  %v5584_v45 = vpop.f32.mrb[31].mxu1  ;;  %v10259_v63 = vadd.f32 %v7462_v36, %v10105_v42  ;;  %v5726_v48 = vsel %vm418_vm0, %v10251_v2, 0.0 }
 0x700   : > { %v5722_v6 = vsel %vm418_vm0, %v10248_v19, 0.0  ;;  %v10256_v56 = vadd.f32 %v10105_v42, %v5584_v45  ;;  %v5900_v32 = vshrl.u32 %v5899_v23, 7 }
 0x701   : > { %v5723_v52 = vadd.f32 %v5722_v6, %v5721_v20  ;;  %v5728_v58 = vsel %vm418_vm0, %v10259_v63, 0.0 }
 0x702   : > { %v5724_v14 = vsel %vm418_vm0, %v10256_v56, 0.0  ;;  %v5901_v36 = vsub.s32 0, %v5900_v32  ;;  %v8169_v32 = vld [vmem:[%s8370_s14 + $0x70] sm:$0xff] }
 0x703   : > { %v5725_v44 = vadd.f32 %v5724_v14, %v5723_v52 }
 0x705   : > { %v5727_v57 = vadd.f32 %v5726_v48, %v5725_v44 }
 0x707   : > { %v5729_v60 = vadd.f32 %v5728_v58, %v5727_v57 }
 0x709   : > { %v5730_v4 = vrot.slane %v5729_v60, 4 }
 0x70b   : > { %v5731_v27 = vadd.f32 %v5730_v4, %v5729_v60 }
 0x70d   : > { %v5732_v34 = vrot.slane %v5731_v27, 2 }
 0x70f   : > { %v5733_v31 = vadd.f32 %v5732_v34, %v5731_v27  ;;  %v8159_v34 = vld [vmem:[%s8370_s14 + $0x20] sm:$0xff] }
 0x711   : > { %v5734_v50 = vrot.slane %v5733_v31, 1 }
 0x713   : > { %v5735_v39 = vadd.f32 %v5734_v50, %v5733_v31  ;;  %v8160_v31 = vld [vmem:[%s8370_s14 + $0x28] sm:$0xff] }
 0x715   : > { %v5737_v42 = vmul.f32 0.00390625, %v5735_v39  ;;  %v8161_v39 = vld [vmem:[%s8370_s14 + $0x30] sm:$0xff] }
 0x717   : > { %7472 = vmatmul.mubr.msk.f32.vlgmr.msra.gmra.mrb[32].mxu0 %vm418_vm0, %v5737_v42  ;;  %v8162_v42 = vld [vmem:[%s8370_s14 + $0x38] sm:$0xff] }
 0x7ea   : > { %v5812_v59 = vpop.f32.mrb[32].mxu0 }
 0x7eb   : > { %v5813_v1 = vadd.f32 %v5812_v59, %v5742_v0  ;;  %v7473_v43 = vpop.f32.mrb[33].mxu0  ;;  %v8163_v59 = vld [vmem:[%s8370_s14 + $0x40] sm:$0xff] }
 0x7ec   : > { %v8164_v43 = vld [vmem:[%s8370_s14 + $0x48] sm:$0xff] }
 0x7ed   : > { %v5816_v25 = vmax.f32 %v5813_v1, 0.0 }
 0x7ef   : > { %7477 = vmatmul.mubr.msk.f32.vlgmr.msra.gmra.mrb[32].mxu1 %vm5819_vm4, %v5816_v25 }
 0x8c2   : > { %v5889_v30 = vpop.f32.mrb[32].mxu1 }
 0x8c3   : > { %v5890_v22 = vadd.f32 %v5889_v30, %v5818_v53  ;;  %v7478_v24 = vpop.f32.mrb[33].mxu1  ;;  %v8165_v53 = vld [vmem:[%s8370_s14 + $0x50] sm:$0xff] }
 0x8c5   : > { %v6476_v62 = vmul.f32 -1.442695, %v5890_v22  ;;  %v8166_v22 = vld [vmem:[%s8370_s14 + $0x58] sm:$0xff] }
 0x8c7   : > { %8141 = vpow2.f32 %v6476_v62  ;;  %v8167_v62 = vld [vmem:[%s8370_s14 + $0x60] sm:$0xff] }
 0x8d1   : > { %v8142_v7 = vpop.eup %8141 }
 0x8d2   : > { %v5896_v33 = vadd.f32 1.0, %v8142_v7 }
 0x8d4   : > { %8143 = vrcp.f32 %v5896_v33  ;;  %v8168_v33 = vld [vmem:[%s8370_s14 + $0x68] sm:$0xff] }
 0x8de   : > { %v8144_v20 = vpop.eup %8143 }
 0x8df   : > { %v5902_v45 = vrot.slane %v8144_v20, %v5901_v36  ;;  %v8170_v20 = vld [vmem:[%s8370_s14 + $0x78] sm:$0xff] }
 0x8e1   : > { %v5903_v6 = vmul.f32 %v5902_v45, %v10108_v40  ;;  %v5904_v52 = vmul.f32 %v5902_v45, %v10114_v11  ;;  %v5905_v14 = vmul.f32 %v5902_v45, %v10111_v12  ;;  %v5906_v44 = vmul.f32 %v5902_v45, %v10119_v28 }
 0x8e2   : > { %v5907_v48 = vmul.f32 %v5902_v45, %v10128_v10  ;;  %v5908_v57 = vmul.f32 %v5902_v45, %v10136_v35  ;;  %v5909_v58 = vmul.f32 %v5902_v45, %v10131_v54  ;;  %v5910_v60 = vmul.f32 %v5902_v45, %v10139_v37 }
 0x8e3   : > { %v5911_v4 = vmul.f32 %v5902_v45, %v10148_v47  ;;  %v5912_v40 = vmul.f32 %v5902_v45, %v10156_v61  ;;  %v5913_v11 = vmul.f32 %v5902_v45, %v10151_v5  ;;  %v5914_v27 = vmul.f32 %v5902_v45, %v10159_v3 }
 0x8e4   : > { %v5915_v12 = vmul.f32 %v5902_v45, %v10168_v41  ;;  %v5916_v28 = vmul.f32 %v5902_v45, %v10176_v13  ;;  %v5917_v10 = vmul.f32 %v5902_v45, %v10171_v55  ;;  %v5918_v35 = vmul.f32 %v5902_v45, %v10179_v18 }
 0x8e5   : > { %v5919_v54 = vmul.f32 %v5902_v45, %v10188_v51  ;;  %v5920_v37 = vmul.f32 %v5902_v45, %v10196_v21  ;;  %v5921_v47 = vmul.f32 %v5902_v45, %v10191_v15  ;;  %v10299_v5 = vmul.f32 %v5902_v45, %v10199_v9 }
 0x8e6   : > { %v10302_v61 = vmul.f32 %v5902_v45, %v10208_v26  ;;  %v10305_v3 = vmul.f32 %v5902_v45, %v10216_v16  ;;  %v10308_v41 = vmul.f32 %v5902_v45, %v10211_v29  ;;  %v10311_v55 = vmul.f32 %v5902_v45, %v10219_v17  ;;  %v8155_v16 = vld [vmem:[%s8370_s14] sm:$0xff] }
 0x8e7   : > { %v10314_v13 = vmul.f32 %v5902_v45, %v10228_v8  ;;  %v10317_v18 = vmul.f32 %v5902_v45, %v10236_v38  ;;  %v10320_v51 = vmul.f32 %v5902_v45, %v10231_v49  ;;  %v10323_v15 = vmul.f32 %v5902_v45, %v10239_v46  ;;  %v8156_v8 = vld [vmem:[%s8370_s14 + $0x8] sm:$0xff]  ;;  %v8157_v38 = vld [vmem:[%s8370_s14 + $0x10] sm:$0xff] }
 0x8e8   : > { %v10326_v21 = vmul.f32 %v5902_v45, %v10248_v19  ;;  %v10329_v9 = vmul.f32 %v5902_v45, %v10256_v56  ;;  %v10332_v26 = vmul.f32 %v5902_v45, %v10251_v2  ;;  %v10335_v29 = vmul.f32 %v5902_v45, %v10259_v63  ;;  %v8158_v19 = vld [vmem:[%s8370_s14 + $0x18] sm:$0xff] }
 0x8e9   : > { %v5935_v17 = vadd.f32 %v8155_v16, %v5903_v6  ;;  %v5936_v49 = vadd.f32 %v8156_v8, %v5904_v52  ;;  %v5937_v46 = vadd.f32 %v8157_v38, %v5905_v14  ;;  %v5938_v56 = vadd.f32 %v8158_v19, %v5906_v44  ;;  %v8171_v6 = vld [vmem:[%s8370_s14 + $0x80] sm:$0xff]  ;;  %v8172_v14 = vld [vmem:[%s8370_s14 + $0x88] sm:$0xff]  ;;  %v8185_v16 = vld [vmem:[%s8370_s14 + $0xf0] sm:$0xff] }
 0x8ea   : > { %v5939_v2 = vadd.f32 %v8159_v34, %v5907_v48  ;;  %v5940_v50 = vadd.f32 %v8160_v31, %v5908_v57  ;;  %v5941_v63 = vadd.f32 %v8161_v39, %v5909_v58  ;;  %v5942_v0 = vadd.f32 %v8162_v42, %v5910_v60  ;;  %v8173_v48 = vld [vmem:[%s8370_s14 + $0x90] sm:$0xff]  ;;  %v8174_v58 = vld [vmem:[%s8370_s14 + $0x98] sm:$0xff] }
 0x8eb   : > { %v5943_v1 = vadd.f32 %v8163_v59, %v5911_v4  ;;  %v5944_v25 = vadd.f32 %v8164_v43, %v5912_v40  ;;  %v5945_v30 = vadd.f32 %v8165_v53, %v5913_v11  ;;  %v5946_v24 = vadd.f32 %v8166_v22, %v5914_v27  ;;  %5967 = vst.msk [vmem:[%s10350_s16] sm:$0xff] %vm418_vm0, %v5935_v17  ;;  %v8175_v4 = vld [vmem:[%s8370_s14 + $0xa0] sm:$0xff]  ;;  %v8176_v11 = vld [vmem:[%s8370_s14 + $0xa8] sm:$0xff]  ;;  %v8186_v8 = vld [vmem:[%s8370_s14 + $0xf8] sm:$0xff] }
 0x8ec   : > { %5968 = vst.msk [vmem:[%s10350_s16 + $0x8] sm:$0xff] %vm418_vm0, %v5936_v49  ;;  %5969 = vst.msk [vmem:[%s10350_s16 + $0x10] sm:$0xff] %vm418_vm0, %v5937_v46  ;;  %v5947_v7 = vadd.f32 %v8167_v62, %v5915_v12  ;;  %v5948_v23 = vadd.f32 %v8168_v33, %v5916_v28  ;;  %v5949_v36 = vadd.f32 %v8169_v32, %v5917_v10  ;;  %v8177_v12 = vld [vmem:[%s8370_s14 + $0xb0] sm:$0xff]  ;;  %v8178_v10 = vld [vmem:[%s8370_s14 + $0xb8] sm:$0xff] }
 0x8ed   : > { %5970 = vst.msk [vmem:[%s10350_s16 + $0x18] sm:$0xff] %vm418_vm0, %v5938_v56  ;;  %v5950_v45 = vadd.f32 %v8170_v20, %v5918_v35  ;;  %5971 = vst.msk [vmem:[%s10350_s16 + $0x20] sm:$0xff] %vm418_vm0, %v5939_v2  ;;  %v5951_v52 = vadd.f32 %v8171_v6, %v5919_v54  ;;  %v5952_v44 = vadd.f32 %v8172_v14, %v5920_v37  ;;  %v8179_v54 = vld [vmem:[%s8370_s14 + $0xc0] sm:$0xff] }
 0x8ee   : > { %5972 = vst.msk [vmem:[%s10350_s16 + $0x28] sm:$0xff] %vm418_vm0, %v5940_v50  ;;  %5973 = vst.msk [vmem:[%s10350_s16 + $0x30] sm:$0xff] %vm418_vm0, %v5941_v63  ;;  %v5953_v57 = vadd.f32 %v8173_v48, %v5921_v47  ;;  %v5954_v60 = vadd.f32 %v8174_v58, %v10299_v5  ;;  %v5955_v40 = vadd.f32 %v8175_v4, %v10302_v61  ;;  %v8180_v47 = vld [vmem:[%s8370_s14 + $0xc8] sm:$0xff]  ;;  %v8181_v61 = vld [vmem:[%s8370_s14 + $0xd0] sm:$0xff] }
 0x8ef   : > { %5974 = vst.msk [vmem:[%s10350_s16 + $0x38] sm:$0xff] %vm418_vm0, %v5942_v0  ;;  %5975 = vst.msk [vmem:[%s10350_s16 + $0x40] sm:$0xff] %vm418_vm0, %v5943_v1  ;;  %v5956_v27 = vadd.f32 %v8176_v11, %v10305_v3  ;;  %v5957_v28 = vadd.f32 %v8177_v12, %v10308_v41  ;;  %v5958_v35 = vadd.f32 %v8178_v10, %v10311_v55  ;;  %v8182_v41 = vld [vmem:[%s8370_s14 + $0xd8] sm:$0xff] }
 0x8f0   : > { %5976 = vst.msk [vmem:[%s10350_s16 + $0x48] sm:$0xff] %vm418_vm0, %v5944_v25  ;;  %5977 = vst.msk [vmem:[%s10350_s16 + $0x50] sm:$0xff] %vm418_vm0, %v5945_v30  ;;  %v5959_v37 = vadd.f32 %v8179_v54, %v10314_v13  ;;  %v5960_v5 = vadd.f32 %v8180_v47, %v10317_v18  ;;  %v5961_v3 = vadd.f32 %v8181_v61, %v10320_v51  ;;  %v8183_v13 = vld [vmem:[%s8370_s14 + $0xe0] sm:$0xff]  ;;  %v8184_v51 = vld [vmem:[%s8370_s14 + $0xe8] sm:$0xff]  ;;  %s8187_s14 = scalar_lea.vmem %s10428_s24, 4096 }
 0x8f1   : > { %5978 = vst.msk [vmem:[%s10350_s16 + $0x58] sm:$0xff] %vm418_vm0, %v5946_v24  ;;  %5979 = vst.msk [vmem:[%s10350_s16 + $0x60] sm:$0xff] %vm418_vm0, %v5947_v7  ;;  %v5962_v55 = vadd.f32 %v8182_v41, %v10323_v15  ;;  %v5963_v18 = vadd.f32 %v8183_v13, %v10326_v21  ;;  %v5964_v15 = vadd.f32 %v8184_v51, %v10329_v9  ;;  %p8188_p11 = scmp.ne.s32.totalorder %s10428_s24, %s8187_s14  ;;  %p8195_p1 = scmp.lt.s32.totalorder %s8193_s22, %s8187_s14 }
 0x8f2   : > { %5980 = vst.msk [vmem:[%s10350_s16 + $0x68] sm:$0xff] %vm418_vm0, %v5948_v23  ;;  %5981 = vst.msk [vmem:[%s10350_s16 + $0x70] sm:$0xff] %vm418_vm0, %v5949_v36  ;;  %v5965_v17 = vadd.f32 %v8185_v16, %v10332_v26  ;;  %v5966_v49 = vadd.f32 %v8186_v8, %v10335_v29 }
 0x8f3   : > { %5982 = vst.msk [vmem:[%s10350_s16 + $0x78] sm:$0xff] %vm418_vm0, %v5950_v45  ;;  %5983 = vst.msk [vmem:[%s10350_s16 + $0x80] sm:$0xff] %vm418_vm0, %v5951_v52  ;;  %p8189_p12 = pnand %p8188_p11, %p8355_p5  ;;  %p8196_p2 = por %p8195_p1, %p8194_p0 }
 0x8f4   : > { %5984 = vst.msk [vmem:[%s10350_s16 + $0x88] sm:$0xff] %vm418_vm0, %v5952_v44  ;;  %5985 = vst.msk [vmem:[%s10350_s16 + $0x90] sm:$0xff] %vm418_vm0, %v5953_v57 }
 0x8f5   : > { %5986 = vst.msk [vmem:[%s10350_s16 + $0x98] sm:$0xff] %vm418_vm0, %v5954_v60  ;;  %5987 = vst.msk [vmem:[%s10350_s16 + $0xa0] sm:$0xff] %vm418_vm0, %v5955_v40  ;;  %p8190_p13 = pneg %p8189_p12 }
 0x8f6   : > { %5988 = vst.msk [vmem:[%s10350_s16 + $0xa8] sm:$0xff] %vm418_vm0, %v5956_v27  ;;  %5989 = vst.msk [vmem:[%s10350_s16 + $0xb0] sm:$0xff] %vm418_vm0, %v5957_v28 }
 0x8f7   : > { %5990 = vst.msk [vmem:[%s10350_s16 + $0xb8] sm:$0xff] %vm418_vm0, %v5958_v35  ;;  %5991 = vst.msk [vmem:[%s10350_s16 + $0xc0] sm:$0xff] %vm418_vm0, %v5959_v37  ;;  %p8197_p3 = pnand %p8196_p2, %p8190_p13 }
 0x8f8   : > { %5992 = vst.msk [vmem:[%s10350_s16 + $0xc8] sm:$0xff] %vm418_vm0, %v5960_v5  ;;  %5993 = vst.msk [vmem:[%s10350_s16 + $0xd0] sm:$0xff] %vm418_vm0, %v5961_v3 }
 0x8f9   : > { %5994 = vst.msk [vmem:[%s10350_s16 + $0xd8] sm:$0xff] %vm418_vm0, %v5962_v55  ;;  %5995 = vst.msk [vmem:[%s10350_s16 + $0xe0] sm:$0xff] %vm418_vm0, %v5963_v18 }
 0x8fa   : > { %5996 = vst.msk [vmem:[%s10350_s16 + $0xe8] sm:$0xff] %vm418_vm0, %v5964_v15  ;;  %5997 = vst.msk [vmem:[%s10350_s16 + $0xf0] sm:$0xff] %vm418_vm0, %v5965_v17 }
 0x8fb   : > { %5998 = vst.msk [vmem:[%s10350_s16 + $0xf8] sm:$0xff] %vm418_vm0, %v5966_v49 }
 0x8fc   : > { %8200 = shalt.err (!%p8197_p3)
}
 0x8fd   : > { %s8201_s13 = scalar_lea.hbm %s10424_s30, 4096  ;;  %s8205_s29 = scalar_lea.hbm %s10516_s11, 8192 }
 0x8fe   : > { %p8202_p4 = scmp.ne.s32.totalorder %s10424_s30, %s8201_s13  ;;  %p8206_p9 = scmp.lt.u32.totalorder %s10424_s30, %s10516_s11 }
 0x8ff   : > { %p8207_p10 = scmp.lt.u32.totalorder %s8205_s29, %s8201_s13  ;;  %p8209_p12 = scmp.lt.u32.totalorder %s8201_s13, %s10424_s30 }
 0x900   : > { %p8203_p7 = pnand %p8202_p4, %p8355_p5 }
 0x901   : > { %p8208_p11 = por %p8207_p10, %p8206_p9 }
 0x902   : > { %p8204_p8 = pneg %p8203_p7 }
 0x903   : > { %p8210_p13 = por %p8209_p12, %p8208_p11 }
 0x905   : > { %p8211_p0 = pnand %p8210_p13, %p8204_p8 }
 0x907   : > { %8214 = shalt.err (!%p8211_p0)
}
 0x908   : > { %s8255_s14 = smov 128   ;;  %s8256_s22 = smov 8  }
 0x909   : > { %7997 = dma.vmem_to_hbm [thread:$0]  (%p8355_p5), %s10428_s24, 4096, %s10424_s30, %s10464_s21, %s8255_s14, %s8255_s14, %s8256_s22  }
 0x90a PF: > { %p8003_p1 = scmp.ge.s32.totalorder %s8249_s20, 2  ;;  %s6028_s16 = sand.u32 1, %s8237_s17  }
 0x90b   : > { %s6029_s13 = scalar_lea.sflag [#allocation3], %s6028_s16 }
 0x90c   : > { %p8000_p2 = pnand %p8003_p1, %p8359_p6 }
 0x90e   : > { %8232 = dma.done.wait (!%p8000_p2), %s6029_s13, 4096  }
 0x90f   : > { %8234 = vsyncadd (!%p8000_p2), %s6029_s13, 4294963200  ;;  %p21_p3 = scmp.ge.s32.totalorder %s8342_s23, 4   ;;  %s10584_s17 = smov %s8241_s18 }
 0x910   : > { %s10585_s18 = smov %s8245_s19  ;;  %s10586_s19 = smov %s8353_s26 }
 0x911   : > { %s10587_s20 = smov %s8342_s23  ;;  %23 = sbr.rel (!%p21_p3) target bundleno = 3 (0x3), region = 115 }
 0x918   :  { %6034 = vsyncpa [#allocation3], 1 }
 0x919   :  { %6036 = vsyncpa [#allocation3 + $0x1], 1 }

</bundles_post_ra>
